<compile_context>
chip_gen: v6e
topology: v6e:2x2x1
jax: 0.10.0
libtpu: 0.0.40
codegen_flags: <defaults>
</compile_context>

<pallas_src>
import functools

import jax
import jax.numpy as jnp
from jax.experimental import pallas as pl
from jax.experimental.pallas import tpu as pltpu

LATENT = 100
LATENT_PAD = 128          # 100 -> 128 (lane-dense K for the first matmul)
OUT = 28 * 28             # 784 (6*128 + 16; stored directly, tail lanes masked)
HID = (256, 512, 1024)


def _round_up(x, m):
    return (x + m - 1) // m * m


def _default_block_batch():
    """Per-chip batch-tile cap: 256 on v5e, 512 on v6e/v7x and anything newer."""
    try:
        kind = jax.devices()[0].device_kind.lower()
    except Exception:  # pragma: no cover - CPU fallback
        return 512
    if "v5e" in kind or "v5 lite" in kind or "v5lite" in kind:
        return 256
    return 512


def _choose_tb(batch, block_batch):
    """Pick the batch tile.

    * multiple of 16 (bf16 sublane packing), multiple of 256 for large batches
    * >= 2 grid steps whenever the batch allows it (v7x has 2 TensorCores)
    * capped at the per-chip block_batch
    """
    if batch < 2 * 256:
        return min(block_batch, _round_up(batch, 16))
    half = (batch + 1) // 2
    return min(block_batch, _round_up(half, 256))


def generator_kernel(x_ref,
                     w1_ref, b1_ref,
                     w2_ref, b2_ref,
                     w3_ref, b3_ref,
                     w4_ref, b4_ref,
                     o_ref):
    """One batch tile of the fused 4-layer MLP.

    x_ref: (TB, 128) bf16; weights bf16; biases f32 (1, N); o_ref: (TB, 784) bf16.
    Matmuls run on the MXU with f32 accumulation; elementwise math stays f32.
    """
    cdt = w1_ref.dtype

    h = jnp.dot(x_ref[...], w1_ref[...], preferred_element_type=jnp.float32)
    h = h + b1_ref[...]
    h = jnp.maximum(h, 0.2 * h)                      # LeakyReLU(0.2)

    h = jnp.dot(h.astype(cdt), w2_ref[...], preferred_element_type=jnp.float32)
    h = h + b2_ref[...]
    h = jnp.maximum(h, 0.2 * h)

    h = jnp.dot(h.astype(cdt), w3_ref[...], preferred_element_type=jnp.float32)
    h = h + b3_ref[...]
    h = jnp.maximum(h, 0.2 * h)

    h = jnp.dot(h.astype(cdt), w4_ref[...], preferred_element_type=jnp.float32)
    h = h + b4_ref[...]
    o_ref[...] = jnp.tanh(h).astype(o_ref.dtype)


@functools.partial(jax.jit, static_argnames=("block_batch",))
def generator_forward(x, params, *, block_batch=None):
    """x: (B, 100) float32.  Returns (B, 1, 28, 28) float32 (NCHW), matching
    the PyTorch module's .view(-1, 1, 28, 28)."""
    B = x.shape[0]
    if block_batch is None:
        block_batch = _default_block_batch()
    compute_dtype = jnp.bfloat16
    (w1, b1), (w2, b2), (w3, b3), (w4, b4) = params

    # --- layout / dtype prep (zero-padding only: numerically identical) ------
    w1_p = jnp.pad(w1, ((0, LATENT_PAD - LATENT), (0, 0))).astype(compute_dtype)
    w2_p = w2.astype(compute_dtype)
    w3_p = w3.astype(compute_dtype)
    w4_p = w4.astype(compute_dtype)
    b1_p = b1.astype(jnp.float32)
    b2_p = b2.astype(jnp.float32)
    b3_p = b3.astype(jnp.float32)
    b4_p = b4.astype(jnp.float32)

    TB = _choose_tb(B, block_batch)
    B_pad = _round_up(B, TB)
    grid = (B_pad // TB,)

    x_p = jnp.pad(x, ((0, B_pad - B), (0, LATENT_PAD - LATENT))).astype(compute_dtype)

    # Weights/biases: constant block index -> DMA'd once, VMEM-resident across
    # grid steps; single pipeline buffer (no point double-buffering constants).
    def const_spec(shape):
        return pl.BlockSpec(shape, lambda i: (0, 0), pipeline_mode=pl.Buffered(1))

    d1, d2, d3 = HID
    flops = 2 * B_pad * (LATENT_PAD * d1 + d1 * d2 + d2 * d3 + d3 * OUT)
    weight_bytes = sum(int(a.size) * a.dtype.itemsize
                       for a in (w1_p, w2_p, w3_p, w4_p, b1_p, b2_p, b3_p, b4_p))
    bytes_accessed = weight_bytes + B_pad * (LATENT_PAD * 2 + OUT * 2)

    out = pl.pallas_call(
        generator_kernel,
        out_shape=jax.ShapeDtypeStruct((B_pad, OUT), jnp.bfloat16),
        grid=grid,
        in_specs=[
            pl.BlockSpec((TB, LATENT_PAD), lambda i: (i, 0)),   # x tile
            const_spec(w1_p.shape), const_spec(b1_p.shape),
            const_spec(w2_p.shape), const_spec(b2_p.shape),
            const_spec(w3_p.shape), const_spec(b3_p.shape),
            const_spec(w4_p.shape), const_spec(b4_p.shape),
        ],
        out_specs=pl.BlockSpec((TB, OUT), lambda i: (i, 0)),
        compiler_params=pltpu.CompilerParams(
            dimension_semantics=("parallel",),
            vmem_limit_bytes=40 * 1024 * 1024,
        ),
        cost_estimate=pl.CostEstimate(
            flops=flops,
            transcendentals=B_pad * OUT,
            bytes_accessed=bytes_accessed,
        ),
    )(x_p, w1_p, b1_p, w2_p, b2_p, w3_p, b3_p, w4_p, b4_p)

    # Glue: drop batch padding, upcast to f32, reshape like .view(-1, 1, 28, 28).
    return out[:B].astype(jnp.float32).reshape(B, 1, 28, 28)


def init_params(key):
    """Deterministic init mimicking PyTorch Linear default (uniform +/- 1/sqrt(fan_in)).
    Weights stored as (in_features, out_features), biases as (1, out_features)."""
    dims = [(LATENT, HID[0]), (HID[0], HID[1]), (HID[1], HID[2]), (HID[2], OUT)]
    params = []
    for fan_in, fan_out in dims:
        key, kw, kb = jax.random.split(key, 3)
        bound = 1.0 / jnp.sqrt(fan_in)
        w = jax.random.uniform(kw, (fan_in, fan_out), jnp.float32, -bound, bound)
        b = jax.random.uniform(kb, (1, fan_out), jnp.float32, -bound, bound)
        params.append((w, b))
    return params


def reference_forward_mirror(x, params):
    """Pure-JAX reference mirroring the kernel's bf16 numerics (weights,
    activations and output) exactly."""
    cdt = jnp.bfloat16
    h = x.astype(cdt)
    for i, (w, b) in enumerate(params):
        h = jnp.dot(h, w.astype(cdt), preferred_element_type=jnp.float32) + b
        if i < 3:
            h = jnp.maximum(h, 0.2 * h).astype(cdt)
        else:
            h = jnp.tanh(h).astype(cdt).astype(jnp.float32)
    return h.reshape(-1, 1, 28, 28)


def reference_forward_f32(x, params):
    """Pure-f32 reference matching the PyTorch module semantics."""
    h = x
    for i, (w, b) in enumerate(params):
        h = h @ w + b
        h = jnp.where(h > 0, h, 0.2 * h) if i < 3 else jnp.tanh(h)
    return h.reshape(-1, 1, 28, 28)


if __name__ == "__main__":
    key = jax.random.PRNGKey(0)
    kp, kx = jax.random.split(key)

    params = init_params(kp)

    B = 8  # small batch; latent dim fixed at 100 by the module
    x = jax.random.normal(kx, (B, 100), jnp.float32)

    out = generator_forward(x, params)
    out = jax.block_until_ready(out)
    assert out.shape == (B, 1, 28, 28), out.shape

    # Check against a reference with identical bf16 numerics.
    ref_mirror = reference_forward_mirror(x, params)
    assert jnp.allclose(out, ref_mirror, atol=5e-3, rtol=1e-2), (
        "mismatch vs bf16-mirror reference: "
        f"max abs diff {float(jnp.max(jnp.abs(out - ref_mirror)))}")

    # Semantic check against the full-f32 PyTorch-equivalent forward
    # (tolerance loosened for bf16 weight/activation/output quantization).
    ref_f32 = reference_forward_f32(x, params)
    assert jnp.allclose(out, ref_f32, atol=2.5e-2, rtol=2e-2), (
        "mismatch vs f32 reference: "
        f"max abs diff {float(jnp.max(jnp.abs(out - ref_f32)))}")

    print("KERNEL_OK")
</pallas_src>

<mosaic_0001>
module attributes {stable_mosaic.version = 11 : i64} {
  func.func @generator_kernel(%arg0: i32, %arg1: memref<16x128xbf16, #tpu.memory_space<vmem>>, %arg2: memref<128x256xbf16, #tpu.memory_space<vmem>>, %arg3: memref<1x256xf32, #tpu.memory_space<vmem>>, %arg4: memref<256x512xbf16, #tpu.memory_space<vmem>>, %arg5: memref<1x512xf32, #tpu.memory_space<vmem>>, %arg6: memref<512x1024xbf16, #tpu.memory_space<vmem>>, %arg7: memref<1x1024xf32, #tpu.memory_space<vmem>>, %arg8: memref<1024x784xbf16, #tpu.memory_space<vmem>>, %arg9: memref<1x784xf32, #tpu.memory_space<vmem>>, %arg10: memref<16x784xbf16, #tpu.memory_space<vmem>>) attributes {dimension_semantics = [#tpu.dimension_semantics<parallel>], iteration_bounds = array<i64: 1>, scalar_prefetch = 0 : i64, scratch_operands = 0 : i64, tpu.core_type = #tpu.core_type<tc>, window_params = [{transform_indices = @transform_0, window_bounds = array<i64: 16, 128>}, {pipeline_mode = #tpu.pipeline_mode<synchronous>, transform_indices = @transform_1, window_bounds = array<i64: 128, 256>}, {pipeline_mode = #tpu.pipeline_mode<synchronous>, transform_indices = @transform_2, window_bounds = array<i64: 1, 256>}, {pipeline_mode = #tpu.pipeline_mode<synchronous>, transform_indices = @transform_3, window_bounds = array<i64: 256, 512>}, {pipeline_mode = #tpu.pipeline_mode<synchronous>, transform_indices = @transform_4, window_bounds = array<i64: 1, 512>}, {pipeline_mode = #tpu.pipeline_mode<synchronous>, transform_indices = @transform_5, window_bounds = array<i64: 512, 1024>}, {pipeline_mode = #tpu.pipeline_mode<synchronous>, transform_indices = @transform_6, window_bounds = array<i64: 1, 1024>}, {pipeline_mode = #tpu.pipeline_mode<synchronous>, transform_indices = @transform_7, window_bounds = array<i64: 1024, 784>}, {pipeline_mode = #tpu.pipeline_mode<synchronous>, transform_indices = @transform_8, window_bounds = array<i64: 1, 784>}, {transform_indices = @transform_9, window_bounds = array<i64: 16, 784>}]} {
    %c0 = arith.constant 0 : index
    %c0_0 = arith.constant 0 : index
    %0 = vector.load %arg1[%c0, %c0_0] : memref<16x128xbf16, #tpu.memory_space<vmem>>, vector<16x128xbf16>
    %c0_1 = arith.constant 0 : index
    %c0_2 = arith.constant 0 : index
    %1 = vector.load %arg2[%c0_1, %c0_2] : memref<128x256xbf16, #tpu.memory_space<vmem>>, vector<128x256xbf16>
    %cst = arith.constant dense<0.000000e+00> : vector<16x256xf32>
    %2 = tpu.matmul %0, %1, %cst {dimension_numbers = #tpu.dot_dimension_numbers<[1], [0], [0], [1], [0, 0, 1, 1], [], []>} : vector<16x128xbf16>, vector<128x256xbf16>, vector<16x256xf32> -> vector<16x256xf32>
    %c0_3 = arith.constant 0 : index
    %c0_4 = arith.constant 0 : index
    %3 = vector.load %arg3[%c0_3, %c0_4] : memref<1x256xf32, #tpu.memory_space<vmem>>, vector<1x256xf32>
    %4 = vector.broadcast %3 : vector<1x256xf32> to vector<16x256xf32>
    %5 = arith.addf %2, %4 : vector<16x256xf32>
    %cst_5 = arith.constant 2.000000e-01 : f32
    %6 = vector.broadcast %cst_5 : f32 to vector<16x256xf32>
    %7 = arith.mulf %6, %5 : vector<16x256xf32>
    %8 = arith.maximumf %5, %7 : vector<16x256xf32>
    %9 = arith.truncf %8 : vector<16x256xf32> to vector<16x256xbf16>
    %c0_6 = arith.constant 0 : index
    %c0_7 = arith.constant 0 : index
    %10 = vector.load %arg4[%c0_6, %c0_7] : memref<256x512xbf16, #tpu.memory_space<vmem>>, vector<256x512xbf16>
    %cst_8 = arith.constant dense<0.000000e+00> : vector<16x512xf32>
    %11 = tpu.matmul %9, %10, %cst_8 {dimension_numbers = #tpu.dot_dimension_numbers<[1], [0], [0], [1], [0, 0, 1, 1], [], []>} : vector<16x256xbf16>, vector<256x512xbf16>, vector<16x512xf32> -> vector<16x512xf32>
    %c0_9 = arith.constant 0 : index
    %c0_10 = arith.constant 0 : index
    %12 = vector.load %arg5[%c0_9, %c0_10] : memref<1x512xf32, #tpu.memory_space<vmem>>, vector<1x512xf32>
    %13 = vector.broadcast %12 : vector<1x512xf32> to vector<16x512xf32>
    %14 = arith.addf %11, %13 : vector<16x512xf32>
    %cst_11 = arith.constant 2.000000e-01 : f32
    %15 = vector.broadcast %cst_11 : f32 to vector<16x512xf32>
    %16 = arith.mulf %15, %14 : vector<16x512xf32>
    %17 = arith.maximumf %14, %16 : vector<16x512xf32>
    %18 = arith.truncf %17 : vector<16x512xf32> to vector<16x512xbf16>
    %c0_12 = arith.constant 0 : index
    %c0_13 = arith.constant 0 : index
    %19 = vector.load %arg6[%c0_12, %c0_13] : memref<512x1024xbf16, #tpu.memory_space<vmem>>, vector<512x1024xbf16>
    %cst_14 = arith.constant dense<0.000000e+00> : vector<16x1024xf32>
    %20 = tpu.matmul %18, %19, %cst_14 {dimension_numbers = #tpu.dot_dimension_numbers<[1], [0], [0], [1], [0, 0, 1, 1], [], []>} : vector<16x512xbf16>, vector<512x1024xbf16>, vector<16x1024xf32> -> vector<16x1024xf32>
    %c0_15 = arith.constant 0 : index
    %c0_16 = arith.constant 0 : index
    %21 = vector.load %arg7[%c0_15, %c0_16] : memref<1x1024xf32, #tpu.memory_space<vmem>>, vector<1x1024xf32>
    %22 = vector.broadcast %21 : vector<1x1024xf32> to vector<16x1024xf32>
    %23 = arith.addf %20, %22 : vector<16x1024xf32>
    %cst_17 = arith.constant 2.000000e-01 : f32
    %24 = vector.broadcast %cst_17 : f32 to vector<16x1024xf32>
    %25 = arith.mulf %24, %23 : vector<16x1024xf32>
    %26 = arith.maximumf %23, %25 : vector<16x1024xf32>
    %27 = arith.truncf %26 : vector<16x1024xf32> to vector<16x1024xbf16>
    %c0_18 = arith.constant 0 : index
    %c0_19 = arith.constant 0 : index
    %28 = vector.load %arg8[%c0_18, %c0_19] : memref<1024x784xbf16, #tpu.memory_space<vmem>>, vector<1024x784xbf16>
    %cst_20 = arith.constant dense<0.000000e+00> : vector<16x784xf32>
    %29 = tpu.matmul %27, %28, %cst_20 {dimension_numbers = #tpu.dot_dimension_numbers<[1], [0], [0], [1], [0, 0, 1, 1], [], []>} : vector<16x1024xbf16>, vector<1024x784xbf16>, vector<16x784xf32> -> vector<16x784xf32>
    %c0_21 = arith.constant 0 : index
    %c0_22 = arith.constant 0 : index
    %30 = vector.load %arg9[%c0_21, %c0_22] : memref<1x784xf32, #tpu.memory_space<vmem>>, vector<1x784xf32>
    %31 = vector.broadcast %30 : vector<1x784xf32> to vector<16x784xf32>
    %32 = arith.addf %29, %31 : vector<16x784xf32>
    %33 = math.tanh %32 : vector<16x784xf32>
    %34 = arith.truncf %33 : vector<16x784xf32> to vector<16x784xbf16>
    %c0_23 = arith.constant 0 : index
    %c0_24 = arith.constant 0 : index
    %35 = vector.load %arg10[%c0_23, %c0_24] : memref<16x784xbf16, #tpu.memory_space<vmem>>, vector<16x784xbf16>
    tpu.vector_store %arg10[%c0_23, %c0_24], %34 {strides = array<i32>} : memref<16x784xbf16, #tpu.memory_space<vmem>>, vector<16x784xbf16>,
    return
  }
  func.func @transform_0(%arg0: i32) -> (i32, i32) {
    %c0_i32 = arith.constant 0 : i32
    %c0_i32_0 = arith.constant 0 : i32
    return %arg0, %c0_i32 : i32, i32
  }
  func.func @transform_1(%arg0: i32) -> (i32, i32) {
    %c0_i32 = arith.constant 0 : i32
    %c0_i32_0 = arith.constant 0 : i32
    %c0_i32_1 = arith.constant 0 : i32
    return %c0_i32, %c0_i32_0 : i32, i32
  }
  func.func @transform_2(%arg0: i32) -> (i32, i32) {
    %c0_i32 = arith.constant 0 : i32
    %c0_i32_0 = arith.constant 0 : i32
    %c0_i32_1 = arith.constant 0 : i32
    return %c0_i32, %c0_i32_0 : i32, i32
  }
  func.func @transform_3(%arg0: i32) -> (i32, i32) {
    %c0_i32 = arith.constant 0 : i32
    %c0_i32_0 = arith.constant 0 : i32
    %c0_i32_1 = arith.constant 0 : i32
    return %c0_i32, %c0_i32_0 : i32, i32
  }
  func.func @transform_4(%arg0: i32) -> (i32, i32) {
    %c0_i32 = arith.constant 0 : i32
    %c0_i32_0 = arith.constant 0 : i32
    %c0_i32_1 = arith.constant 0 : i32
    return %c0_i32, %c0_i32_0 : i32, i32
  }
  func.func @transform_5(%arg0: i32) -> (i32, i32) {
    %c0_i32 = arith.constant 0 : i32
    %c0_i32_0 = arith.constant 0 : i32
    %c0_i32_1 = arith.constant 0 : i32
    return %c0_i32, %c0_i32_0 : i32, i32
  }
  func.func @transform_6(%arg0: i32) -> (i32, i32) {
    %c0_i32 = arith.constant 0 : i32
    %c0_i32_0 = arith.constant 0 : i32
    %c0_i32_1 = arith.constant 0 : i32
    return %c0_i32, %c0_i32_0 : i32, i32
  }
  func.func @transform_7(%arg0: i32) -> (i32, i32) {
    %c0_i32 = arith.constant 0 : i32
    %c0_i32_0 = arith.constant 0 : i32
    %c0_i32_1 = arith.constant 0 : i32
    return %c0_i32, %c0_i32_0 : i32, i32
  }
  func.func @transform_8(%arg0: i32) -> (i32, i32) {
    %c0_i32 = arith.constant 0 : i32
    %c0_i32_0 = arith.constant 0 : i32
    %c0_i32_1 = arith.constant 0 : i32
    return %c0_i32, %c0_i32_0 : i32, i32
  }
  func.func @transform_9(%arg0: i32) -> (i32, i32) {
    %c0_i32 = arith.constant 0 : i32
    %c0_i32_0 = arith.constant 0 : i32
    return %arg0, %c0_i32 : i32, i32
  }
}

</mosaic_0001>

<bundles_post_ra>
// kernel: generator_forward.1
= control target key start
LH: loop header
LB: loop body
LE: loop exit
PB: predicated region body
PF: predicated region fallthrough
CT: control target
= control target key end

     0   :  { %v7960_v1 = vmov 0   ;;  %vm6270_vm0 = vcmask 125952   ;;  %s10570_s1 = inlined_call_operand.vmem [shape: bf16[128,256], index: 1, kind: input, shape index: {}]   ;;  %s10571_s0 = inlined_call_operand.vmem [shape: bf16[16,128], index: 0, kind: input, shape index: {}]   ;;  %s10572_s3 = inlined_call_operand.vmem [shape: bf16[256,512], index: 3, kind: input, shape index: {}]   ;;  %s10573_s5 = inlined_call_operand.vmem [shape: bf16[512,1024], index: 5, kind: input, shape index: {}]   ;;  %s10574_s2 = inlined_call_operand.vmem [shape: f32[1,256], index: 2, kind: input, shape index: {}]   ;;  %s10575_s4 = inlined_call_operand.vmem [shape: f32[1,512], index: 4, kind: input, shape index: {}]   ;;  %s10576_s7 = inlined_call_operand.vmem [shape: bf16[1024,784], index: 7, kind: input, shape index: {}]   ;;  %s10577_s6 = inlined_call_operand.vmem [shape: f32[1,1024], index: 6, kind: input, shape index: {}]   ;;  %s10578_s8 = inlined_call_operand.vmem [shape: f32[1,784], index: 8, kind: input, shape index: {}]   ;;  %s10579_s9 = inlined_call_operand.vmem [shape: bf16[16,784], index: 9, kind: output, shape index: {}]  }
   0x1   :  { %v7170_v0 = vld [vmem:[%s10570_s1 + $0x74] ss:$8 sps:$4 sm:$0xff]   ;;  %181 = vmatprep.mubr.bf16.mxu0 %v7960_v1  ;;  %v7172_v2 = vld [vmem:[%s10570_s1 + $0x70] ss:$8 sps:$4 sm:$0xff]   ;;  %v7173_v3 = vld [vmem:[%s10570_s1 + $0x64] ss:$8 sps:$4 sm:$0xff]  }
   0x2   :  { %149 = vmatprep.subr.bf16.mxu0 %v7170_v0  ;;  %v7175_v4 = vld [vmem:[%s10570_s1 + $0x60] ss:$8 sps:$4 sm:$0xff]   ;;  %v7176_v5 = vld [vmem:[%s10570_s1 + $0x54] ss:$8 sps:$4 sm:$0xff]   ;;  %v7178_v6 = vld [vmem:[%s10570_s1 + $0x50] ss:$8 sps:$4 sm:$0xff]  }
   0x3   :  { %150 = vmatpush1.bf16.msra.mxu0 %v7172_v2  ;;  %v7179_v7 = vld [vmem:[%s10570_s1 + $0x44] ss:$8 sps:$4 sm:$0xff]   ;;  %v7181_v8 = vld [vmem:[%s10570_s1 + $0x40] ss:$8 sps:$4 sm:$0xff]   ;;  %v7182_v9 = vld [vmem:[%s10570_s1 + $0x34] ss:$8 sps:$4 sm:$0xff]  }
   0x4   :  { %151 = vmatprep.subr.bf16.mxu0 %v7173_v3  ;;  %v7195_v10 = vld [vmem:[%s10572_s3 + $0xe4] ss:$16 sps:$4 sm:$0xff]   ;;  %v7184_v11 = vld [vmem:[%s10570_s1 + $0x30] ss:$8 sps:$4 sm:$0xff]   ;;  %v7187_v17 = vld [vmem:[%s10570_s1 + $0x20] ss:$8 sps:$4 sm:$0xff]  }
   0x5   :  { %608 = vmatprep.subr.bf16.mxu1 %v7195_v10  ;;  %v7200_v12 = vld [vmem:[%s10572_s3 + $0xe0] ss:$16 sps:$4 sm:$0xff]   ;;  %v7201_v13 = vld [vmem:[%s10572_s3 + $0xc4] ss:$16 sps:$4 sm:$0xff]   ;;  %v7199_v26 = vld [vmem:[%s10572_s3 + $0xec] ss:$16 sps:$4 sm:$0xff]  }
   0x6   :  { %v7185_v14 = vld [vmem:[%s10570_s1 + $0x24] ss:$8 sps:$4 sm:$0xff]   ;;  %609 = vmatpush1.bf16.msra.mxu1 %v7200_v12  ;;  %v7206_v15 = vld [vmem:[%s10572_s3 + $0xc0] ss:$16 sps:$4 sm:$0xff]   ;;  %v7188_v18 = vld [vmem:[%s10570_s1 + $0x14] ss:$8 sps:$4 sm:$0xff]  }
   0x7   :  { %152 = vmatpush1.bf16.msra.mxu0 %v7175_v4  ;;  %610 = vmatprep.subr.bf16.mxu1 %v7201_v13  ;;  %v7207_v16 = vld [vmem:[%s10572_s3 + $0xa4] ss:$16 sps:$4 sm:$0xff]   ;;  %v7212_v19 = vld [vmem:[%s10572_s3 + $0xa0] ss:$16 sps:$4 sm:$0xff]   ;;  %v7197_v30 = vld [vmem:[%s10572_s3 + $0xe8] ss:$16 sps:$4 sm:$0xff]  }
   0x8   :  { %153 = vmatprep.subr.bf16.mxu0 %v7176_v5  ;;  %v7213_v20 = vld [vmem:[%s10572_s3 + $0x84] ss:$16 sps:$4 sm:$0xff]   ;;  %v7190_v21 = vld [vmem:[%s10570_s1 + $0x10] ss:$8 sps:$4 sm:$0xff]   ;;  %v7193_v25 = vld [vmem:[%s10570_s1] ss:$8 sps:$4 sm:$0xff]  }
   0x9   :  { %v7191_v22 = vld [vmem:[%s10570_s1 + $0x4] ss:$8 sps:$4 sm:$0xff]   ;;  %v7218_v23 = vld [vmem:[%s10572_s3 + $0x80] ss:$16 sps:$4 sm:$0xff]   ;;  %v7203_v34 = vld [vmem:[%s10572_s3 + $0xc8] ss:$16 sps:$4 sm:$0xff]  }
   0xa   :  { %611 = vmatpush1.bf16.msra.mxu1 %v7206_v15  ;;  %v7219_v24 = vld [vmem:[%s10572_s3 + $0x64] ss:$16 sps:$4 sm:$0xff]   ;;  %v7224_v27 = vld [vmem:[%s10572_s3 + $0x60] ss:$16 sps:$4 sm:$0xff]   ;;  %v7205_v31 = vld [vmem:[%s10572_s3 + $0xcc] ss:$16 sps:$4 sm:$0xff]  }
   0xb   :  { %154 = vmatpush1.bf16.msra.mxu0 %v7178_v6  ;;  %612 = vmatprep.subr.bf16.mxu1 %v7207_v16  ;;  %v7225_v28 = vld [vmem:[%s10572_s3 + $0x44] ss:$16 sps:$4 sm:$0xff]   ;;  %v7230_v32 = vld [vmem:[%s10572_s3 + $0x40] ss:$16 sps:$4 sm:$0xff]   ;;  %v7211_v35 = vld [vmem:[%s10572_s3 + $0xac] ss:$16 sps:$4 sm:$0xff]  }
   0xc   :  { %155 = vmatprep.subr.bf16.mxu0 %v7179_v7  ;;  %v7194_v29 = vld [vmem:[%s10571_s0] sm:$0xff]   ;;  %v7209_v38 = vld [vmem:[%s10572_s3 + $0xa8] ss:$16 sps:$4 sm:$0xff]   ;;  %v7217_v39 = vld [vmem:[%s10572_s3 + $0x8c] ss:$16 sps:$4 sm:$0xff]  }
   0xd   :  { %v7231_v33 = vld [vmem:[%s10572_s3 + $0x24] ss:$16 sps:$4 sm:$0xff]   ;;  %v7236_v36 = vld [vmem:[%s10572_s3 + $0x20] ss:$16 sps:$4 sm:$0xff]   ;;  %v7215_v42 = vld [vmem:[%s10572_s3 + $0x88] ss:$16 sps:$4 sm:$0xff]  }
   0xe   :  { %613 = vmatpush1.bf16.msra.mxu1 %v7212_v19  ;;  %v7237_v37 = vld [vmem:[%s10572_s3 + $0x4] ss:$16 sps:$4 sm:$0xff]   ;;  %v7242_v40 = vld [vmem:[%s10572_s3] ss:$16 sps:$4 sm:$0xff]   ;;  %v7223_v43 = vld [vmem:[%s10572_s3 + $0x6c] ss:$16 sps:$4 sm:$0xff]  }
   0xf   :  { %156 = vmatpush1.bf16.msra.mxu0 %v7181_v8  ;;  %614 = vmatprep.subr.bf16.mxu1 %v7213_v20  ;;  %v7243_v41 = vld [vmem:[%s10572_s3 + $0x1e4] ss:$16 sps:$4 sm:$0xff]   ;;  %v7248_v44 = vld [vmem:[%s10572_s3 + $0x1e0] ss:$16 sps:$4 sm:$0xff]   ;;  %v7221_v46 = vld [vmem:[%s10572_s3 + $0x68] ss:$16 sps:$4 sm:$0xff]  }
  0x10   :  { %157 = vmatprep.subr.bf16.mxu0 %v7182_v9  ;;  %v7249_v45 = vld [vmem:[%s10572_s3 + $0x1c4] ss:$16 sps:$4 sm:$0xff]   ;;  %v7229_v47 = vld [vmem:[%s10572_s3 + $0x4c] ss:$16 sps:$4 sm:$0xff]   ;;  %v7254_v48 = vld [vmem:[%s10572_s3 + $0x1c0] ss:$16 sps:$4 sm:$0xff]  }
  0x11   :  { %v7255_v49 = vld [vmem:[%s10572_s3 + $0x1a4] ss:$16 sps:$4 sm:$0xff]   ;;  %v7227_v50 = vld [vmem:[%s10572_s3 + $0x48] ss:$16 sps:$4 sm:$0xff]   ;;  %v7235_v51 = vld [vmem:[%s10572_s3 + $0x2c] ss:$16 sps:$4 sm:$0xff]  }
  0x12   :  { %615 = vmatpush1.bf16.msra.mxu1 %v7218_v23  ;;  %v7260_v52 = vld [vmem:[%s10572_s3 + $0x1a0] ss:$16 sps:$4 sm:$0xff]   ;;  %v7261_v53 = vld [vmem:[%s10572_s3 + $0x184] ss:$16 sps:$4 sm:$0xff]   ;;  %v7233_v54 = vld [vmem:[%s10572_s3 + $0x28] ss:$16 sps:$4 sm:$0xff]  }
  0x13   :  { %158 = vmatpush1.bf16.msra.mxu0 %v7184_v11  ;;  %616 = vmatprep.subr.bf16.mxu1 %v7219_v24  ;;  %v7241_v55 = vld [vmem:[%s10572_s3 + $0xc] ss:$16 sps:$4 sm:$0xff]   ;;  %v7266_v56 = vld [vmem:[%s10572_s3 + $0x180] ss:$16 sps:$4 sm:$0xff]   ;;  %v7239_v57 = vld [vmem:[%s10572_s3 + $0x8] ss:$16 sps:$4 sm:$0xff]  }
  0x14   :  { %159 = vmatprep.subr.bf16.mxu0 %v7185_v14  ;;  %v7247_v58 = vld [vmem:[%s10572_s3 + $0x1ec] ss:$16 sps:$4 sm:$0xff]   ;;  %v7245_v59 = vld [vmem:[%s10572_s3 + $0x1e8] ss:$16 sps:$4 sm:$0xff]   ;;  %v7267_v2 = vld [vmem:[%s10572_s3 + $0x164] ss:$16 sps:$4 sm:$0xff]  }
  0x15   :  { %v7253_v60 = vld [vmem:[%s10572_s3 + $0x1cc] ss:$16 sps:$4 sm:$0xff]   ;;  %v7251_v61 = vld [vmem:[%s10572_s3 + $0x1c8] ss:$16 sps:$4 sm:$0xff]   ;;  %v7272_v5 = vld [vmem:[%s10572_s3 + $0x160] ss:$16 sps:$4 sm:$0xff]  }
  0x16   :  { %617 = vmatpush1.bf16.msra.mxu1 %v7224_v27  ;;  %v7259_v62 = vld [vmem:[%s10572_s3 + $0x1ac] ss:$16 sps:$4 sm:$0xff]   ;;  %v7257_v63 = vld [vmem:[%s10572_s3 + $0x1a8] ss:$16 sps:$4 sm:$0xff]   ;;  %v7273_v6 = vld [vmem:[%s10572_s3 + $0x144] ss:$16 sps:$4 sm:$0xff]  }
  0x17   :  { %160 = vmatpush1.bf16.msra.mxu0 %v7187_v17  ;;  %618 = vmatprep.subr.bf16.mxu1 %v7225_v28  ;;  %v7265_v0 = vld [vmem:[%s10572_s3 + $0x18c] ss:$16 sps:$4 sm:$0xff]   ;;  %v7263_v1 = vld [vmem:[%s10572_s3 + $0x188] ss:$16 sps:$4 sm:$0xff]   ;;  %v7278_v9 = vld [vmem:[%s10572_s3 + $0x140] ss:$16 sps:$4 sm:$0xff]  }
  0x18   :  { %161 = vmatprep.subr.bf16.mxu0 %v7188_v18  ;;  %v7271_v3 = vld [vmem:[%s10572_s3 + $0x16c] ss:$16 sps:$4 sm:$0xff]   ;;  %v7269_v4 = vld [vmem:[%s10572_s3 + $0x168] ss:$16 sps:$4 sm:$0xff]   ;;  %v7279_v10 = vld [vmem:[%s10572_s3 + $0x124] ss:$16 sps:$4 sm:$0xff]  }
  0x19   :  { %v7277_v7 = vld [vmem:[%s10572_s3 + $0x14c] ss:$16 sps:$4 sm:$0xff]   ;;  %v7275_v8 = vld [vmem:[%s10572_s3 + $0x148] ss:$16 sps:$4 sm:$0xff]   ;;  %v7284_v13 = vld [vmem:[%s10572_s3 + $0x120] ss:$16 sps:$4 sm:$0xff]  }
  0x1a   :  { %619 = vmatpush1.bf16.msra.mxu1 %v7230_v32  ;;  %v7283_v11 = vld [vmem:[%s10572_s3 + $0x12c] ss:$16 sps:$4 sm:$0xff]   ;;  %v7281_v12 = vld [vmem:[%s10572_s3 + $0x128] ss:$16 sps:$4 sm:$0xff]   ;;  %v7285_v14 = vld [vmem:[%s10572_s3 + $0x104] ss:$16 sps:$4 sm:$0xff]  }
  0x1b   :  { %162 = vmatpush1.bf16.msra.mxu0 %v7190_v21  ;;  %620 = vmatprep.subr.bf16.mxu1 %v7231_v33  ;;  %v7289_v15 = vld [vmem:[%s10572_s3 + $0x10c] ss:$16 sps:$4 sm:$0xff]   ;;  %v7287_v16 = vld [vmem:[%s10572_s3 + $0x108] ss:$16 sps:$4 sm:$0xff]   ;;  %v7290_v17 = vld [vmem:[%s10572_s3 + $0x100] ss:$16 sps:$4 sm:$0xff]  }
  0x1c   :  { %163 = vmatprep.subr.bf16.mxu0 %v7191_v22  ;;  %v770_v18 = vld [vmem:[%s10573_s5 + $0x1c0] sm:$0xff] }
  0x1d   :  { %v774_v19 = vld [vmem:[%s10573_s5 + $0x1e0] sm:$0xff] }
  0x1e   :  { %621 = vmatpush1.bf16.msra.mxu1 %v7236_v36  ;;  %v898_v20 = vld [vmem:[%s10573_s5 + $0x5c0] sm:$0xff]  ;;  %v6417_v21 = vcombine.low %v770_v18, %v774_v19  ;;  %v6418_v22 = vcombine.high %v770_v18, %v774_v19 }
  0x1f   :  { %164 = vmatpush1.bf16.msra.mxu0 %v7193_v25  ;;  %622 = vmatprep.subr.bf16.mxu1 %v7237_v37  ;;  %v902_v23 = vld [vmem:[%s10573_s5 + $0x5e0] sm:$0xff] }
  0x20   :  { %651 = vmatprep.subr.bf16.mxu0 %v7199_v26  ;;  %v6545_v24 = vcombine.low %v898_v20, %v902_v23  ;;  %v6546_v25 = vcombine.high %v898_v20, %v902_v23  ;;  %v53_v26 = vlaneseq  ;;  %v734_v18 = vld [vmem:[%s10573_s5 + $0xa0] sm:$0xff] }
  0x21   :  { %v858_v19 = vld [vmem:[%s10573_s5 + $0x480] sm:$0xff] }
  0x22   :  { %182 = vmatmul.mubr.bf16.vlgmr.msra.gmra.mxu0 %v7194_v29  ;;  %623 = vmatpush1.bf16.msra.mxu1 %v7242_v40  ;;  %v8266_v27 = vshrl.u32 %v53_v26, 7  ;;  %v862_v20 = vld [vmem:[%s10573_s5 + $0x4a0] sm:$0xff] }
  0x23   :  { %652 = vmatpush1.bf16.msra.mxu0 %v7197_v30  ;;  %624 = vmatprep.subr.bf16.mxu1 %v7243_v41  ;;  %v51_v30 = vld [vmem:[%s10574_s2] sm:$0x3] }
  0x24   :  { %653 = vmatprep.subr.bf16.mxu0 %v7205_v31  ;;  %v8269_v28 = vsub.s32 1, %v8266_v27  ;;  %v8272_v29 = vsub.s32 0, %v8266_v27  ;;  %v726_v26 = vld [vmem:[%s10573_s5 + $0x60] sm:$0xff] }
  0x26   :  { %625 = vmatpush2.bf16.msra.mxu1 %v7248_v44  ;;  %v60_v31 = vrot.slane %v51_v30, %v8269_v28  ;;  %v56_v32 = vrot.slane %v51_v30, %v8272_v29  ;;  %v850_v30 = vld [vmem:[%s10573_s5 + $0x440] sm:$0xff] }
  0x27   :  { %654 = vmatpush1.bf16.msra.mxu0 %v7203_v34  ;;  %626 = vmatprep.subr.bf16.mxu1 %v7249_v45 }
  0x28   :  { %655 = vmatprep.subr.bf16.mxu0 %v7211_v35 }
  0x2a   :  { %627 = vmatpush2.bf16.msra.mxu1 %v7254_v48 }
  0x2b   :  { %656 = vmatpush1.bf16.msra.mxu0 %v7209_v38  ;;  %628 = vmatprep.subr.bf16.mxu1 %v7255_v49  ;;  %v766_v49 = vld [vmem:[%s10573_s5 + $0x1a0] sm:$0xff] }
  0x2c   :  { %657 = vmatprep.subr.bf16.mxu0 %v7217_v39 }
  0x2e   :  { %629 = vmatpush2.bf16.msra.mxu1 %v7260_v52 }
  0x2f   :  { %658 = vmatpush1.bf16.msra.mxu0 %v7215_v42  ;;  %630 = vmatprep.subr.bf16.mxu1 %v7261_v53 }
  0x30   :  { %659 = vmatprep.subr.bf16.mxu0 %v7223_v43 }
  0x32   :  { %631 = vmatpush2.bf16.msra.mxu1 %v7266_v56 }
  0x33   :  { %660 = vmatpush1.bf16.msra.mxu0 %v7221_v46  ;;  %632 = vmatprep.subr.bf16.mxu1 %v7267_v2  ;;  %v762_v46 = vld [vmem:[%s10573_s5 + $0x180] sm:$0xff] }
  0x34   :  { %661 = vmatprep.subr.bf16.mxu0 %v7229_v47  ;;  %v750_v2 = vld [vmem:[%s10573_s5 + $0x120] sm:$0xff] }
  0x36   :  { %633 = vmatpush2.bf16.msra.mxu1 %v7272_v5 }
  0x37   :  { %662 = vmatpush1.bf16.msra.mxu0 %v7227_v50  ;;  %634 = vmatprep.subr.bf16.mxu1 %v7273_v6  ;;  %v890_v50 = vld [vmem:[%s10573_s5 + $0x580] sm:$0xff] }
  0x38   :  { %663 = vmatprep.subr.bf16.mxu0 %v7235_v51  ;;  %v894_v51 = vld [vmem:[%s10573_s5 + $0x5a0] sm:$0xff] }
  0x39   :  { %v6538_v56 = vcombine.high %v890_v50, %v894_v51 }
  0x3a   :  { %635 = vmatpush2.bf16.msra.mxu1 %v7278_v9  ;;  %v738_v9 = vld [vmem:[%s10573_s5 + $0xc0] sm:$0xff] }
  0x3b   :  { %664 = vmatpush1.bf16.msra.mxu0 %v7233_v54  ;;  %636 = vmatprep.subr.bf16.mxu1 %v7279_v10  ;;  %v742_v10 = vld [vmem:[%s10573_s5 + $0xe0] sm:$0xff] }
  0x3c   :  { %665 = vmatprep.subr.bf16.mxu0 %v7241_v55  ;;  %v6410_v55 = vcombine.high %v762_v46, %v766_v49 }
  0x3e   :  { %637 = vmatpush2.bf16.msra.mxu1 %v7284_v13 }
  0x3f   :  { %666 = vmatpush1.bf16.msra.mxu0 %v7239_v57  ;;  %638 = vmatprep.subr.bf16.mxu1 %v7285_v14  ;;  %v754_v57 = vld [vmem:[%s10573_s5 + $0x140] sm:$0xff] }
  0x40   :  { %667 = vmatprep.subr.bf16.mxu0 %v7247_v58  ;;  %v758_v58 = vld [vmem:[%s10573_s5 + $0x160] sm:$0xff] }
  0x41   :  { %v6401_v5 = vcombine.low %v754_v57, %v758_v58 }
  0x42   :  { %639 = vmatpush2.bf16.msra.mxu1 %v7290_v17  ;;  %v730_v17 = vld [vmem:[%s10573_s5 + $0x80] sm:$0xff] }
  0x43   :  { %668 = vmatpush2.bf16.msra.mxu0 %v7245_v59  ;;  %2292 = vmatprep.subr.bf16.mxu1 %v6418_v22  ;;  %v882_v59 = vld [vmem:[%s10573_s5 + $0x540] sm:$0xff]  ;;  %v6378_v23 = vcombine.high %v730_v17, %v734_v18 }
  0x44   :  { %669 = vmatprep.subr.bf16.mxu0 %v7253_v60  ;;  %v886_v60 = vld [vmem:[%s10573_s5 + $0x560] sm:$0xff] }
  0x45   :  { %v6529_v6 = vcombine.low %v882_v59, %v886_v60 }
  0x47   :  { %670 = vmatpush2.bf16.msra.mxu0 %v7251_v61  ;;  %v6409_v61 = vcombine.low %v762_v46, %v766_v49  ;;  %v962_v46 = vld [vmem:[%s10573_s5 + $0x7c0] sm:$0xff] }
  0x48   :  { %671 = vmatprep.subr.bf16.mxu0 %v7259_v62  ;;  %v6537_v62 = vcombine.low %v890_v50, %v894_v51 }
  0x4b   :  { %672 = vmatpush2.bf16.msra.mxu0 %v7257_v63  ;;  %v6402_v63 = vcombine.high %v754_v57, %v758_v58 }
  0x4c   :  { %673 = vmatprep.subr.bf16.mxu0 %v7265_v0  ;;  %v6530_v0 = vcombine.high %v882_v59, %v886_v60  ;;  %v818_v60 = vld [vmem:[%s10573_s5 + $0x340] sm:$0xff] }
  0x4f   :  { %674 = vmatpush2.bf16.msra.mxu0 %v7263_v1  ;;  %v746_v1 = vld [vmem:[%s10573_s5 + $0x100] sm:$0xff] }
  0x50   :  { %675 = vmatprep.subr.bf16.mxu0 %v7271_v3  ;;  %v874_v3 = vld [vmem:[%s10573_s5 + $0x500] sm:$0xff]  ;;  %v6393_v13 = vcombine.low %v746_v1, %v750_v2 }
  0x53   :  { %676 = vmatpush2.bf16.msra.mxu0 %v7269_v4  ;;  %v878_v4 = vld [vmem:[%s10573_s5 + $0x520] sm:$0xff] }
  0x54   :  { %677 = vmatprep.subr.bf16.mxu0 %v7277_v7  ;;  %v6394_v7 = vcombine.high %v746_v1, %v750_v2  ;;  %v6521_v14 = vcombine.low %v874_v3, %v878_v4 }
  0x57   :  { %678 = vmatpush2.bf16.msra.mxu0 %v7275_v8  ;;  %v6522_v8 = vcombine.high %v874_v3, %v878_v4  ;;  %v810_v4 = vld [vmem:[%s10573_s5 + $0x300] sm:$0xff] }
  0x58   :  { %679 = vmatprep.subr.bf16.mxu0 %v7283_v11  ;;  %v866_v11 = vld [vmem:[%s10573_s5 + $0x4c0] sm:$0xff] }
  0x5b   :  { %680 = vmatpush2.bf16.msra.mxu0 %v7281_v12  ;;  %v870_v12 = vld [vmem:[%s10573_s5 + $0x4e0] sm:$0xff] }
  0x5c   :  { %681 = vmatprep.subr.bf16.mxu0 %v7289_v15  ;;  %v6386_v15 = vcombine.high %v738_v9, %v742_v10  ;;  %v6513_v22 = vcombine.low %v866_v11, %v870_v12 }
  0x5f   :  { %682 = vmatpush2.bf16.msra.mxu0 %v7287_v16  ;;  %v6514_v16 = vcombine.high %v866_v11, %v870_v12  ;;  %v802_v12 = vld [vmem:[%s10573_s5 + $0x2c0] sm:$0xff] }
  0x60   :  { %2335 = vmatprep.subr.bf16.mxu0 %v6546_v25  ;;  %v722_v25 = vld [vmem:[%s10573_s5 + $0x40] sm:$0xff] }
  0xe2   :  { %v183_v33 = vpop.f32.mrf.mxu0 }
  0xe3   :  { %v184_v36 = vadd.f32 %v183_v33, %v56_v32  ;;  %v6505_v33 = vcombine.low %v858_v19, %v862_v20 }
  0xe4   :  { %v185_v34 = vpop.f32.mrf.mxu0 }
  0xe5   :  { %v186_v35 = vadd.f32 %v185_v34, %v60_v31  ;;  %v192_v43 = vmul.f32 0.2, %v184_v36  ;;  %v6370_v34 = vcombine.high %v722_v25, %v726_v26 }
  0xe6   :  { %v187_v37 = vpop.f32.mrf.mxu0 }
  0xe7   :  { %v188_v38 = vadd.f32 %v187_v37, %v56_v32  ;;  %v193_v40 = vmul.f32 0.2, %v186_v35  ;;  %v196_v52 = vmax.f32 %v184_v36, %v192_v43  ;;  %v6377_v32 = vcombine.low %v730_v17, %v734_v18  ;;  %v714_v36 = vld [vmem:[%s10573_s5] sm:$0xff] }
  0xe8   :  { %v189_v39 = vpop.f32.mrf.mxu0  ;;  %v718_v37 = vld [vmem:[%s10573_s5 + $0x20] sm:$0xff] }
  0xe9   :  { %v194_v41 = vmul.f32 0.2, %v188_v38  ;;  %v190_v42 = vadd.f32 %v189_v39, %v60_v31  ;;  %v197_v47 = vmax.f32 %v186_v35, %v193_v40  ;;  %v854_v31 = vld [vmem:[%s10573_s5 + $0x460] sm:$0xff]  ;;  %v6369_v40 = vcombine.low %v722_v25, %v726_v26 }
  0xea   :  { %v6498_v35 = vcombine.high %v850_v30, %v854_v31  ;;  %v846_v39 = vld [vmem:[%s10573_s5 + $0x420] sm:$0xff] }
  0xeb   :  { %v195_v44 = vmul.f32 0.2, %v190_v42  ;;  %v198_v45 = vmax.f32 %v188_v38, %v194_v41  ;;  %v842_v38 = vld [vmem:[%s10573_s5 + $0x400] sm:$0xff]  ;;  %v6497_v41 = vcombine.low %v850_v30, %v854_v31 }
  0xec   :  { %v6490_v43 = vcombine.high %v842_v38, %v846_v39  ;;  %v6489_v49 = vcombine.low %v842_v38, %v846_v39  ;;  %v926_v26 = vld [vmem:[%s10573_s5 + $0x6a0] sm:$0xff] }
  0xed   :  { %v199_v48 = vmax.f32 %v190_v42, %v195_v44  ;;  %v200_v54 = vpack.c.bf16 %v198_v45, %v196_v52  ;;  %v6362_v42 = vcombine.high %v714_v36, %v718_v37  ;;  %v834_v44 = vld [vmem:[%s10573_s5 + $0x3c0] sm:$0xff] }
  0xee   :  { %v838_v45 = vld [vmem:[%s10573_s5 + $0x3e0] sm:$0xff] }
  0xef   :  { %v201_v53 = vpack.c.bf16 %v199_v48, %v197_v47  ;;  %v966_v47 = vld [vmem:[%s10573_s5 + $0x7e0] sm:$0xff]  ;;  %v6361_v48 = vcombine.low %v714_v36, %v718_v37  ;;  %v6482_v50 = vcombine.high %v834_v44, %v838_v45 }
  0xf0   :  { %v6610_v51 = vcombine.high %v962_v46, %v966_v47  ;;  %v826_v52 = vld [vmem:[%s10573_s5 + $0x380] sm:$0xff]  ;;  %v6609_v57 = vcombine.low %v962_v46, %v966_v47 }
  0xf1   :  { %640 = vmatprep.mubr.bf16.mxu1 %v201_v53  ;;  %683 = vmatprep.mubr.bf16.mxu0 %v201_v53  ;;  %v830_v53 = vld [vmem:[%s10573_s5 + $0x3a0] sm:$0xff] }
  0xf2   :  { %641 = vmatmul.mubr.bf16.vlgmr.msra.gmra.mxu1 %v200_v54  ;;  %684 = vmatmul.mubr.bf16.vlgmr.msra.gmra.mxu0 %v200_v54  ;;  %v954_v54 = vld [vmem:[%s10573_s5 + $0x780] sm:$0xff]  ;;  %v6474_v58 = vcombine.high %v826_v52, %v830_v53 }
  0xf3   :  { %2293 = vmatpush1.bf16.msra.mxu1 %v6417_v21  ;;  %2336 = vmatpush1.bf16.msra.mxu0 %v6545_v24  ;;  %v6385_v21 = vcombine.low %v738_v9, %v742_v10  ;;  %v6506_v24 = vcombine.high %v858_v19, %v862_v20  ;;  %v918_v37 = vld [vmem:[%s10573_s5 + $0x660] sm:$0xff] }
  0xf4   :  { %2294 = vmatprep.subr.bf16.mxu1 %v6410_v55  ;;  %2337 = vmatprep.subr.bf16.mxu0 %v6538_v56  ;;  %v958_v55 = vld [vmem:[%s10573_s5 + $0x7a0] sm:$0xff]  ;;  %v6481_v56 = vcombine.low %v834_v44, %v838_v45 }
  0xf5   :  { %v6602_v59 = vcombine.high %v954_v54, %v958_v55  ;;  %v6601_v1 = vcombine.low %v954_v54, %v958_v55  ;;  %v910_v45 = vld [vmem:[%s10573_s5 + $0x620] sm:$0xff] }
  0xf7   :  { %2295 = vmatpush1.bf16.msra.mxu1 %v6409_v61  ;;  %2338 = vmatpush1.bf16.msra.mxu0 %v6537_v62  ;;  %v822_v61 = vld [vmem:[%s10573_s5 + $0x360] sm:$0xff] }
  0xf8   :  { %2296 = vmatprep.subr.bf16.mxu1 %v6402_v63  ;;  %2339 = vmatprep.subr.bf16.mxu0 %v6530_v0  ;;  %v946_v62 = vld [vmem:[%s10573_s5 + $0x740] sm:$0xff]  ;;  %v6473_v0 = vcombine.low %v826_v52, %v830_v53  ;;  %v6466_v2 = vcombine.high %v818_v60, %v822_v61  ;;  %v8479_v53 = vld [vmem:[%s10573_s5 + $0x5e8] sm:$0xff] }
  0xf9   :  { %v950_v63 = vld [vmem:[%s10573_s5 + $0x760] sm:$0xff] }
  0xfa   :  { %v6594_v3 = vcombine.high %v946_v62, %v950_v63  ;;  %v6593_v9 = vcombine.low %v946_v62, %v950_v63 }
  0xfb   :  { %2297 = vmatpush1.bf16.msra.mxu1 %v6401_v5  ;;  %2340 = vmatpush1.bf16.msra.mxu0 %v6529_v6  ;;  %v814_v5 = vld [vmem:[%s10573_s5 + $0x320] sm:$0xff] }
  0xfc   :  { %2298 = vmatprep.subr.bf16.mxu1 %v6394_v7  ;;  %2341 = vmatprep.subr.bf16.mxu0 %v6522_v8  ;;  %v938_v6 = vld [vmem:[%s10573_s5 + $0x700] sm:$0xff]  ;;  %v6465_v8 = vcombine.low %v818_v60, %v822_v61  ;;  %v6458_v10 = vcombine.high %v810_v4, %v814_v5 }
  0xfd   :  { %v942_v7 = vld [vmem:[%s10573_s5 + $0x720] sm:$0xff] }
  0xfe   :  { %v6586_v11 = vcombine.high %v938_v6, %v942_v7  ;;  %v6585_v17 = vcombine.low %v938_v6, %v942_v7 }
  0xff   :  { %2299 = vmatpush1.bf16.msra.mxu1 %v6393_v13  ;;  %2342 = vmatpush1.bf16.msra.mxu0 %v6521_v14  ;;  %v806_v13 = vld [vmem:[%s10573_s5 + $0x2e0] sm:$0xff] }
 0x100   :  { %2300 = vmatprep.subr.bf16.mxu1 %v6386_v15  ;;  %2343 = vmatprep.subr.bf16.mxu0 %v6514_v16  ;;  %v930_v14 = vld [vmem:[%s10573_s5 + $0x6c0] sm:$0xff]  ;;  %v6457_v16 = vcombine.low %v810_v4, %v814_v5  ;;  %v6450_v18 = vcombine.high %v802_v12, %v806_v13  ;;  %v6449_v20 = vcombine.low %v802_v12, %v806_v13 }
 0x101   :  { %v934_v15 = vld [vmem:[%s10573_s5 + $0x6e0] sm:$0xff] }
 0x102   :  { %v6578_v19 = vcombine.high %v930_v14, %v934_v15 }
 0x103   :  { %2301 = vmatpush1.bf16.msra.mxu1 %v6385_v21  ;;  %2344 = vmatpush1.bf16.msra.mxu0 %v6513_v22  ;;  %v6577_v21 = vcombine.low %v930_v14, %v934_v15  ;;  %v794_v22 = vld [vmem:[%s10573_s5 + $0x280] sm:$0xff] }
 0x104   :  { %2302 = vmatprep.subr.bf16.mxu1 %v6378_v23  ;;  %2345 = vmatprep.subr.bf16.mxu0 %v6506_v24  ;;  %v798_v23 = vld [vmem:[%s10573_s5 + $0x2a0] sm:$0xff] }
 0x105   :  { %v922_v24 = vld [vmem:[%s10573_s5 + $0x680] sm:$0xff]  ;;  %v6442_v25 = vcombine.high %v794_v22, %v798_v23  ;;  %v6441_v30 = vcombine.low %v794_v22, %v798_v23 }
 0x106   :  { %v6569_v31 = vcombine.low %v922_v24, %v926_v26 }
 0x107   :  { %2303 = vmatpush1.bf16.msra.mxu1 %v6377_v32  ;;  %2346 = vmatpush1.bf16.msra.mxu0 %v6505_v33  ;;  %v6570_v32 = vcombine.high %v922_v24, %v926_v26  ;;  %v786_v33 = vld [vmem:[%s10573_s5 + $0x240] sm:$0xff] }
 0x108   :  { %2304 = vmatprep.subr.bf16.mxu1 %v6370_v34  ;;  %2347 = vmatprep.subr.bf16.mxu0 %v6498_v35  ;;  %v790_v34 = vld [vmem:[%s10573_s5 + $0x260] sm:$0xff] }
 0x109   :  { %v914_v35 = vld [vmem:[%s10573_s5 + $0x640] sm:$0xff]  ;;  %v6434_v36 = vcombine.high %v786_v33, %v790_v34  ;;  %v6433_v38 = vcombine.low %v786_v33, %v790_v34  ;;  %v763_v33 = vld [vmem:[%s10573_s5 + $0x188] sm:$0xff] }
 0x10a   :  { %v6561_v39 = vcombine.low %v914_v35, %v918_v37 }
 0x10b   :  { %2305 = vmatpush1.bf16.msra.mxu1 %v6369_v40  ;;  %2348 = vmatpush1.bf16.msra.mxu0 %v6497_v41  ;;  %v6562_v40 = vcombine.high %v914_v35, %v918_v37  ;;  %v778_v41 = vld [vmem:[%s10573_s5 + $0x200] sm:$0xff]  ;;  %v891_v37 = vld [vmem:[%s10573_s5 + $0x588] sm:$0xff] }
 0x10c   :  { %2306 = vmatprep.subr.bf16.mxu1 %v6362_v42  ;;  %2349 = vmatprep.subr.bf16.mxu0 %v6490_v43  ;;  %v782_v42 = vld [vmem:[%s10573_s5 + $0x220] sm:$0xff] }
 0x10d   :  { %v906_v43 = vld [vmem:[%s10573_s5 + $0x600] sm:$0xff]  ;;  %v6426_v44 = vcombine.high %v778_v41, %v782_v42  ;;  %v6425_v46 = vcombine.low %v778_v41, %v782_v42 }
 0x10e   :  { %v6553_v47 = vcombine.low %v906_v43, %v910_v45 }
 0x10f   :  { %2307 = vmatpush1.bf16.msra.mxu1 %v6361_v48  ;;  %2350 = vmatpush1.bf16.msra.mxu0 %v6489_v49  ;;  %v6554_v48 = vcombine.high %v906_v43, %v910_v45  ;;  %v8462_v49 = vld [vmem:[%s10573_s5 + $0x1c8] sm:$0xff] }
 0x110   :  { %2308 = vmatprep.subr.bf16.mxu1 %v6482_v50  ;;  %2351 = vmatprep.subr.bf16.mxu0 %v6610_v51  ;;  %v8467_v50 = vld [vmem:[%s10573_s5 + $0x1e8] sm:$0xff] }
 0x111   :  { %v8472_v51 = vld [vmem:[%s10573_s5 + $0x5c8] sm:$0xff]  ;;  %v6420_v52 = vcombine.high %v8462_v49, %v8467_v50  ;;  %v6419_v54 = vcombine.low %v8462_v49, %v8467_v50 }
 0x112   :  { %v6547_v55 = vcombine.low %v8472_v51, %v8479_v53  ;;  %v755_v43 = vld [vmem:[%s10573_s5 + $0x148] sm:$0xff] }
 0x113   :  { %2309 = vmatpush2.bf16.msra.mxu1 %v6481_v56  ;;  %2352 = vmatpush2.bf16.msra.mxu0 %v6609_v57  ;;  %v6548_v56 = vcombine.high %v8472_v51, %v8479_v53  ;;  %v266_v57 = vld [vmem:[%s10575_s4] sm:$0xf]  ;;  %v747_v53 = vld [vmem:[%s10573_s5 + $0x108] sm:$0xff] }
 0x114   :  { %2310 = vmatprep.subr.bf16.mxu1 %v6474_v58  ;;  %2353 = vmatprep.subr.bf16.mxu0 %v6602_v59  ;;  %v8491_v58 = vsub.s32 3, %v8266_v27  ;;  %v8494_v59 = vsub.s32 2, %v8266_v27  ;;  %v271_v60 = vrot.slane %v266_v57, %v8272_v29  ;;  %v275_v61 = vrot.slane %v266_v57, %v8269_v28 }
 0x116   :  { %v283_v62 = vrot.slane %v266_v57, %v8491_v58 }
 0x117   :  { %2311 = vmatpush2.bf16.msra.mxu1 %v6473_v0  ;;  %2354 = vmatpush2.bf16.msra.mxu0 %v6601_v1  ;;  %v279_v0 = vrot.slane %v266_v57, %v8494_v59 }
 0x118   :  { %2312 = vmatprep.subr.bf16.mxu1 %v6466_v2  ;;  %2355 = vmatprep.subr.bf16.mxu0 %v6594_v3 }
 0x11b   :  { %2313 = vmatpush2.bf16.msra.mxu1 %v6465_v8  ;;  %2356 = vmatpush2.bf16.msra.mxu0 %v6593_v9 }
 0x11c   :  { %2314 = vmatprep.subr.bf16.mxu1 %v6458_v10  ;;  %2357 = vmatprep.subr.bf16.mxu0 %v6586_v11 }
 0x11f   :  { %2315 = vmatpush2.bf16.msra.mxu1 %v6457_v16  ;;  %2358 = vmatpush2.bf16.msra.mxu0 %v6585_v17 }
 0x120   :  { %2316 = vmatprep.subr.bf16.mxu1 %v6450_v18  ;;  %2359 = vmatprep.subr.bf16.mxu0 %v6578_v19 }
 0x123   :  { %2317 = vmatpush2.bf16.msra.mxu1 %v6449_v20  ;;  %2360 = vmatpush2.bf16.msra.mxu0 %v6577_v21 }
 0x124   :  { %2318 = vmatprep.subr.bf16.mxu1 %v6442_v25  ;;  %2361 = vmatprep.subr.bf16.mxu0 %v6570_v32 }
 0x127   :  { %2319 = vmatpush2.bf16.msra.mxu1 %v6441_v30  ;;  %2362 = vmatpush2.bf16.msra.mxu0 %v6569_v31 }
 0x128   :  { %2320 = vmatprep.subr.bf16.mxu1 %v6434_v36  ;;  %2363 = vmatprep.subr.bf16.mxu0 %v6562_v40  ;;  %v767_v36 = vld [vmem:[%s10573_s5 + $0x1a8] sm:$0xff] }
 0x129   :  { %v6411_v49 = vcombine.low %v763_v33, %v767_v36 }
 0x12b   :  { %2321 = vmatpush2.bf16.msra.mxu1 %v6433_v38  ;;  %2364 = vmatpush2.bf16.msra.mxu0 %v6561_v39  ;;  %v895_v38 = vld [vmem:[%s10573_s5 + $0x5a8] sm:$0xff] }
 0x12c   :  { %2322 = vmatprep.subr.bf16.mxu1 %v6426_v44  ;;  %2365 = vmatprep.subr.bf16.mxu0 %v6554_v48  ;;  %v6412_v44 = vcombine.high %v763_v33, %v767_v36  ;;  %v6540_v45 = vcombine.high %v891_v37, %v895_v38  ;;  %v887_v48 = vld [vmem:[%s10573_s5 + $0x568] sm:$0xff]  ;;  %v6539_v50 = vcombine.low %v891_v37, %v895_v38 }
 0x12d   :  { %v963_v36 = vld [vmem:[%s10573_s5 + $0x7c8] sm:$0xff] }
 0x12e   :  { %v967_v37 = vld [vmem:[%s10573_s5 + $0x7e8] sm:$0xff] }
 0x12f   :  { %2323 = vmatpush2.bf16.msra.mxu1 %v6425_v46  ;;  %2366 = vmatpush2.bf16.msra.mxu0 %v6553_v47  ;;  %v759_v46 = vld [vmem:[%s10573_s5 + $0x168] sm:$0xff] }
 0x130   :  { %2378 = vmatprep.subr.bf16.mxu1 %v6420_v52  ;;  %2421 = vmatprep.subr.bf16.mxu0 %v6548_v56  ;;  %v883_v47 = vld [vmem:[%s10573_s5 + $0x548] sm:$0xff]  ;;  %v6404_v51 = vcombine.high %v755_v43, %v759_v46  ;;  %v6403_v57 = vcombine.low %v755_v43, %v759_v46 }
 0x131   :  { %v6532_v52 = vcombine.high %v883_v47, %v887_v48  ;;  %v751_v56 = vld [vmem:[%s10573_s5 + $0x128] sm:$0xff] }
 0x132   :  { %v827_v46 = vld [vmem:[%s10573_s5 + $0x388] sm:$0xff] }
 0x1b2   :  { %v642_v63 = vpop.f32.mrf.mxu1  ;;  %v685_v1 = vpop.f32.mrf.mxu0 }
 0x1b3   :  { %v643_v2 = vadd.f32 %v642_v63, %v271_v60  ;;  %v686_v7 = vadd.f32 %v685_v1, %v279_v0  ;;  %v739_v63 = vld [vmem:[%s10573_s5 + $0xc8] sm:$0xff] }
 0x1b4   :  { %v644_v3 = vpop.f32.mrf.mxu1  ;;  %v687_v4 = vpop.f32.mrf.mxu0  ;;  %v867_v1 = vld [vmem:[%s10573_s5 + $0x4c8] sm:$0xff] }
 0x1b5   :  { %v645_v5 = vadd.f32 %v644_v3, %v275_v61  ;;  %v688_v6 = vadd.f32 %v687_v4, %v283_v62  ;;  %v694_v10 = vmul.f32 0.2, %v643_v2  ;;  %v696_v19 = vmul.f32 0.2, %v686_v7 }
 0x1b6   :  { %v646_v8 = vpop.f32.mrf.mxu1  ;;  %v689_v9 = vpop.f32.mrf.mxu0  ;;  %v6395_v3 = vcombine.low %v747_v53, %v751_v56 }
 0x1b7   :  { %v647_v11 = vadd.f32 %v646_v8, %v271_v60  ;;  %v690_v12 = vadd.f32 %v689_v9, %v279_v0  ;;  %v695_v15 = vmul.f32 0.2, %v645_v5  ;;  %v697_v16 = vmul.f32 0.2, %v688_v6  ;;  %v743_v0 = vld [vmem:[%s10573_s5 + $0xe8] sm:$0xff] }
 0x1b8   :  { %v648_v13 = vpop.f32.mrf.mxu1  ;;  %v691_v14 = vpop.f32.mrf.mxu0  ;;  %v702_v34 = vmax.f32 %v643_v2, %v694_v10  ;;  %v704_v35 = vmax.f32 %v686_v7, %v696_v19  ;;  %v6531_v60 = vcombine.low %v883_v47, %v887_v48  ;;  %v871_v2 = vld [vmem:[%s10573_s5 + $0x4e8] sm:$0xff] }
 0x1b9   :  { %v649_v17 = vadd.f32 %v648_v13, %v275_v61  ;;  %v692_v18 = vadd.f32 %v691_v14, %v283_v62  ;;  %v698_v20 = vmul.f32 0.2, %v647_v11  ;;  %v700_v21 = vmul.f32 0.2, %v690_v12  ;;  %v731_v7 = vld [vmem:[%s10573_s5 + $0x88] sm:$0xff] }
 0x1ba   :  { %v703_v26 = vmax.f32 %v645_v5, %v695_v15  ;;  %v705_v30 = vmax.f32 %v688_v6, %v697_v16  ;;  %v6396_v61 = vcombine.high %v747_v53, %v751_v56  ;;  %v6388_v5 = vcombine.high %v739_v63, %v743_v0  ;;  %v735_v8 = vld [vmem:[%s10573_s5 + $0xa8] sm:$0xff] }
 0x1bb   :  { %v699_v22 = vmul.f32 0.2, %v649_v17  ;;  %v701_v23 = vmul.f32 0.2, %v692_v18  ;;  %v706_v24 = vmax.f32 %v647_v11, %v698_v20  ;;  %v708_v25 = vmax.f32 %v690_v12, %v700_v21  ;;  %v859_v9 = vld [vmem:[%s10573_s5 + $0x488] sm:$0xff] }
 0x1bc   :  { %v6516_v6 = vcombine.high %v867_v1, %v871_v2  ;;  %v863_v10 = vld [vmem:[%s10573_s5 + $0x4a8] sm:$0xff]  ;;  %v6387_v11 = vcombine.low %v739_v63, %v743_v0  ;;  %v6515_v12 = vcombine.low %v867_v1, %v871_v2  ;;  %v6380_v13 = vcombine.high %v731_v7, %v735_v8 }
 0x1bd   :  { %v707_v31 = vmax.f32 %v649_v17, %v699_v22  ;;  %v709_v32 = vmax.f32 %v692_v18, %v701_v23  ;;  %v8516_v41 = vpack.c.bf16 %v706_v24, %v702_v34  ;;  %v8518_v42 = vpack.c.bf16 %v708_v25, %v704_v35  ;;  %v723_v15 = vld [vmem:[%s10573_s5 + $0x48] sm:$0xff] }
 0x1be   :  { %v6508_v14 = vcombine.high %v859_v9, %v863_v10  ;;  %v727_v16 = vld [vmem:[%s10573_s5 + $0x68] sm:$0xff]  ;;  %v6379_v19 = vcombine.low %v731_v7, %v735_v8  ;;  %v6507_v20 = vcombine.low %v859_v9, %v863_v10 }
 0x1bf   :  { %v8512_v39 = vpack.c.bf16 %v707_v31, %v703_v26  ;;  %v8514_v40 = vpack.c.bf16 %v709_v32, %v705_v30  ;;  %v851_v17 = vld [vmem:[%s10573_s5 + $0x448] sm:$0xff]  ;;  %v6372_v21 = vcombine.high %v723_v15, %v727_v16  ;;  %v6371_v30 = vcombine.low %v723_v15, %v727_v16 }
 0x1c0   :  { %v855_v18 = vld [vmem:[%s10573_s5 + $0x468] sm:$0xff] }
 0x1c1   :  { %2324 = vmatprep.mubr.bf16.mxu1 %v8512_v39  ;;  %2367 = vmatprep.mubr.bf16.mxu0 %v8514_v40  ;;  %v6500_v22 = vcombine.high %v851_v17, %v855_v18  ;;  %v715_v23 = vld [vmem:[%s10573_s5 + $0x8] sm:$0xff]  ;;  %v6499_v31 = vcombine.low %v851_v17, %v855_v18 }
 0x1c2   :  { %2325 = vmatmul.mubr.bf16.vlgmr.msra.gmra.mxu1 %v8516_v41  ;;  %2368 = vmatmul.mubr.bf16.vlgmr.msra.gmra.mxu0 %v8518_v42  ;;  %v719_v24 = vld [vmem:[%s10573_s5 + $0x28] sm:$0xff] }
 0x1c3   :  { %2379 = vmatpush1.bf16.msra.mxu1 %v6419_v54  ;;  %2422 = vmatpush1.bf16.msra.mxu0 %v6547_v55  ;;  %v875_v54 = vld [vmem:[%s10573_s5 + $0x508] sm:$0xff]  ;;  %v6364_v32 = vcombine.high %v715_v23, %v719_v24  ;;  %v6363_v38 = vcombine.low %v715_v23, %v719_v24 }
 0x1c4   :  { %2410 = vmatprep.mubr.bf16.mxu1 %v8512_v39  ;;  %2453 = vmatprep.mubr.bf16.mxu0 %v8514_v40  ;;  %v879_v55 = vld [vmem:[%s10573_s5 + $0x528] sm:$0xff] }
 0x1c5   :  { %2380 = vmatprep.subr.bf16.mxu1 %v6412_v44  ;;  %2423 = vmatprep.subr.bf16.mxu0 %v6540_v45  ;;  %v6524_v62 = vcombine.high %v875_v54, %v879_v55  ;;  %v6523_v4 = vcombine.low %v875_v54, %v879_v55  ;;  %v843_v25 = vld [vmem:[%s10573_s5 + $0x408] sm:$0xff]  ;;  %v6612_v45 = vcombine.high %v963_v36, %v967_v37 }
 0x1c6   :  { %v847_v26 = vld [vmem:[%s10573_s5 + $0x428] sm:$0xff] }
 0x1c7   :  { %2381 = vmatpush1.bf16.msra.mxu1 %v6411_v49  ;;  %2424 = vmatpush1.bf16.msra.mxu0 %v6539_v50  ;;  %v6492_v33 = vcombine.high %v843_v25, %v847_v26  ;;  %v835_v34 = vld [vmem:[%s10573_s5 + $0x3c8] sm:$0xff]  ;;  %v6491_v43 = vcombine.low %v843_v25, %v847_v26 }
 0x1c8   :  { %2382 = vmatprep.subr.bf16.mxu1 %v6404_v51  ;;  %2425 = vmatprep.subr.bf16.mxu0 %v6532_v52  ;;  %v839_v35 = vld [vmem:[%s10573_s5 + $0x3e8] sm:$0xff]  ;;  %v6611_v51 = vcombine.low %v963_v36, %v967_v37 }
 0x1c9   :  { %v6484_v44 = vcombine.high %v835_v34, %v839_v35  ;;  %v831_v47 = vld [vmem:[%s10573_s5 + $0x3a8] sm:$0xff]  ;;  %v6483_v50 = vcombine.low %v835_v34, %v839_v35 }
 0x1ca   :  { %v955_v48 = vld [vmem:[%s10573_s5 + $0x788] sm:$0xff]  ;;  %v6476_v52 = vcombine.high %v827_v46, %v831_v47 }
 0x1cb   :  { %2383 = vmatpush1.bf16.msra.mxu1 %v6403_v57  ;;  %2426 = vmatpush1.bf16.msra.mxu0 %v6531_v60  ;;  %v959_v49 = vld [vmem:[%s10573_s5 + $0x7a8] sm:$0xff]  ;;  %v6475_v60 = vcombine.low %v827_v46, %v831_v47  ;;  %v772_v47 = vld [vmem:[%s10573_s5 + $0x1d0] sm:$0xff] }
 0x1cc   :  { %2384 = vmatprep.subr.bf16.mxu1 %v6396_v61  ;;  %2427 = vmatprep.subr.bf16.mxu0 %v6524_v62  ;;  %v6604_v53 = vcombine.high %v955_v48, %v959_v49  ;;  %v819_v56 = vld [vmem:[%s10573_s5 + $0x348] sm:$0xff]  ;;  %v6603_v61 = vcombine.low %v955_v48, %v959_v49  ;;  %v776_v48 = vld [vmem:[%s10573_s5 + $0x1f0] sm:$0xff] }
 0x1cd   :  { %v823_v54 = vld [vmem:[%s10573_s5 + $0x368] sm:$0xff]  ;;  %v900_v49 = vld [vmem:[%s10573_s5 + $0x5d0] sm:$0xff] }
 0x1ce   :  { %v947_v55 = vld [vmem:[%s10573_s5 + $0x748] sm:$0xff]  ;;  %v6468_v62 = vcombine.high %v819_v56, %v823_v54 }
 0x1cf   :  { %2385 = vmatpush1.bf16.msra.mxu1 %v6395_v3  ;;  %2428 = vmatpush1.bf16.msra.mxu0 %v6523_v4  ;;  %v951_v57 = vld [vmem:[%s10573_s5 + $0x768] sm:$0xff]  ;;  %v6467_v4 = vcombine.low %v819_v56, %v823_v54  ;;  %v764_v54 = vld [vmem:[%s10573_s5 + $0x190] sm:$0xff] }
 0x1d0   :  { %2386 = vmatprep.subr.bf16.mxu1 %v6388_v5  ;;  %2429 = vmatprep.subr.bf16.mxu0 %v6516_v6  ;;  %v6596_v63 = vcombine.high %v947_v55, %v951_v57  ;;  %v811_v0 = vld [vmem:[%s10573_s5 + $0x308] sm:$0xff]  ;;  %v6595_v5 = vcombine.low %v947_v55, %v951_v57  ;;  %v768_v55 = vld [vmem:[%s10573_s5 + $0x1b0] sm:$0xff] }
 0x1d1   :  { %v815_v1 = vld [vmem:[%s10573_s5 + $0x328] sm:$0xff]  ;;  %v892_v57 = vld [vmem:[%s10573_s5 + $0x590] sm:$0xff] }
 0x1d2   :  { %v939_v2 = vld [vmem:[%s10573_s5 + $0x708] sm:$0xff]  ;;  %v6460_v6 = vcombine.high %v811_v0, %v815_v1 }
 0x1d3   :  { %2387 = vmatpush1.bf16.msra.mxu1 %v6387_v11  ;;  %2430 = vmatpush1.bf16.msra.mxu0 %v6515_v12  ;;  %v943_v3 = vld [vmem:[%s10573_s5 + $0x728] sm:$0xff]  ;;  %v6459_v12 = vcombine.low %v811_v0, %v815_v1  ;;  %v756_v1 = vld [vmem:[%s10573_s5 + $0x150] sm:$0xff] }
 0x1d4   :  { %2388 = vmatprep.subr.bf16.mxu1 %v6380_v13  ;;  %2431 = vmatprep.subr.bf16.mxu0 %v6508_v14  ;;  %v6588_v7 = vcombine.high %v939_v2, %v943_v3  ;;  %v803_v8 = vld [vmem:[%s10573_s5 + $0x2c8] sm:$0xff]  ;;  %v6587_v13 = vcombine.low %v939_v2, %v943_v3  ;;  %v760_v2 = vld [vmem:[%s10573_s5 + $0x170] sm:$0xff] }
 0x1d5   :  { %v807_v9 = vld [vmem:[%s10573_s5 + $0x2e8] sm:$0xff]  ;;  %v884_v3 = vld [vmem:[%s10573_s5 + $0x550] sm:$0xff] }
 0x1d6   :  { %v931_v10 = vld [vmem:[%s10573_s5 + $0x6c8] sm:$0xff]  ;;  %v6452_v14 = vcombine.high %v803_v8, %v807_v9 }
 0x1d7   :  { %2389 = vmatpush1.bf16.msra.mxu1 %v6379_v19  ;;  %2432 = vmatpush1.bf16.msra.mxu0 %v6507_v20  ;;  %v935_v11 = vld [vmem:[%s10573_s5 + $0x6e8] sm:$0xff]  ;;  %v6451_v20 = vcombine.low %v803_v8, %v807_v9  ;;  %v6406_v9 = vcombine.high %v756_v1, %v760_v2 }
 0x1d8   :  { %2390 = vmatprep.subr.bf16.mxu1 %v6372_v21  ;;  %2433 = vmatprep.subr.bf16.mxu0 %v6500_v22  ;;  %v6580_v15 = vcombine.high %v931_v10, %v935_v11  ;;  %v795_v16 = vld [vmem:[%s10573_s5 + $0x288] sm:$0xff]  ;;  %v6579_v21 = vcombine.low %v931_v10, %v935_v11  ;;  %v876_v10 = vld [vmem:[%s10573_s5 + $0x510] sm:$0xff] }
 0x1d9   :  { %v799_v17 = vld [vmem:[%s10573_s5 + $0x2a8] sm:$0xff] }
 0x1da   :  { %v923_v18 = vld [vmem:[%s10573_s5 + $0x688] sm:$0xff]  ;;  %v6444_v22 = vcombine.high %v795_v16, %v799_v17 }
 0x1db   :  { %2391 = vmatpush1.bf16.msra.mxu1 %v6371_v30  ;;  %2434 = vmatpush1.bf16.msra.mxu0 %v6499_v31  ;;  %v927_v19 = vld [vmem:[%s10573_s5 + $0x6a8] sm:$0xff]  ;;  %v6443_v31 = vcombine.low %v795_v16, %v799_v17 }
 0x1dc   :  { %2392 = vmatprep.subr.bf16.mxu1 %v6364_v32  ;;  %2435 = vmatprep.subr.bf16.mxu0 %v6492_v33  ;;  %v6572_v23 = vcombine.high %v923_v18, %v927_v19  ;;  %v787_v24 = vld [vmem:[%s10573_s5 + $0x248] sm:$0xff]  ;;  %v6571_v32 = vcombine.low %v923_v18, %v927_v19  ;;  %v868_v18 = vld [vmem:[%s10573_s5 + $0x4d0] sm:$0xff] }
 0x1dd   :  { %v791_v25 = vld [vmem:[%s10573_s5 + $0x268] sm:$0xff] }
 0x1de   :  { %v915_v26 = vld [vmem:[%s10573_s5 + $0x648] sm:$0xff]  ;;  %v6436_v33 = vcombine.high %v787_v24, %v791_v25 }
 0x1df   :  { %2393 = vmatpush1.bf16.msra.mxu1 %v6363_v38  ;;  %2436 = vmatpush1.bf16.msra.mxu0 %v6491_v43  ;;  %v919_v30 = vld [vmem:[%s10573_s5 + $0x668] sm:$0xff]  ;;  %v6435_v43 = vcombine.low %v787_v24, %v791_v25 }
 0x1e0   :  { %2394 = vmatprep.subr.bf16.mxu1 %v6484_v44  ;;  %2437 = vmatprep.subr.bf16.mxu0 %v6612_v45  ;;  %v6564_v34 = vcombine.high %v915_v26, %v919_v30  ;;  %v779_v35 = vld [vmem:[%s10573_s5 + $0x208] sm:$0xff]  ;;  %v6563_v44 = vcombine.low %v915_v26, %v919_v30  ;;  %v860_v26 = vld [vmem:[%s10573_s5 + $0x490] sm:$0xff] }
 0x1e1   :  { %v783_v36 = vld [vmem:[%s10573_s5 + $0x228] sm:$0xff] }
 0x1e2   :  { %v907_v37 = vld [vmem:[%s10573_s5 + $0x608] sm:$0xff]  ;;  %v6428_v45 = vcombine.high %v779_v35, %v783_v36 }
 0x1e3   :  { %2395 = vmatpush2.bf16.msra.mxu1 %v6483_v50  ;;  %2438 = vmatpush2.bf16.msra.mxu0 %v6611_v51  ;;  %v911_v38 = vld [vmem:[%s10573_s5 + $0x628] sm:$0xff]  ;;  %v904_v50 = vld [vmem:[%s10573_s5 + $0x5f0] sm:$0xff]  ;;  %v6427_v51 = vcombine.low %v779_v35, %v783_v36 }
 0x1e4   :  { %2396 = vmatprep.subr.bf16.mxu1 %v6476_v52  ;;  %2439 = vmatprep.subr.bf16.mxu0 %v6604_v53  ;;  %v6556_v46 = vcombine.high %v907_v37, %v911_v38  ;;  %v6555_v52 = vcombine.low %v907_v37, %v911_v38  ;;  %v6422_v53 = vcombine.high %v772_v47, %v776_v48  ;;  %v852_v38 = vld [vmem:[%s10573_s5 + $0x450] sm:$0xff] }
 0x1e5   :  { %v6550_v56 = vcombine.high %v900_v49, %v904_v50 }
 0x1e7   :  { %2397 = vmatpush2.bf16.msra.mxu1 %v6475_v60  ;;  %2440 = vmatpush2.bf16.msra.mxu0 %v6603_v61  ;;  %v896_v60 = vld [vmem:[%s10573_s5 + $0x5b0] sm:$0xff]  ;;  %v6421_v61 = vcombine.low %v772_v47, %v776_v48 }
 0x1e8   :  { %2398 = vmatprep.subr.bf16.mxu1 %v6468_v62  ;;  %2441 = vmatprep.subr.bf16.mxu0 %v6596_v63  ;;  %v6549_v62 = vcombine.low %v900_v49, %v904_v50  ;;  %v6414_v63 = vcombine.high %v764_v54, %v768_v55  ;;  %v6542_v0 = vcombine.high %v892_v57, %v896_v60  ;;  %v844_v49 = vld [vmem:[%s10573_s5 + $0x410] sm:$0xff] }
 0x1e9   :  { %v6541_v8 = vcombine.low %v892_v57, %v896_v60  ;;  %v848_v50 = vld [vmem:[%s10573_s5 + $0x430] sm:$0xff] }
 0x1ea   :  { %v964_v57 = vld [vmem:[%s10573_s5 + $0x7d0] sm:$0xff] }
 0x1eb   :  { %2399 = vmatpush2.bf16.msra.mxu1 %v6467_v4  ;;  %2442 = vmatpush2.bf16.msra.mxu0 %v6595_v5  ;;  %v888_v4 = vld [vmem:[%s10573_s5 + $0x570] sm:$0xff]  ;;  %v6413_v5 = vcombine.low %v764_v54, %v768_v55 }
 0x1ec   :  { %2400 = vmatprep.subr.bf16.mxu1 %v6460_v6  ;;  %2443 = vmatprep.subr.bf16.mxu0 %v6588_v7  ;;  %v748_v6 = vld [vmem:[%s10573_s5 + $0x110] sm:$0xff]  ;;  %v6534_v11 = vcombine.high %v884_v3, %v888_v4  ;;  %v6533_v16 = vcombine.low %v884_v3, %v888_v4 }
 0x1ed   :  { %v752_v7 = vld [vmem:[%s10573_s5 + $0x130] sm:$0xff] }
 0x1ee   :  { %v6398_v17 = vcombine.high %v748_v6, %v752_v7  ;;  %v968_v60 = vld [vmem:[%s10573_s5 + $0x7f0] sm:$0xff] }
 0x1ef   :  { %2401 = vmatpush2.bf16.msra.mxu1 %v6459_v12  ;;  %2444 = vmatpush2.bf16.msra.mxu0 %v6587_v13  ;;  %v880_v12 = vld [vmem:[%s10573_s5 + $0x530] sm:$0xff]  ;;  %v6405_v13 = vcombine.low %v756_v1, %v760_v2  ;;  %v6493_v1 = vcombine.low %v844_v49, %v848_v50 }
 0x1f0   :  { %2402 = vmatprep.subr.bf16.mxu1 %v6452_v14  ;;  %2445 = vmatprep.subr.bf16.mxu0 %v6580_v15  ;;  %v740_v14 = vld [vmem:[%s10573_s5 + $0xd0] sm:$0xff]  ;;  %v6526_v19 = vcombine.high %v876_v10, %v880_v12  ;;  %v6525_v24 = vcombine.low %v876_v10, %v880_v12 }
 0x1f1   :  { %v744_v15 = vld [vmem:[%s10573_s5 + $0xf0] sm:$0xff] }
 0x1f2   :  { %v6390_v25 = vcombine.high %v740_v14, %v744_v15  ;;  %v956_v3 = vld [vmem:[%s10573_s5 + $0x790] sm:$0xff] }
 0x1f3   :  { %2403 = vmatpush2.bf16.msra.mxu1 %v6451_v20  ;;  %2446 = vmatpush2.bf16.msra.mxu0 %v6579_v21  ;;  %v872_v20 = vld [vmem:[%s10573_s5 + $0x4f0] sm:$0xff]  ;;  %v6397_v21 = vcombine.low %v748_v6, %v752_v7 }
 0x1f4   :  { %2404 = vmatprep.subr.bf16.mxu1 %v6444_v22  ;;  %2447 = vmatprep.subr.bf16.mxu0 %v6572_v23  ;;  %v732_v22 = vld [vmem:[%s10573_s5 + $0x90] sm:$0xff]  ;;  %v6518_v30 = vcombine.high %v868_v18, %v872_v20  ;;  %v6517_v35 = vcombine.low %v868_v18, %v872_v20 }
 0x1f5   :  { %v736_v23 = vld [vmem:[%s10573_s5 + $0xb0] sm:$0xff] }
 0x1f6   :  { %v6382_v36 = vcombine.high %v732_v22, %v736_v23  ;;  %v960_v4 = vld [vmem:[%s10573_s5 + $0x7b0] sm:$0xff] }
 0x1f7   :  { %2405 = vmatpush2.bf16.msra.mxu1 %v6443_v31  ;;  %2448 = vmatpush2.bf16.msra.mxu0 %v6571_v32  ;;  %v864_v31 = vld [vmem:[%s10573_s5 + $0x4b0] sm:$0xff]  ;;  %v6389_v32 = vcombine.low %v740_v14, %v744_v15 }
 0x1f8   :  { %2406 = vmatprep.subr.bf16.mxu1 %v6436_v33  ;;  %2449 = vmatprep.subr.bf16.mxu0 %v6564_v34  ;;  %v724_v33 = vld [vmem:[%s10573_s5 + $0x50] sm:$0xff]  ;;  %v6510_v37 = vcombine.high %v860_v26, %v864_v31  ;;  %v6509_v47 = vcombine.low %v860_v26, %v864_v31 }
 0x1f9   :  { %v728_v34 = vld [vmem:[%s10573_s5 + $0x70] sm:$0xff] }
 0x1fa   :  { %v6374_v48 = vcombine.high %v724_v33, %v728_v34  ;;  %v820_v7 = vld [vmem:[%s10573_s5 + $0x350] sm:$0xff] }
 0x1fb   :  { %2407 = vmatpush2.bf16.msra.mxu1 %v6435_v43  ;;  %2450 = vmatpush2.bf16.msra.mxu0 %v6563_v44  ;;  %v856_v43 = vld [vmem:[%s10573_s5 + $0x470] sm:$0xff]  ;;  %v6381_v44 = vcombine.low %v732_v22, %v736_v23 }
 0x1fc   :  { %2408 = vmatprep.subr.bf16.mxu1 %v6428_v45  ;;  %2451 = vmatprep.subr.bf16.mxu0 %v6556_v46  ;;  %v716_v45 = vld [vmem:[%s10573_s5 + $0x10] sm:$0xff]  ;;  %v6501_v54 = vcombine.low %v852_v38, %v856_v43 }
 0x1fd   :  { %v720_v46 = vld [vmem:[%s10573_s5 + $0x30] sm:$0xff] }
 0x1fe   :  { %v6366_v55 = vcombine.high %v716_v45, %v720_v46  ;;  %v952_v12 = vld [vmem:[%s10573_s5 + $0x770] sm:$0xff] }
 0x1ff   :  { %2409 = vmatpush2.bf16.msra.mxu1 %v6427_v51  ;;  %2452 = vmatpush2.bf16.msra.mxu0 %v6555_v52  ;;  %v6502_v51 = vcombine.high %v852_v38, %v856_v43  ;;  %v6373_v52 = vcombine.low %v724_v33, %v728_v34  ;;  %v812_v15 = vld [vmem:[%s10573_s5 + $0x310] sm:$0xff] }
 0x200   :  { %2464 = vmatprep.subr.bf16.mxu1 %v6422_v53  ;;  %2507 = vmatprep.subr.bf16.mxu0 %v6550_v56  ;;  %v836_v53 = vld [vmem:[%s10573_s5 + $0x3d0] sm:$0xff] }
 0x201   :  { %v840_v56 = vld [vmem:[%s10573_s5 + $0x3f0] sm:$0xff] }
 0x202   :  { %2411 = vmatmul.mubr.bf16.vlgmr.msra.gmra.mxu1 %v8516_v41  ;;  %2454 = vmatmul.mubr.bf16.vlgmr.msra.gmra.mxu0 %v8518_v42  ;;  %v6486_v2 = vcombine.high %v836_v53, %v840_v56  ;;  %v6485_v6 = vcombine.low %v836_v53, %v840_v56  ;;  %v944_v20 = vld [vmem:[%s10573_s5 + $0x730] sm:$0xff] }
 0x203   :  { %2465 = vmatpush1.bf16.msra.mxu1 %v6421_v61  ;;  %2496 = vmatprep.mubr.bf16.mxu1 %v8512_v39  ;;  %v6494_v61 = vcombine.high %v844_v49, %v848_v50  ;;  %v804_v23 = vld [vmem:[%s10573_s5 + $0x2d0] sm:$0xff] }
 0x204   :  { %2508 = vmatpush1.bf16.msra.mxu0 %v6549_v62  ;;  %2539 = vmatprep.mubr.bf16.mxu0 %v8514_v40  ;;  %v6365_v62 = vcombine.low %v716_v45, %v720_v46  ;;  %v936_v31 = vld [vmem:[%s10573_s5 + $0x6f0] sm:$0xff] }
 0x205   :  { %2466 = vmatprep.subr.bf16.mxu1 %v6414_v63  ;;  %2509 = vmatprep.subr.bf16.mxu0 %v6542_v0  ;;  %v828_v63 = vld [vmem:[%s10573_s5 + $0x390] sm:$0xff] }
 0x206   :  { %v832_v0 = vld [vmem:[%s10573_s5 + $0x3b0] sm:$0xff] }
 0x207   :  { %2467 = vmatpush1.bf16.msra.mxu1 %v6413_v5  ;;  %v6614_v5 = vcombine.high %v964_v57, %v968_v60  ;;  %v6478_v10 = vcombine.high %v828_v63, %v832_v0  ;;  %v6477_v14 = vcombine.low %v828_v63, %v832_v0  ;;  %v796_v34 = vld [vmem:[%s10573_s5 + $0x290] sm:$0xff]  ;;  %v773_v0 = vld [vmem:[%s10573_s5 + $0x1d8] sm:$0xff] }
 0x208   :  { %2510 = vmatpush1.bf16.msra.mxu0 %v6541_v8  ;;  %2468 = vmatprep.subr.bf16.mxu1 %v6406_v9  ;;  %v824_v8 = vld [vmem:[%s10573_s5 + $0x370] sm:$0xff]  ;;  %v6613_v9 = vcombine.low %v964_v57, %v968_v60 }
 0x209   :  { %2511 = vmatprep.subr.bf16.mxu0 %v6534_v11  ;;  %v948_v11 = vld [vmem:[%s10573_s5 + $0x750] sm:$0xff]  ;;  %v6470_v18 = vcombine.high %v820_v7, %v824_v8  ;;  %v6469_v22 = vcombine.low %v820_v7, %v824_v8 }
 0x20a   :  { %v924_v38 = vld [vmem:[%s10573_s5 + $0x690] sm:$0xff] }
 0x20b   :  { %2469 = vmatpush1.bf16.msra.mxu1 %v6405_v13  ;;  %v6606_v13 = vcombine.high %v956_v3, %v960_v4  ;;  %v928_v43 = vld [vmem:[%s10573_s5 + $0x6b0] sm:$0xff] }
 0x20c   :  { %2512 = vmatpush1.bf16.msra.mxu0 %v6533_v16  ;;  %2470 = vmatprep.subr.bf16.mxu1 %v6398_v17  ;;  %v816_v16 = vld [vmem:[%s10573_s5 + $0x330] sm:$0xff]  ;;  %v6605_v17 = vcombine.low %v956_v3, %v960_v4  ;;  %v901_v4 = vld [vmem:[%s10573_s5 + $0x5d8] sm:$0xff] }
 0x20d   :  { %2513 = vmatprep.subr.bf16.mxu0 %v6526_v19  ;;  %v940_v19 = vld [vmem:[%s10573_s5 + $0x710] sm:$0xff]  ;;  %v6462_v26 = vcombine.high %v812_v15, %v816_v16  ;;  %v6461_v33 = vcombine.low %v812_v15, %v816_v16  ;;  %v757_v16 = vld [vmem:[%s10573_s5 + $0x158] sm:$0xff] }
 0x20e   :  { %v788_v46 = vld [vmem:[%s10573_s5 + $0x250] sm:$0xff] }
 0x20f   :  { %2471 = vmatpush1.bf16.msra.mxu1 %v6397_v21  ;;  %v6598_v21 = vcombine.high %v948_v11, %v952_v12  ;;  %v916_v50 = vld [vmem:[%s10573_s5 + $0x650] sm:$0xff] }
 0x210   :  { %2514 = vmatpush1.bf16.msra.mxu0 %v6525_v24  ;;  %2472 = vmatprep.subr.bf16.mxu1 %v6390_v25  ;;  %v808_v24 = vld [vmem:[%s10573_s5 + $0x2f0] sm:$0xff]  ;;  %v6597_v25 = vcombine.low %v948_v11, %v952_v12  ;;  %v769_v11 = vld [vmem:[%s10573_s5 + $0x1b8] sm:$0xff] }
 0x211   :  { %2515 = vmatprep.subr.bf16.mxu0 %v6518_v30  ;;  %v932_v30 = vld [vmem:[%s10573_s5 + $0x6d0] sm:$0xff]  ;;  %v6453_v45 = vcombine.low %v804_v23, %v808_v24 }
 0x212   :  { %v780_v56 = vld [vmem:[%s10573_s5 + $0x210] sm:$0xff] }
 0x213   :  { %2473 = vmatpush1.bf16.msra.mxu1 %v6389_v32  ;;  %v6590_v32 = vcombine.high %v940_v19, %v944_v20  ;;  %v908_v60 = vld [vmem:[%s10573_s5 + $0x610] sm:$0xff] }
 0x214   :  { %2516 = vmatpush1.bf16.msra.mxu0 %v6517_v35  ;;  %2474 = vmatprep.subr.bf16.mxu1 %v6382_v36  ;;  %v800_v35 = vld [vmem:[%s10573_s5 + $0x2b0] sm:$0xff]  ;;  %v6589_v36 = vcombine.low %v940_v19, %v944_v20  ;;  %v885_v19 = vld [vmem:[%s10573_s5 + $0x558] sm:$0xff] }
 0x215   :  { %2517 = vmatprep.subr.bf16.mxu0 %v6510_v37  ;;  %v6454_v37 = vcombine.high %v804_v23, %v808_v24  ;;  %v6446_v49 = vcombine.high %v796_v34, %v800_v35  ;;  %v6445_v53 = vcombine.low %v796_v34, %v800_v35  ;;  %v889_v20 = vld [vmem:[%s10573_s5 + $0x578] sm:$0xff] }
 0x216   :  { %v749_v24 = vld [vmem:[%s10573_s5 + $0x118] sm:$0xff] }
 0x217   :  { %2475 = vmatpush1.bf16.msra.mxu1 %v6381_v44  ;;  %v6582_v44 = vcombine.high %v932_v30, %v936_v31  ;;  %v745_v35 = vld [vmem:[%s10573_s5 + $0xf8] sm:$0xff] }
 0x218   :  { %2518 = vmatpush1.bf16.msra.mxu0 %v6509_v47  ;;  %2476 = vmatprep.subr.bf16.mxu1 %v6374_v48  ;;  %v792_v47 = vld [vmem:[%s10573_s5 + $0x270] sm:$0xff]  ;;  %v6581_v48 = vcombine.low %v932_v30, %v936_v31  ;;  %v877_v31 = vld [vmem:[%s10573_s5 + $0x518] sm:$0xff] }
 0x219   :  { %2519 = vmatprep.subr.bf16.mxu0 %v6502_v51  ;;  %v920_v51 = vld [vmem:[%s10573_s5 + $0x670] sm:$0xff]  ;;  %v6438_v57 = vcombine.high %v788_v46, %v792_v47  ;;  %v6437_v63 = vcombine.low %v788_v46, %v792_v47  ;;  %v737_v46 = vld [vmem:[%s10573_s5 + $0xb8] sm:$0xff] }
 0x21b   :  { %2477 = vmatpush1.bf16.msra.mxu1 %v6373_v52  ;;  %v6574_v52 = vcombine.high %v924_v38, %v928_v43 }
 0x21c   :  { %2520 = vmatpush1.bf16.msra.mxu0 %v6501_v54  ;;  %2478 = vmatprep.subr.bf16.mxu1 %v6366_v55  ;;  %v784_v54 = vld [vmem:[%s10573_s5 + $0x230] sm:$0xff]  ;;  %v6573_v55 = vcombine.low %v924_v38, %v928_v43  ;;  %v873_v43 = vld [vmem:[%s10573_s5 + $0x4f8] sm:$0xff] }
 0x21d   :  { %2521 = vmatprep.subr.bf16.mxu0 %v6494_v61  ;;  %v912_v61 = vld [vmem:[%s10573_s5 + $0x630] sm:$0xff]  ;;  %v6430_v3 = vcombine.high %v780_v56, %v784_v54  ;;  %v6429_v7 = vcombine.low %v780_v56, %v784_v54  ;;  %v729_v56 = vld [vmem:[%s10573_s5 + $0x78] sm:$0xff] }
 0x21e   :  { %v6557_v8 = vcombine.low %v908_v60, %v912_v61 }
 0x21f   :  { %2479 = vmatpush1.bf16.msra.mxu1 %v6365_v62  ;;  %v6566_v62 = vcombine.high %v916_v50, %v920_v51 }
 0x220   :  { %2522 = vmatpush1.bf16.msra.mxu0 %v6493_v1  ;;  %2480 = vmatprep.subr.bf16.mxu1 %v6486_v2  ;;  %v777_v1 = vld [vmem:[%s10573_s5 + $0x1f8] sm:$0xff]  ;;  %v6565_v2 = vcombine.low %v916_v50, %v920_v51 }
 0x221   :  { %2523 = vmatprep.subr.bf16.mxu0 %v6614_v5  ;;  %v905_v5 = vld [vmem:[%s10573_s5 + $0x5f8] sm:$0xff]  ;;  %v6423_v15 = vcombine.low %v773_v0, %v777_v1 }
 0x222   :  { %v6552_v12 = vcombine.high %v901_v4, %v905_v5  ;;  %v865_v51 = vld [vmem:[%s10573_s5 + $0x4b8] sm:$0xff] }
 0x223   :  { %2481 = vmatpush2.bf16.msra.mxu1 %v6485_v6  ;;  %v6558_v6 = vcombine.high %v908_v60, %v912_v61  ;;  %v857_v61 = vld [vmem:[%s10573_s5 + $0x478] sm:$0xff] }
 0x224   :  { %2524 = vmatpush2.bf16.msra.mxu0 %v6613_v9  ;;  %2482 = vmatprep.subr.bf16.mxu1 %v6478_v10  ;;  %v6424_v9 = vcombine.high %v773_v0, %v777_v1  ;;  %v765_v10 = vld [vmem:[%s10573_s5 + $0x198] sm:$0xff] }
 0x225   :  { %2525 = vmatprep.subr.bf16.mxu0 %v6606_v13  ;;  %v893_v13 = vld [vmem:[%s10573_s5 + $0x598] sm:$0xff]  ;;  %v6415_v23 = vcombine.low %v765_v10, %v769_v11 }
 0x227   :  { %2483 = vmatpush2.bf16.msra.mxu1 %v6477_v14  ;;  %v897_v14 = vld [vmem:[%s10573_s5 + $0x5b8] sm:$0xff] }
 0x228   :  { %2526 = vmatpush2.bf16.msra.mxu0 %v6605_v17  ;;  %2484 = vmatprep.subr.bf16.mxu1 %v6470_v18  ;;  %v761_v17 = vld [vmem:[%s10573_s5 + $0x178] sm:$0xff]  ;;  %v6551_v18 = vcombine.low %v901_v4, %v905_v5 }
 0x229   :  { %2527 = vmatprep.subr.bf16.mxu0 %v6598_v21  ;;  %v6416_v21 = vcombine.high %v765_v10, %v769_v11  ;;  %v6408_v30 = vcombine.high %v757_v16, %v761_v17  ;;  %v6407_v34 = vcombine.low %v757_v16, %v761_v17  ;;  %v845_v4 = vld [vmem:[%s10573_s5 + $0x418] sm:$0xff] }
 0x22a   :  { %v849_v5 = vld [vmem:[%s10573_s5 + $0x438] sm:$0xff] }
 0x22b   :  { %2485 = vmatpush2.bf16.msra.mxu1 %v6469_v22  ;;  %v6544_v22 = vcombine.high %v893_v13, %v897_v14  ;;  %v965_v11 = vld [vmem:[%s10573_s5 + $0x7d8] sm:$0xff]  ;;  %v6495_v17 = vcombine.low %v845_v4, %v849_v5 }
 0x22c   :  { %2528 = vmatpush2.bf16.msra.mxu0 %v6597_v25  ;;  %2486 = vmatprep.subr.bf16.mxu1 %v6462_v26  ;;  %v753_v25 = vld [vmem:[%s10573_s5 + $0x138] sm:$0xff]  ;;  %v6543_v26 = vcombine.low %v893_v13, %v897_v14  ;;  %v6496_v13 = vcombine.high %v845_v4, %v849_v5 }
 0x22d   :  { %2529 = vmatprep.subr.bf16.mxu0 %v6590_v32  ;;  %v6536_v32 = vcombine.high %v885_v19, %v889_v20  ;;  %v833_v16 = vld [vmem:[%s10573_s5 + $0x3b8] sm:$0xff] }
 0x22f   :  { %2487 = vmatpush2.bf16.msra.mxu1 %v6461_v33  ;;  %v881_v33 = vld [vmem:[%s10573_s5 + $0x538] sm:$0xff] }
 0x230   :  { %2530 = vmatpush2.bf16.msra.mxu0 %v6589_v36  ;;  %2488 = vmatprep.subr.bf16.mxu1 %v6454_v37  ;;  %v6400_v36 = vcombine.high %v749_v24, %v753_v25  ;;  %v869_v37 = vld [vmem:[%s10573_s5 + $0x4d8] sm:$0xff]  ;;  %v6528_v38 = vcombine.high %v877_v31, %v881_v33  ;;  %v6527_v47 = vcombine.low %v877_v31, %v881_v33 }
 0x231   :  { %2531 = vmatprep.subr.bf16.mxu0 %v6582_v44  ;;  %v6399_v44 = vcombine.low %v749_v24, %v753_v25  ;;  %v6520_v50 = vcombine.high %v869_v37, %v873_v43  ;;  %v6519_v54 = vcombine.low %v869_v37, %v873_v43  ;;  %v825_v24 = vld [vmem:[%s10573_s5 + $0x378] sm:$0xff] }
 0x232   :  { %v953_v31 = vld [vmem:[%s10573_s5 + $0x778] sm:$0xff] }
 0x233   :  { %2489 = vmatpush2.bf16.msra.mxu1 %v6453_v45  ;;  %v733_v45 = vld [vmem:[%s10573_s5 + $0x98] sm:$0xff] }
 0x234   :  { %2532 = vmatpush2.bf16.msra.mxu0 %v6581_v48  ;;  %2490 = vmatprep.subr.bf16.mxu1 %v6446_v49  ;;  %v861_v49 = vld [vmem:[%s10573_s5 + $0x498] sm:$0xff] }
 0x235   :  { %2533 = vmatprep.subr.bf16.mxu0 %v6574_v52  ;;  %v6512_v60 = vcombine.high %v861_v49, %v865_v51  ;;  %v945_v37 = vld [vmem:[%s10573_s5 + $0x738] sm:$0xff] }
 0x237   :  { %2491 = vmatpush2.bf16.msra.mxu1 %v6445_v53  ;;  %v725_v53 = vld [vmem:[%s10573_s5 + $0x58] sm:$0xff] }
 0x238   :  { %2534 = vmatpush2.bf16.msra.mxu0 %v6573_v55  ;;  %2492 = vmatprep.subr.bf16.mxu1 %v6438_v57  ;;  %v6384_v55 = vcombine.high %v733_v45, %v737_v46  ;;  %v853_v57 = vld [vmem:[%s10573_s5 + $0x458] sm:$0xff]  ;;  %v6376_v0 = vcombine.high %v725_v53, %v729_v56 }
 0x239   :  { %2535 = vmatprep.subr.bf16.mxu0 %v6566_v62  ;;  %v6383_v62 = vcombine.low %v733_v45, %v737_v46  ;;  %v6504_v1 = vcombine.high %v853_v57, %v857_v61  ;;  %v809_v45 = vld [vmem:[%s10573_s5 + $0x2f8] sm:$0xff] }
 0x23b   :  { %2493 = vmatpush2.bf16.msra.mxu1 %v6437_v63  ;;  %v6511_v63 = vcombine.low %v861_v49, %v865_v51  ;;  %v937_v49 = vld [vmem:[%s10573_s5 + $0x6f8] sm:$0xff] }
 0x23c   :  { %2536 = vmatpush2.bf16.msra.mxu0 %v6565_v2  ;;  %2494 = vmatprep.subr.bf16.mxu1 %v6430_v3  ;;  %v717_v2 = vld [vmem:[%s10573_s5 + $0x18] sm:$0xff] }
 0x23d   :  { %2537 = vmatprep.subr.bf16.mxu0 %v6558_v6  ;;  %v721_v3 = vld [vmem:[%s10573_s5 + $0x38] sm:$0xff]  ;;  %v6375_v6 = vcombine.low %v725_v53, %v729_v56 }
 0x23e   :  { %v6368_v10 = vcombine.high %v717_v2, %v721_v3  ;;  %v6367_v14 = vcombine.low %v717_v2, %v721_v3  ;;  %v801_v53 = vld [vmem:[%s10573_s5 + $0x2b8] sm:$0xff] }
 0x23f   :  { %2495 = vmatpush2.bf16.msra.mxu1 %v6429_v7  ;;  %v837_v7 = vld [vmem:[%s10573_s5 + $0x3d8] sm:$0xff] }
 0x240   :  { %2538 = vmatpush2.bf16.msra.mxu0 %v6557_v8  ;;  %2550 = vmatprep.subr.bf16.mxu1 %v6424_v9  ;;  %v841_v8 = vld [vmem:[%s10573_s5 + $0x3f8] sm:$0xff]  ;;  %v6503_v9 = vcombine.low %v853_v57, %v857_v61 }
 0x241   :  { %2593 = vmatprep.subr.bf16.mxu0 %v6552_v12  ;;  %v969_v12 = vld [vmem:[%s10573_s5 + $0x7f8] sm:$0xff] }
 0x242   :  { %2497 = vmatmul.mubr.bf16.vlgmr.msra.gmra.mxu1 %v8516_v41  ;;  %v6615_v25 = vcombine.low %v965_v11, %v969_v12  ;;  %v929_v57 = vld [vmem:[%s10573_s5 + $0x6b8] sm:$0xff] }
 0x243   :  { %2540 = vmatmul.mubr.bf16.vlgmr.msra.gmra.mxu0 %v8518_v42  ;;  %2551 = vmatpush1.bf16.msra.mxu1 %v6423_v15  ;;  %v829_v15 = vld [vmem:[%s10573_s5 + $0x398] sm:$0xff] }
 0x244   :  { %2582 = vmatprep.mubr.bf16.mxu1 %v8512_v39  ;;  %2594 = vmatpush1.bf16.msra.mxu0 %v6551_v18  ;;  %v741_v39 = vld [vmem:[%s10573_s5 + $0xd8] sm:$0xff]  ;;  %v6488_v18 = vcombine.high %v837_v7, %v841_v8  ;;  %v6479_v33 = vcombine.low %v829_v15, %v833_v16 }
 0x245   :  { %2625 = vmatprep.mubr.bf16.mxu0 %v8514_v40  ;;  %2552 = vmatprep.subr.bf16.mxu1 %v6416_v21  ;;  %v6535_v40 = vcombine.low %v885_v19, %v889_v20  ;;  %v6392_v48 = vcombine.high %v741_v39, %v745_v35  ;;  %v6391_v52 = vcombine.low %v741_v39, %v745_v35  ;;  %v957_v19 = vld [vmem:[%s10573_s5 + $0x798] sm:$0xff] }
 0x246   :  { %2595 = vmatprep.subr.bf16.mxu0 %v6544_v22  ;;  %v961_v20 = vld [vmem:[%s10573_s5 + $0x7b8] sm:$0xff]  ;;  %v6616_v21 = vcombine.high %v965_v11, %v969_v12  ;;  %v6487_v22 = vcombine.low %v837_v7, %v841_v8 }
 0x247   :  { %2553 = vmatpush1.bf16.msra.mxu1 %v6415_v23  ;;  %v821_v23 = vld [vmem:[%s10573_s5 + $0x358] sm:$0xff]  ;;  %v6607_v35 = vcombine.low %v957_v19, %v961_v20 }
 0x248   :  { %2596 = vmatpush1.bf16.msra.mxu0 %v6543_v26  ;;  %2554 = vmatprep.subr.bf16.mxu1 %v6408_v30  ;;  %v6480_v26 = vcombine.high %v829_v15, %v833_v16  ;;  %v949_v30 = vld [vmem:[%s10573_s5 + $0x758] sm:$0xff]  ;;  %v6471_v43 = vcombine.low %v821_v23, %v825_v24 }
 0x249   :  { %2597 = vmatprep.subr.bf16.mxu0 %v6536_v32  ;;  %v6608_v32 = vcombine.high %v957_v19, %v961_v20  ;;  %v817_v39 = vld [vmem:[%s10573_s5 + $0x338] sm:$0xff]  ;;  %v6599_v46 = vcombine.low %v949_v30, %v953_v31  ;;  %v7308_v19 = vld [vmem:[%s10576_s7 + $0x50c] ss:$28 sps:$4 sm:$0xff]  }
 0x24a   :  { %v917_v2 = vld [vmem:[%s10573_s5 + $0x658] sm:$0xff] }
 0x24b   :  { %2555 = vmatpush1.bf16.msra.mxu1 %v6407_v34  ;;  %v813_v34 = vld [vmem:[%s10573_s5 + $0x318] sm:$0xff] }
 0x24c   :  { %2598 = vmatpush1.bf16.msra.mxu0 %v6535_v40  ;;  %2556 = vmatprep.subr.bf16.mxu1 %v6400_v36  ;;  %v6472_v40 = vcombine.high %v821_v23, %v825_v24  ;;  %v941_v36 = vld [vmem:[%s10573_s5 + $0x718] sm:$0xff]  ;;  %v6463_v51 = vcombine.low %v813_v34, %v817_v39  ;;  %v7296_v23 = vld [vmem:[%s10576_s7 + $0x154] ss:$28 sps:$4 sm:$0xff]   ;;  %v7306_v24 = vld [vmem:[%s10576_s7 + $0x508] ss:$28 sps:$4 sm:$0xff]  }
 0x24d   :  { %2599 = vmatprep.subr.bf16.mxu0 %v6528_v38  ;;  %v6600_v38 = vcombine.high %v949_v30, %v953_v31  ;;  %v6591_v56 = vcombine.low %v941_v36, %v945_v37  ;;  %v921_v3 = vld [vmem:[%s10573_s5 + $0x678] sm:$0xff]  ;;  %v7294_v30 = vld [vmem:[%s10576_s7 + $0x150] ss:$28 sps:$4 sm:$0xff]  }
 0x24e   :  { %v785_v7 = vld [vmem:[%s10573_s5 + $0x238] sm:$0xff]  ;;  %v6568_v12 = vcombine.high %v917_v2, %v921_v3 }
 0x24f   :  { %2557 = vmatpush1.bf16.msra.mxu1 %v6399_v44  ;;  %v805_v44 = vld [vmem:[%s10573_s5 + $0x2d8] sm:$0xff] }
 0x250   :  { %2600 = vmatpush1.bf16.msra.mxu0 %v6527_v47  ;;  %2558 = vmatprep.subr.bf16.mxu1 %v6392_v48  ;;  %v6464_v47 = vcombine.high %v813_v34, %v817_v39  ;;  %v933_v48 = vld [vmem:[%s10573_s5 + $0x6d8] sm:$0xff]  ;;  %v6455_v61 = vcombine.low %v805_v44, %v809_v45  ;;  %v7312_v34 = vld [vmem:[%s10576_s7 + $0x4d0] ss:$28 sps:$4 sm:$0xff]  }
 0x251   :  { %2601 = vmatprep.subr.bf16.mxu0 %v6520_v50  ;;  %v6592_v50 = vcombine.high %v941_v36, %v945_v37  ;;  %v913_v11 = vld [vmem:[%s10573_s5 + $0x638] sm:$0xff] }
 0x252   :  { %v7297_v36 = vld [vmem:[%s10576_s7 + $0x118] ss:$28 sps:$4 sm:$0xff]  }
 0x253   :  { %2559 = vmatpush1.bf16.msra.mxu1 %v6391_v52  ;;  %v797_v52 = vld [vmem:[%s10573_s5 + $0x298] sm:$0xff] }
 0x254   :  { %2602 = vmatpush1.bf16.msra.mxu0 %v6519_v54  ;;  %2560 = vmatprep.subr.bf16.mxu1 %v6384_v55  ;;  %v6456_v54 = vcombine.high %v805_v44, %v809_v45  ;;  %v925_v55 = vld [vmem:[%s10573_s5 + $0x698] sm:$0xff]  ;;  %v6447_v5 = vcombine.low %v797_v52, %v801_v53 }
 0x255   :  { %2603 = vmatprep.subr.bf16.mxu0 %v6512_v60  ;;  %v6584_v60 = vcombine.high %v933_v48, %v937_v49  ;;  %v6576_v4 = vcombine.high %v925_v55, %v929_v57  ;;  %v6575_v8 = vcombine.low %v925_v55, %v929_v57  ;;  %v7318_v44 = vld [vmem:[%s10576_s7 + $0x498] ss:$28 sps:$4 sm:$0xff]   ;;  %v7303_v55 = vld [vmem:[%s10576_s7 + $0xa8] ss:$28 sps:$4 sm:$0xff]  }
 0x256   :  { %v7311_v57 = vld [vmem:[%s10576_s7 + $0x74] ss:$28 sps:$4 sm:$0xff]  }
 0x257   :  { %2561 = vmatpush1.bf16.msra.mxu1 %v6383_v62  ;;  %v789_v62 = vld [vmem:[%s10573_s5 + $0x258] sm:$0xff] }
 0x258   :  { %2604 = vmatpush1.bf16.msra.mxu0 %v6511_v63  ;;  %2562 = vmatprep.subr.bf16.mxu1 %v6376_v0  ;;  %v793_v63 = vld [vmem:[%s10573_s5 + $0x278] sm:$0xff]  ;;  %v6583_v0 = vcombine.low %v933_v48, %v937_v49 }
 0x259   :  { %2605 = vmatprep.subr.bf16.mxu0 %v6504_v1  ;;  %v6448_v1 = vcombine.high %v797_v52, %v801_v53  ;;  %v7300_v48 = vld [vmem:[%s10576_s7 + $0xe0] ss:$28 sps:$4 sm:$0xff]  }
 0x25a   :  { %v7324_v53 = vld [vmem:[%s10576_s7 + $0x460] ss:$28 sps:$4 sm:$0xff]  }
 0x25b   :  { %2563 = vmatpush1.bf16.msra.mxu1 %v6375_v6  ;;  %v781_v6 = vld [vmem:[%s10573_s5 + $0x218] sm:$0xff] }
 0x25c   :  { %2606 = vmatpush1.bf16.msra.mxu0 %v6503_v9  ;;  %2564 = vmatprep.subr.bf16.mxu1 %v6368_v10  ;;  %v6440_v9 = vcombine.high %v789_v62, %v793_v63  ;;  %v909_v10 = vld [vmem:[%s10573_s5 + $0x618] sm:$0xff]  ;;  %v6432_v15 = vcombine.high %v781_v6, %v785_v7 }
 0x25d   :  { %2607 = vmatprep.subr.bf16.mxu0 %v6496_v13  ;;  %v6439_v13 = vcombine.low %v789_v62, %v793_v63  ;;  %v6560_v16 = vcombine.high %v909_v10, %v913_v11  ;;  %v6559_v20 = vcombine.low %v909_v10, %v913_v11  ;;  %v7330_v62 = vld [vmem:[%s10576_s7 + $0x428] ss:$28 sps:$4 sm:$0xff]   ;;  %v7338_v63 = vld [vmem:[%s10576_s7 + $0x3f4] ss:$28 sps:$4 sm:$0xff]   ;;  %v7348_v11 = vld [vmem:[%s10576_s7 + $0x380] ss:$28 sps:$4 sm:$0xff]  }
 0x25e   :  { %v7329_v10 = vld [vmem:[%s10576_s7 + $0x34c] ss:$28 sps:$4 sm:$0xff]  }
 0x25f   :  { %2565 = vmatpush1.bf16.msra.mxu1 %v6367_v14  ;;  %v6567_v14 = vcombine.low %v917_v2, %v921_v3  ;;  %v7317_v2 = vld [vmem:[%s10576_s7 + $0x3c] ss:$28 sps:$4 sm:$0xff]   ;;  %v7336_v3 = vld [vmem:[%s10576_s7 + $0x3f0] ss:$28 sps:$4 sm:$0xff]  }
 0x260   :  { %2608 = vmatpush1.bf16.msra.mxu0 %v6495_v17  ;;  %2566 = vmatprep.subr.bf16.mxu1 %v6488_v18  ;;  %v7293_v17 = vld [vmem:[%s10576_s7 + $0x18c] ss:$28 sps:$4 sm:$0xff]   ;;  %v6431_v18 = vcombine.low %v781_v6, %v785_v7  ;;  %v7323_v6 = vld [vmem:[%s10576_s7 + $0x4] ss:$28 sps:$4 sm:$0xff]   ;;  %v7342_v7 = vld [vmem:[%s10576_s7 + $0x3b8] ss:$28 sps:$4 sm:$0xff]  }
 0x261   :  { %2609 = vmatprep.subr.bf16.mxu0 %v6616_v21  ;;  %v7291_v21 = vld [vmem:[%s10576_s7 + $0x188] ss:$28 sps:$4 sm:$0xff]  }
 0x263   :  { %2567 = vmatpush2.bf16.msra.mxu1 %v6487_v22  ;;  %v9098_v22 = vld [vmem:[%s10577_s6] sm:$0xff] }
 0x264   :  { %2610 = vmatpush2.bf16.msra.mxu0 %v6615_v25  ;;  %2568 = vmatprep.subr.bf16.mxu1 %v6480_v26  ;;  %v7314_v25 = vld [vmem:[%s10576_s7 + $0x4d4] ss:$28 sps:$4 sm:$0xff]   ;;  %v979_v26 = vrot.slane %v9098_v22, %v8269_v28 }
 0x265   :  { %2611 = vmatprep.subr.bf16.mxu0 %v6608_v32 }
 0x267   :  { %2569 = vmatpush2.bf16.msra.mxu1 %v6479_v33  ;;  %v7299_v33 = vld [vmem:[%s10576_s7 + $0x11c] ss:$28 sps:$4 sm:$0xff]  }
 0x268   :  { %2612 = vmatpush2.bf16.msra.mxu0 %v6607_v35  ;;  %2570 = vmatprep.subr.bf16.mxu1 %v6472_v40 }
 0x269   :  { %2613 = vmatprep.subr.bf16.mxu0 %v6600_v38  ;;  %v7302_v38 = vld [vmem:[%s10576_s7 + $0xe4] ss:$28 sps:$4 sm:$0xff]  }
 0x26b   :  { %2571 = vmatpush2.bf16.msra.mxu1 %v6471_v43 }
 0x26c   :  { %2614 = vmatpush2.bf16.msra.mxu0 %v6599_v46  ;;  %2572 = vmatprep.subr.bf16.mxu1 %v6464_v47  ;;  %v7326_v46 = vld [vmem:[%s10576_s7 + $0x464] ss:$28 sps:$4 sm:$0xff]  }
 0x26d   :  { %2615 = vmatprep.subr.bf16.mxu0 %v6592_v50  ;;  %v7305_v50 = vld [vmem:[%s10576_s7 + $0xac] ss:$28 sps:$4 sm:$0xff]  }
 0x26f   :  { %2573 = vmatpush2.bf16.msra.mxu1 %v6463_v51 }
 0x270   :  { %2616 = vmatpush2.bf16.msra.mxu0 %v6591_v56  ;;  %2574 = vmatprep.subr.bf16.mxu1 %v6456_v54  ;;  %v7332_v56 = vld [vmem:[%s10576_s7 + $0x42c] ss:$28 sps:$4 sm:$0xff]  }
 0x271   :  { %2617 = vmatprep.subr.bf16.mxu0 %v6584_v60 }
 0x273   :  { %2575 = vmatpush2.bf16.msra.mxu1 %v6455_v61 }
 0x274   :  { %2618 = vmatpush2.bf16.msra.mxu0 %v6583_v0  ;;  %2576 = vmatprep.subr.bf16.mxu1 %v6448_v1  ;;  %v7309_v1 = vld [vmem:[%s10576_s7 + $0x70] ss:$28 sps:$4 sm:$0xff]  }
 0x275   :  { %2619 = vmatprep.subr.bf16.mxu0 %v6576_v4  ;;  %v7315_v4 = vld [vmem:[%s10576_s7 + $0x38] ss:$28 sps:$4 sm:$0xff]  }
 0x277   :  { %2577 = vmatpush2.bf16.msra.mxu1 %v6447_v5  ;;  %v7344_v5 = vld [vmem:[%s10576_s7 + $0x3bc] ss:$28 sps:$4 sm:$0xff]  }
 0x278   :  { %2620 = vmatpush2.bf16.msra.mxu0 %v6575_v8  ;;  %2578 = vmatprep.subr.bf16.mxu1 %v6440_v9  ;;  %v7321_v8 = vld [vmem:[%s10576_s7] ss:$28 sps:$4 sm:$0xff]  }
 0x279   :  { %2621 = vmatprep.subr.bf16.mxu0 %v6568_v12  ;;  %v7350_v9 = vld [vmem:[%s10576_s7 + $0x384] ss:$28 sps:$4 sm:$0xff]  }
 0x27a   :  { %v7327_v12 = vld [vmem:[%s10576_s7 + $0x348] ss:$28 sps:$4 sm:$0xff]  }
 0x27b   :  { %2579 = vmatpush2.bf16.msra.mxu1 %v6439_v13  ;;  %v7356_v13 = vld [vmem:[%s10576_s7 + $0x6cc] ss:$28 sps:$4 sm:$0xff]  }
 0x27c   :  { %2622 = vmatpush2.bf16.msra.mxu0 %v6567_v14  ;;  %2580 = vmatprep.subr.bf16.mxu1 %v6432_v15  ;;  %v7335_v14 = vld [vmem:[%s10576_s7 + $0x314] ss:$28 sps:$4 sm:$0xff]   ;;  %v7354_v15 = vld [vmem:[%s10576_s7 + $0x6c8] ss:$28 sps:$4 sm:$0xff]  }
 0x27d   :  { %2623 = vmatprep.subr.bf16.mxu0 %v6560_v16  ;;  %v7333_v16 = vld [vmem:[%s10576_s7 + $0x310] ss:$28 sps:$4 sm:$0xff]  }
 0x27f   :  { %2581 = vmatpush2.bf16.msra.mxu1 %v6431_v18  ;;  %v7341_v18 = vld [vmem:[%s10576_s7 + $0x2dc] ss:$28 sps:$4 sm:$0xff]  }
 0x280   :  { %2624 = vmatpush2.bf16.msra.mxu0 %v6559_v20  ;;  %5529 = vmatprep.subr.bf16.mxu1 %v7293_v17  ;;  %v7362_v17 = vld [vmem:[%s10576_s7 + $0x694] ss:$28 sps:$4 sm:$0xff]  }
 0x281   :  { %5572 = vmatprep.subr.bf16.mxu0 %v7308_v19  ;;  %v7360_v19 = vld [vmem:[%s10576_s7 + $0x690] ss:$28 sps:$4 sm:$0xff]   ;;  %v7339_v20 = vld [vmem:[%s10576_s7 + $0x2d8] ss:$28 sps:$4 sm:$0xff]  }
 0x282   :  { %2583 = vmatmul.mubr.bf16.vlgmr.msra.gmra.mxu1 %v8516_v41  ;;  %v9115_v31 = vpop.f32.mrf.mxu1  ;;  %v9117_v32 = vpop.f32.mrf.mxu0  ;;  %v7320_v41 = vld [vmem:[%s10576_s7 + $0x49c] ss:$28 sps:$4 sm:$0xff]  }
 0x283   :  { %2626 = vmatmul.mubr.bf16.vlgmr.msra.gmra.mxu0 %v8518_v42  ;;  %5530 = vmatpush1.bf16.msra.mxu1 %v7291_v21  ;;  %v7368_v21 = vld [vmem:[%s10576_s7 + $0x65c] ss:$28 sps:$4 sm:$0xff]  }
 0x284   :  { %v2328_v39 = vpop.f32.mrf.mxu1  ;;  %v2371_v35 = vpop.f32.mrf.mxu0  ;;  %5531 = vmatprep.subr.bf16.mxu1 %v7296_v23  ;;  %5573 = vmatpush1.bf16.msra.mxu0 %v7306_v24  ;;  %v7347_v23 = vld [vmem:[%s10576_s7 + $0x2a4] ss:$28 sps:$4 sm:$0xff]   ;;  %v7366_v24 = vld [vmem:[%s10576_s7 + $0x658] ss:$28 sps:$4 sm:$0xff]  }
 0x285   :  { %v2329_v40 = vadd.f32 %v2328_v39, %v979_v26  ;;  %5574 = vmatprep.subr.bf16.mxu0 %v7314_v25  ;;  %v7345_v25 = vld [vmem:[%s10576_s7 + $0x2a0] ss:$28 sps:$4 sm:$0xff]   ;;  %v7351_v39 = vld [vmem:[%s10576_s7 + $0x268] ss:$28 sps:$4 sm:$0xff]  }
 0x286   :  { %v9132_v42 = vpop.f32.mrf.mxu1  ;;  %v9134_v37 = vpop.f32.mrf.mxu0 }
 0x287   :  { %v2372_v43 = vadd.f32 %v2371_v35, %v2329_v40  ;;  %5532 = vmatpush1.bf16.msra.mxu1 %v7294_v30  ;;  %v7353_v30 = vld [vmem:[%s10576_s7 + $0x26c] ss:$28 sps:$4 sm:$0xff]  }
 0x288   :  { %v2332_v45 = vpop.f32.mrf.mxu1  ;;  %5533 = vmatprep.subr.bf16.mxu1 %v7299_v33  ;;  %5575 = vmatpush1.bf16.msra.mxu0 %v7312_v34  ;;  %v2375_v49 = vpop.f32.mrf.mxu0  ;;  %v7372_v33 = vld [vmem:[%s10576_s7 + $0x620] ss:$28 sps:$4 sm:$0xff]   ;;  %v975_v34 = vrot.slane %v9098_v22, %v8272_v29  ;;  %v7377_v35 = vld [vmem:[%s10576_s7 + $0x5ec] ss:$28 sps:$4 sm:$0xff]  }
 0x289   :  { %v2333_v47 = vadd.f32 %v2332_v45, %v979_v26  ;;  %5576 = vmatprep.subr.bf16.mxu0 %v7320_v41  ;;  %v2637_v51 = vmul.f32 0.2, %v2372_v43  ;;  %v7374_v26 = vld [vmem:[%s10576_s7 + $0x624] ss:$28 sps:$4 sm:$0xff]   ;;  %v7359_v41 = vld [vmem:[%s10576_s7 + $0x234] ss:$28 sps:$4 sm:$0xff]  }
 0x28a   :  { %v7375_v40 = vld [vmem:[%s10576_s7 + $0x5e8] ss:$28 sps:$4 sm:$0xff]   ;;  %v7365_v45 = vld [vmem:[%s10576_s7 + $0x1fc] ss:$28 sps:$4 sm:$0xff]  }
 0x28b   :  { %v2376_v52 = vadd.f32 %v2375_v49, %v2333_v47  ;;  %5534 = vmatpush1.bf16.msra.mxu1 %v7297_v36  ;;  %v2653_v60 = vmax.f32 %v2372_v43, %v2637_v51  ;;  %v2331_v36 = vadd.f32 %v9132_v42, %v975_v34  ;;  %v7380_v43 = vld [vmem:[%s10576_s7 + $0x5b4] ss:$28 sps:$4 sm:$0xff]   ;;  %v7371_v49 = vld [vmem:[%s10576_s7 + $0x1c4] ss:$28 sps:$4 sm:$0xff]  }
 0x28c   :  { %5535 = vmatprep.subr.bf16.mxu1 %v7302_v38  ;;  %5577 = vmatpush1.bf16.msra.mxu0 %v7318_v44  ;;  %v7357_v38 = vld [vmem:[%s10576_s7 + $0x230] ss:$28 sps:$4 sm:$0xff]   ;;  %v2327_v44 = vadd.f32 %v9115_v31, %v975_v34  ;;  %v7363_v47 = vld [vmem:[%s10576_s7 + $0x1f8] ss:$28 sps:$4 sm:$0xff]   ;;  %v7369_v51 = vld [vmem:[%s10576_s7 + $0x1c0] ss:$28 sps:$4 sm:$0xff]  }
 0x28d   :  { %v2645_v54 = vmul.f32 0.2, %v2376_v52  ;;  %5578 = vmatprep.subr.bf16.mxu0 %v7326_v46  ;;  %v7378_v42 = vld [vmem:[%s10576_s7 + $0x5b0] ss:$28 sps:$4 sm:$0xff]   ;;  %v2374_v46 = vadd.f32 %v9134_v37, %v2331_v36  ;;  %v7383_v31 = vld [vmem:[%s10576_s7 + $0x57c] ss:$28 sps:$4 sm:$0xff]  }
 0x28e   :  { %v7381_v37 = vld [vmem:[%s10576_s7 + $0x578] ss:$28 sps:$4 sm:$0xff]   ;;  %v7435_v36 = vld [vmem:[%s10576_s7 + $0xc08] ss:$28 sps:$4 sm:$0xff]  }
 0x28f   :  { %v2661_v61 = vmax.f32 %v2376_v52, %v2645_v54  ;;  %5536 = vmatpush1.bf16.msra.mxu1 %v7300_v48  ;;  %v2370_v48 = vadd.f32 %v9117_v32, %v2327_v44  ;;  %v7386_v32 = vld [vmem:[%s10576_s7 + $0x544] ss:$28 sps:$4 sm:$0xff]  }
 0x290   :  { %5537 = vmatprep.subr.bf16.mxu1 %v7305_v50  ;;  %5579 = vmatpush1.bf16.msra.mxu0 %v7324_v53  ;;  %v2644_v50 = vmul.f32 0.2, %v2374_v46  ;;  %v7384_v53 = vld [vmem:[%s10576_s7 + $0x540] ss:$28 sps:$4 sm:$0xff]  }
 0x291   :  { %v9169_v0 = vpack.c.bf16 %v2661_v61, %v2653_v60  ;;  %5580 = vmatprep.subr.bf16.mxu0 %v7332_v56  ;;  %v2636_v52 = vmul.f32 0.2, %v2370_v48  ;;  %v7389_v56 = vld [vmem:[%s10576_s7 + $0x88c] ss:$28 sps:$4 sm:$0xff]   ;;  %v7392_v61 = vld [vmem:[%s10576_s7 + $0x854] ss:$28 sps:$4 sm:$0xff]  }
 0x292   :  { %v2660_v54 = vmax.f32 %v2374_v46, %v2644_v50  ;;  %v7441_v46 = vld [vmem:[%s10576_s7 + $0xbd0] ss:$28 sps:$4 sm:$0xff]  }
 0x293   :  { %5538 = vmatpush1.bf16.msra.mxu1 %v7303_v55  ;;  %5561 = vmatprep.mubr.bf16.mxu1 %v9169_v0  ;;  %v7387_v55 = vld [vmem:[%s10576_s7 + $0x888] ss:$28 sps:$4 sm:$0xff]   ;;  %v2652_v60 = vmax.f32 %v2370_v48, %v2636_v52  ;;  %v7453_v52 = vld [vmem:[%s10576_s7 + $0xb60] ss:$28 sps:$4 sm:$0xff]  }
 0x294   :  { %5539 = vmatprep.subr.bf16.mxu1 %v7311_v57  ;;  %5581 = vmatpush1.bf16.msra.mxu0 %v7330_v62  ;;  %v7437_v57 = vld [vmem:[%s10576_s7 + $0xc0c] ss:$28 sps:$4 sm:$0xff]   ;;  %v7410_v48 = vld [vmem:[%s10576_s7 + $0x704] ss:$28 sps:$4 sm:$0xff]  }
 0x295   :  { %5582 = vmatprep.subr.bf16.mxu0 %v7338_v63  ;;  %v9316_v62 = vpack.c.bf16 %v2660_v54, %v2652_v60  ;;  %v983_v63 = vrot.slane %v9098_v22, %v8494_v59  ;;  %v7413_v50 = vld [vmem:[%s10576_s7 + $0xa4c] ss:$28 sps:$4 sm:$0xff]   ;;  %v7467_v60 = vld [vmem:[%s10576_s7 + $0xaf4] ss:$28 sps:$4 sm:$0xff]  }
 0x296   :  { %v7414_v54 = vld [vmem:[%s10576_s7 + $0xa10] ss:$28 sps:$4 sm:$0xff]  }
 0x297   :  { %5540 = vmatpush1.bf16.msra.mxu1 %v7309_v1  ;;  %v987_v1 = vrot.slane %v9098_v22, %v8491_v58 }
 0x298   :  { %5541 = vmatprep.subr.bf16.mxu1 %v7317_v2  ;;  %5583 = vmatpush1.bf16.msra.mxu0 %v7336_v3 }
 0x299   :  { %5584 = vmatprep.subr.bf16.mxu0 %v7344_v5 }
 0x29b   :  { %5542 = vmatpush1.bf16.msra.mxu1 %v7315_v4  ;;  %v7390_v4 = vld [vmem:[%s10576_s7 + $0x850] ss:$28 sps:$4 sm:$0xff]  }
 0x29c   :  { %5543 = vmatprep.subr.bf16.mxu1 %v7323_v6  ;;  %5585 = vmatpush1.bf16.msra.mxu0 %v7342_v7 }
 0x29d   :  { %5586 = vmatprep.subr.bf16.mxu0 %v7350_v9 }
 0x29f   :  { %5544 = vmatpush1.bf16.msra.mxu1 %v7321_v8  ;;  %v7395_v8 = vld [vmem:[%s10576_s7 + $0x81c] ss:$28 sps:$4 sm:$0xff]  }
 0x2a0   :  { %5545 = vmatprep.subr.bf16.mxu1 %v7329_v10  ;;  %5587 = vmatpush1.bf16.msra.mxu0 %v7348_v11 }
 0x2a1   :  { %5588 = vmatprep.subr.bf16.mxu0 %v7356_v13  ;;  %v7393_v13 = vld [vmem:[%s10576_s7 + $0x818] ss:$28 sps:$4 sm:$0xff]  }
 0x2a3   :  { %5546 = vmatpush2.bf16.msra.mxu1 %v7327_v12 }
 0x2a4   :  { %5547 = vmatprep.subr.bf16.mxu1 %v7335_v14  ;;  %5589 = vmatpush2.bf16.msra.mxu0 %v7354_v15 }
 0x2a5   :  { %5590 = vmatprep.subr.bf16.mxu0 %v7362_v17 }
 0x2a7   :  { %5548 = vmatpush2.bf16.msra.mxu1 %v7333_v16  ;;  %v7398_v16 = vld [vmem:[%s10576_s7 + $0x7e4] ss:$28 sps:$4 sm:$0xff]  }
 0x2a8   :  { %5549 = vmatprep.subr.bf16.mxu1 %v7341_v18  ;;  %5591 = vmatpush2.bf16.msra.mxu0 %v7360_v19 }
 0x2a9   :  { %5592 = vmatprep.subr.bf16.mxu0 %v7368_v21 }
 0x2ab   :  { %5550 = vmatpush2.bf16.msra.mxu1 %v7339_v20 }
 0x2ac   :  { %5551 = vmatprep.subr.bf16.mxu1 %v7347_v23  ;;  %5593 = vmatpush2.bf16.msra.mxu0 %v7366_v24  ;;  %v7396_v24 = vld [vmem:[%s10576_s7 + $0x7e0] ss:$28 sps:$4 sm:$0xff]  }
 0x2ad   :  { %5594 = vmatprep.subr.bf16.mxu0 %v7374_v26  ;;  %v7401_v26 = vld [vmem:[%s10576_s7 + $0x7ac] ss:$28 sps:$4 sm:$0xff]  }
 0x2af   :  { %5552 = vmatpush2.bf16.msra.mxu1 %v7345_v25 }
 0x2b0   :  { %5553 = vmatprep.subr.bf16.mxu1 %v7353_v30  ;;  %5595 = vmatpush2.bf16.msra.mxu0 %v7372_v33 }
 0x2b1   :  { %5596 = vmatprep.subr.bf16.mxu0 %v7377_v35  ;;  %v7399_v35 = vld [vmem:[%s10576_s7 + $0x7a8] ss:$28 sps:$4 sm:$0xff]  }
 0x2b3   :  { %5554 = vmatpush2.bf16.msra.mxu1 %v7351_v39 }
 0x2b4   :  { %5555 = vmatprep.subr.bf16.mxu1 %v7359_v41  ;;  %5597 = vmatpush2.bf16.msra.mxu0 %v7375_v40  ;;  %v7404_v41 = vld [vmem:[%s10576_s7 + $0x774] ss:$28 sps:$4 sm:$0xff]  }
 0x2b5   :  { %5598 = vmatprep.subr.bf16.mxu0 %v7380_v43 }
 0x2b7   :  { %5556 = vmatpush2.bf16.msra.mxu1 %v7357_v38  ;;  %v7443_v38 = vld [vmem:[%s10576_s7 + $0xbd4] ss:$28 sps:$4 sm:$0xff]  }
 0x2b8   :  { %5557 = vmatprep.subr.bf16.mxu1 %v7365_v45  ;;  %5599 = vmatpush2.bf16.msra.mxu0 %v7378_v42  ;;  %v7402_v45 = vld [vmem:[%s10576_s7 + $0x770] ss:$28 sps:$4 sm:$0xff]   ;;  %v7407_v42 = vld [vmem:[%s10576_s7 + $0x73c] ss:$28 sps:$4 sm:$0xff]  }
 0x2b9   :  { %5600 = vmatprep.subr.bf16.mxu0 %v7383_v31  ;;  %v7405_v31 = vld [vmem:[%s10576_s7 + $0x738] ss:$28 sps:$4 sm:$0xff]  }
 0x2bb   :  { %5558 = vmatpush2.bf16.msra.mxu1 %v7363_v47  ;;  %v7449_v47 = vld [vmem:[%s10576_s7 + $0xb9c] ss:$28 sps:$4 sm:$0xff]  }
 0x2bc   :  { %5559 = vmatprep.subr.bf16.mxu1 %v7371_v49  ;;  %5601 = vmatpush2.bf16.msra.mxu0 %v7381_v37  ;;  %v7408_v49 = vld [vmem:[%s10576_s7 + $0x700] ss:$28 sps:$4 sm:$0xff]   ;;  %v7447_v37 = vld [vmem:[%s10576_s7 + $0xb98] ss:$28 sps:$4 sm:$0xff]  }
 0x2bd   :  { %5602 = vmatprep.subr.bf16.mxu0 %v7386_v32  ;;  %v7411_v32 = vld [vmem:[%s10576_s7 + $0xa48] ss:$28 sps:$4 sm:$0xff]  }
 0x2bf   :  { %5560 = vmatpush2.bf16.msra.mxu1 %v7369_v51  ;;  %v7455_v51 = vld [vmem:[%s10576_s7 + $0xb64] ss:$28 sps:$4 sm:$0xff]  }
 0x2c0   :  { %5603 = vmatpush2.bf16.msra.mxu0 %v7384_v53  ;;  %5615 = vmatprep.subr.bf16.mxu1 %v7389_v56  ;;  %v7416_v53 = vld [vmem:[%s10576_s7 + $0xa14] ss:$28 sps:$4 sm:$0xff]   ;;  %v7461_v56 = vld [vmem:[%s10576_s7 + $0xb2c] ss:$28 sps:$4 sm:$0xff]  }
 0x2c1   :  { %5658 = vmatprep.subr.bf16.mxu0 %v7437_v57  ;;  %v7419_v57 = vld [vmem:[%s10576_s7 + $0x9dc] ss:$28 sps:$4 sm:$0xff]  }
 0x2c2   :  { %v2412_v2 = vpop.f32.mrf.mxu1  ;;  %v2455_v3 = vpop.f32.mrf.mxu0  ;;  %5562 = vmatmul.mubr.bf16.vlgmr.msra.gmra.mxu1 %v9316_v62 }
 0x2c3   :  { %5616 = vmatpush1.bf16.msra.mxu1 %v7387_v55  ;;  %v2413_v5 = vadd.f32 %v2412_v2, %v983_v63  ;;  %v7459_v55 = vld [vmem:[%s10576_s7 + $0xb28] ss:$28 sps:$4 sm:$0xff]   ;;  %v7473_v2 = vld [vmem:[%s10576_s7 + $0xabc] ss:$28 sps:$4 sm:$0xff]  }
 0x2c4   :  { %v2414_v6 = vpop.f32.mrf.mxu1  ;;  %v2457_v7 = vpop.f32.mrf.mxu0  ;;  %5617 = vmatprep.subr.bf16.mxu1 %v7392_v61  ;;  %v7417_v61 = vld [vmem:[%s10576_s7 + $0x9d8] ss:$28 sps:$4 sm:$0xff]  }
 0x2c5   :  { %v2415_v9 = vadd.f32 %v2414_v6, %v987_v1  ;;  %v2456_v14 = vadd.f32 %v2455_v3, %v2413_v5  ;;  %v7420_v3 = vld [vmem:[%s10576_s7 + $0x9a0] ss:$28 sps:$4 sm:$0xff]   ;;  %v7425_v5 = vld [vmem:[%s10576_s7 + $0x96c] ss:$28 sps:$4 sm:$0xff]  }
 0x2c6   :  { %v2416_v22 = vpop.f32.mrf.mxu1  ;;  %v2459_v10 = vpop.f32.mrf.mxu0  ;;  %v7479_v6 = vld [vmem:[%s10576_s7 + $0xa84] ss:$28 sps:$4 sm:$0xff]  }
 0x2c7   :  { %v2458_v11 = vadd.f32 %v2457_v7, %v2415_v9  ;;  %v2417_v12 = vadd.f32 %v2416_v22, %v983_v63  ;;  %5618 = vmatpush1.bf16.msra.mxu1 %v7390_v4  ;;  %v2638_v25 = vmul.f32 0.2, %v2456_v14  ;;  %v7465_v63 = vld [vmem:[%s10576_s7 + $0xaf0] ss:$28 sps:$4 sm:$0xff]   ;;  %v7471_v4 = vld [vmem:[%s10576_s7 + $0xab8] ss:$28 sps:$4 sm:$0xff]  }
 0x2c8   :  { %v2418_v15 = vpop.f32.mrf.mxu1  ;;  %5619 = vmatprep.subr.bf16.mxu1 %v7395_v8  ;;  %v2461_v19 = vpop.f32.mrf.mxu0  ;;  %v7477_v7 = vld [vmem:[%s10576_s7 + $0xa80] ss:$28 sps:$4 sm:$0xff]   ;;  %v7485_v8 = vld [vmem:[%s10576_s7 + $0xdcc] ss:$28 sps:$4 sm:$0xff]   ;;  %v7428_v22 = vld [vmem:[%s10576_s7 + $0x934] ss:$28 sps:$4 sm:$0xff]  }
 0x2c9   :  { %v2460_v17 = vadd.f32 %v2459_v10, %v2417_v12  ;;  %v2419_v18 = vadd.f32 %v2418_v15, %v987_v1  ;;  %v2639_v20 = vmul.f32 0.2, %v2458_v11  ;;  %v2654_v40 = vmax.f32 %v2456_v14, %v2638_v25  ;;  %v7422_v1 = vld [vmem:[%s10576_s7 + $0x9a4] ss:$28 sps:$4 sm:$0xff]   ;;  %v7426_v12 = vld [vmem:[%s10576_s7 + $0x930] ss:$28 sps:$4 sm:$0xff]  }
 0x2ca   :  { %v7423_v9 = vld [vmem:[%s10576_s7 + $0x968] ss:$28 sps:$4 sm:$0xff]   ;;  %v7489_v14 = vld [vmem:[%s10576_s7 + $0xd90] ss:$28 sps:$4 sm:$0xff]   ;;  %v7497_v15 = vld [vmem:[%s10576_s7 + $0xd5c] ss:$28 sps:$4 sm:$0xff]  }
 0x2cb   :  { %v2646_v21 = vmul.f32 0.2, %v2460_v17  ;;  %v2462_v23 = vadd.f32 %v2461_v19, %v2419_v18  ;;  %5620 = vmatpush1.bf16.msra.mxu1 %v7393_v13  ;;  %v2655_v34 = vmax.f32 %v2458_v11, %v2639_v20  ;;  %v7483_v10 = vld [vmem:[%s10576_s7 + $0xdc8] ss:$28 sps:$4 sm:$0xff]   ;;  %v7491_v11 = vld [vmem:[%s10576_s7 + $0xd94] ss:$28 sps:$4 sm:$0xff]  }
 0x2cc   :  { %5621 = vmatprep.subr.bf16.mxu1 %v7398_v16  ;;  %v7431_v13 = vld [vmem:[%s10576_s7 + $0x8fc] ss:$28 sps:$4 sm:$0xff]   ;;  %v7503_v19 = vld [vmem:[%s10576_s7 + $0xd24] ss:$28 sps:$4 sm:$0xff]  }
 0x2cd   :  { %v2647_v30 = vmul.f32 0.2, %v2462_v23  ;;  %v2662_v33 = vmax.f32 %v2460_v17, %v2646_v21  ;;  %v7429_v16 = vld [vmem:[%s10576_s7 + $0x8f8] ss:$28 sps:$4 sm:$0xff]   ;;  %v7434_v17 = vld [vmem:[%s10576_s7 + $0x8c4] ss:$28 sps:$4 sm:$0xff]  }
 0x2ce   :  { %v7495_v18 = vld [vmem:[%s10576_s7 + $0xd58] ss:$28 sps:$4 sm:$0xff]   ;;  %v7432_v20 = vld [vmem:[%s10576_s7 + $0x8c0] ss:$28 sps:$4 sm:$0xff]   ;;  %v990_v21 = vsub.s32 4, %v8266_v27 }
 0x2cf   :  { %v2663_v39 = vmax.f32 %v2462_v23, %v2647_v30  ;;  %5622 = vmatpush1.bf16.msra.mxu1 %v7396_v24  ;;  %v9355_v44 = vpack.c.bf16 %v2662_v33, %v2654_v40  ;;  %v7440_v23 = vld [vmem:[%s10576_s7 + $0x194] ss:$28 sps:$4 sm:$0xff]   ;;  %v994_v24 = vsub.s32 5, %v8266_v27  ;;  %v7501_v25 = vld [vmem:[%s10576_s7 + $0xd20] ss:$28 sps:$4 sm:$0xff]  }
 0x2d0   :  { %5623 = vmatprep.subr.bf16.mxu1 %v7401_v26  ;;  %v7509_v26 = vld [vmem:[%s10576_s7 + $0xcec] ss:$28 sps:$4 sm:$0xff]   ;;  %v9496_v30 = vld [vmem:[%s10577_s6] sm:$0xff] }
 0x2d1   :  { %v9353_v43 = vpack.c.bf16 %v2663_v39, %v2655_v34  ;;  %v991_v33 = vrot.slane %v9496_v30, %v990_v21  ;;  %v995_v34 = vrot.slane %v9496_v30, %v994_v24  ;;  %v7507_v39 = vld [vmem:[%s10576_s7 + $0xce8] ss:$28 sps:$4 sm:$0xff]  }
 0x2d3   :  { %5604 = vmatprep.mubr.bf16.mxu0 %v9353_v43  ;;  %5624 = vmatpush1.bf16.msra.mxu1 %v7399_v35 }
 0x2d4   :  { %5605 = vmatmul.mubr.bf16.vlgmr.msra.gmra.mxu0 %v9355_v44  ;;  %5625 = vmatprep.subr.bf16.mxu1 %v7404_v41  ;;  %v7515_v41 = vld [vmem:[%s10576_s7 + $0xcb4] ss:$28 sps:$4 sm:$0xff]  }
 0x2d5   :  { %5659 = vmatpush1.bf16.msra.mxu0 %v7435_v36 }
 0x2d6   :  { %5660 = vmatprep.subr.bf16.mxu0 %v7443_v38 }
 0x2d7   :  { %5626 = vmatpush1.bf16.msra.mxu1 %v7402_v45 }
 0x2d8   :  { %5627 = vmatprep.subr.bf16.mxu1 %v7407_v42 }
 0x2d9   :  { %5661 = vmatpush1.bf16.msra.mxu0 %v7441_v46  ;;  %v7513_v46 = vld [vmem:[%s10576_s7 + $0xcb0] ss:$28 sps:$4 sm:$0xff]  }
 0x2da   :  { %5662 = vmatprep.subr.bf16.mxu0 %v7449_v47 }
 0x2db   :  { %5628 = vmatpush1.bf16.msra.mxu1 %v7405_v31  ;;  %v7521_v31 = vld [vmem:[%s10576_s7 + $0xc7c] ss:$28 sps:$4 sm:$0xff]  }
 0x2dc   :  { %5629 = vmatprep.subr.bf16.mxu1 %v7410_v48 }
 0x2dd   :  { %5663 = vmatpush1.bf16.msra.mxu0 %v7447_v37 }
 0x2de   :  { %5664 = vmatprep.subr.bf16.mxu0 %v7455_v51 }
 0x2df   :  { %5630 = vmatpush1.bf16.msra.mxu1 %v7408_v49 }
 0x2e0   :  { %5631 = vmatprep.subr.bf16.mxu1 %v7413_v50 }
 0x2e1   :  { %5665 = vmatpush1.bf16.msra.mxu0 %v7453_v52 }
 0x2e2   :  { %5666 = vmatprep.subr.bf16.mxu0 %v7461_v56 }
 0x2e3   :  { %5632 = vmatpush2.bf16.msra.mxu1 %v7411_v32 }
 0x2e4   :  { %5633 = vmatprep.subr.bf16.mxu1 %v7416_v53  ;;  %v7519_v53 = vld [vmem:[%s10576_s7 + $0xc78] ss:$28 sps:$4 sm:$0xff]  }
 0x2e5   :  { %5667 = vmatpush1.bf16.msra.mxu0 %v7459_v55 }
 0x2e6   :  { %5668 = vmatprep.subr.bf16.mxu0 %v7467_v60 }
 0x2e7   :  { %5634 = vmatpush2.bf16.msra.mxu1 %v7414_v54  ;;  %v7527_v54 = vld [vmem:[%s10576_s7 + $0xc44] ss:$28 sps:$4 sm:$0xff]  }
 0x2e8   :  { %5635 = vmatprep.subr.bf16.mxu1 %v7419_v57 }
 0x2e9   :  { %5669 = vmatpush1.bf16.msra.mxu0 %v7465_v63 }
 0x2ea   :  { %5670 = vmatprep.subr.bf16.mxu0 %v7473_v2 }
 0x2eb   :  { %5636 = vmatpush2.bf16.msra.mxu1 %v7417_v61 }
 0x2ec   :  { %5637 = vmatprep.subr.bf16.mxu1 %v7422_v1  ;;  %v7525_v1 = vld [vmem:[%s10576_s7 + $0xc40] ss:$28 sps:$4 sm:$0xff]  }
 0x2ed   :  { %5671 = vmatpush1.bf16.msra.mxu0 %v7471_v4 }
 0x2ee   :  { %5672 = vmatprep.subr.bf16.mxu0 %v7479_v6 }
 0x2ef   :  { %5638 = vmatpush2.bf16.msra.mxu1 %v7420_v3  ;;  %v7533_v3 = vld [vmem:[%s10576_s7 + $0x514] ss:$28 sps:$4 sm:$0xff]  }
 0x2f0   :  { %5639 = vmatprep.subr.bf16.mxu1 %v7425_v5 }
 0x2f1   :  { %5673 = vmatpush1.bf16.msra.mxu0 %v7477_v7 }
 0x2f2   :  { %5674 = vmatprep.subr.bf16.mxu0 %v7485_v8  ;;  %v7438_v8 = vld [vmem:[%s10576_s7 + $0x190] ss:$28 sps:$4 sm:$0xff]  }
 0x2f3   :  { %5640 = vmatpush2.bf16.msra.mxu1 %v7423_v9 }
 0x2f4   :  { %5641 = vmatprep.subr.bf16.mxu1 %v7428_v22  ;;  %v7446_v22 = vld [vmem:[%s10576_s7 + $0x15c] ss:$28 sps:$4 sm:$0xff]  }
 0x2f5   :  { %5675 = vmatpush2.bf16.msra.mxu0 %v7483_v10  ;;  %v7444_v10 = vld [vmem:[%s10576_s7 + $0x158] ss:$28 sps:$4 sm:$0xff]  }
 0x2f6   :  { %5676 = vmatprep.subr.bf16.mxu0 %v7491_v11  ;;  %v7452_v11 = vld [vmem:[%s10576_s7 + $0x124] ss:$28 sps:$4 sm:$0xff]  }
 0x2f7   :  { %5642 = vmatpush2.bf16.msra.mxu1 %v7426_v12  ;;  %v7450_v12 = vld [vmem:[%s10576_s7 + $0x120] ss:$28 sps:$4 sm:$0xff]  }
 0x2f8   :  { %5643 = vmatprep.subr.bf16.mxu1 %v7431_v13  ;;  %v7458_v13 = vld [vmem:[%s10576_s7 + $0xec] ss:$28 sps:$4 sm:$0xff]  }
 0x2f9   :  { %5677 = vmatpush2.bf16.msra.mxu0 %v7489_v14  ;;  %v7456_v14 = vld [vmem:[%s10576_s7 + $0xe8] ss:$28 sps:$4 sm:$0xff]  }
 0x2fa   :  { %5678 = vmatprep.subr.bf16.mxu0 %v7497_v15  ;;  %v7464_v15 = vld [vmem:[%s10576_s7 + $0xb4] ss:$28 sps:$4 sm:$0xff]  }
 0x2fb   :  { %5644 = vmatpush2.bf16.msra.mxu1 %v7429_v16  ;;  %v7462_v16 = vld [vmem:[%s10576_s7 + $0xb0] ss:$28 sps:$4 sm:$0xff]  }
 0x2fc   :  { %5645 = vmatprep.subr.bf16.mxu1 %v7434_v17  ;;  %v7470_v17 = vld [vmem:[%s10576_s7 + $0x7c] ss:$28 sps:$4 sm:$0xff]  }
 0x2fd   :  { %5679 = vmatpush2.bf16.msra.mxu0 %v7495_v18  ;;  %v7468_v18 = vld [vmem:[%s10576_s7 + $0x78] ss:$28 sps:$4 sm:$0xff]  }
 0x2fe   :  { %5680 = vmatprep.subr.bf16.mxu0 %v7503_v19  ;;  %v7476_v19 = vld [vmem:[%s10576_s7 + $0x44] ss:$28 sps:$4 sm:$0xff]  }
 0x2ff   :  { %5646 = vmatpush2.bf16.msra.mxu1 %v7432_v20  ;;  %v7474_v20 = vld [vmem:[%s10576_s7 + $0x40] ss:$28 sps:$4 sm:$0xff]  }
 0x300   :  { %5701 = vmatprep.subr.bf16.mxu1 %v7440_v23  ;;  %v7482_v23 = vld [vmem:[%s10576_s7 + $0xc] ss:$28 sps:$4 sm:$0xff]  }
 0x301   :  { %5681 = vmatpush2.bf16.msra.mxu0 %v7501_v25  ;;  %v7480_v25 = vld [vmem:[%s10576_s7 + $0x8] ss:$28 sps:$4 sm:$0xff]  }
 0x302   :  { %v2498_v35 = vpop.f32.mrf.mxu1  ;;  %5682 = vmatprep.subr.bf16.mxu0 %v7509_v26  ;;  %v7488_v26 = vld [vmem:[%s10576_s7 + $0x354] ss:$28 sps:$4 sm:$0xff]  }
 0x303   :  { %v2541_v40 = vpop.f32.mrf.mxu0  ;;  %v2499_v36 = vadd.f32 %v2498_v35, %v991_v33  ;;  %v7500_v35 = vld [vmem:[%s10576_s7 + $0x2e4] ss:$28 sps:$4 sm:$0xff]  }
 0x304   :  { %v2500_v38 = vpop.f32.mrf.mxu1 }
 0x305   :  { %v2501_v45 = vadd.f32 %v2500_v38, %v995_v34  ;;  %v2543_v42 = vpop.f32.mrf.mxu0  ;;  %5683 = vmatpush2.bf16.msra.mxu0 %v7507_v39  ;;  %v2542_v50 = vadd.f32 %v2541_v40, %v2499_v36  ;;  %v7492_v39 = vld [vmem:[%s10576_s7 + $0x318] ss:$28 sps:$4 sm:$0xff]   ;;  %v7506_v40 = vld [vmem:[%s10576_s7 + $0x2ac] ss:$28 sps:$4 sm:$0xff]   ;;  %v998_v36 = vsub.s32 6, %v8266_v27 }
 0x306   :  { %v2502_v47 = vpop.f32.mrf.mxu1  ;;  %5684 = vmatprep.subr.bf16.mxu0 %v7515_v41  ;;  %v7498_v41 = vld [vmem:[%s10576_s7 + $0x2e0] ss:$28 sps:$4 sm:$0xff]   ;;  %v7504_v38 = vld [vmem:[%s10576_s7 + $0x2a8] ss:$28 sps:$4 sm:$0xff]  }
 0x307   :  { %v2544_v48 = vadd.f32 %v2543_v42, %v2501_v45  ;;  %v2503_v49 = vadd.f32 %v2502_v47, %v991_v33  ;;  %v2545_v37 = vpop.f32.mrf.mxu0  ;;  %v2640_v61 = vmul.f32 0.2, %v2542_v50  ;;  %v7486_v33 = vld [vmem:[%s10576_s7 + $0x350] ss:$28 sps:$4 sm:$0xff]   ;;  %v1002_v45 = vsub.s32 7, %v8266_v27 }
 0x308   :  { %v2504_v51 = vpop.f32.mrf.mxu1  ;;  %v7512_v42 = vld [vmem:[%s10576_s7 + $0x274] ss:$28 sps:$4 sm:$0xff]  }
 0x309   :  { %v2546_v32 = vadd.f32 %v2545_v37, %v2503_v49  ;;  %v2505_v52 = vadd.f32 %v2504_v51, %v995_v34  ;;  %5685 = vmatpush2.bf16.msra.mxu0 %v7513_v46  ;;  %v2547_v56 = vpop.f32.mrf.mxu0  ;;  %v2641_v55 = vmul.f32 0.2, %v2544_v48  ;;  %v2656_v6 = vmax.f32 %v2542_v50, %v2640_v61  ;;  %v7494_v34 = vld [vmem:[%s10576_s7 + $0x31c] ss:$28 sps:$4 sm:$0xff]   ;;  %v7510_v47 = vld [vmem:[%s10576_s7 + $0x270] ss:$28 sps:$4 sm:$0xff]  }
 0x30a   :  { %5686 = vmatprep.subr.bf16.mxu0 %v7521_v31  ;;  %v999_v46 = vrot.slane %v9496_v30, %v998_v36  ;;  %v1003_v31 = vrot.slane %v9496_v30, %v1002_v45  ;;  %v7518_v49 = vld [vmem:[%s10576_s7 + $0x23c] ss:$28 sps:$4 sm:$0xff]   ;;  %v7524_v30 = vld [vmem:[%s10576_s7 + $0x204] ss:$28 sps:$4 sm:$0xff]  }
 0x30b   :  { %v2648_v57 = vmul.f32 0.2, %v2546_v32  ;;  %v2548_v60 = vadd.f32 %v2547_v56, %v2505_v52  ;;  %v2657_v4 = vmax.f32 %v2544_v48, %v2641_v55  ;;  %v7549_v45 = vld [vmem:[%s10576_s7 + $0x468] ss:$28 sps:$4 sm:$0xff]  }
 0x30d   :  { %v2649_v63 = vmul.f32 0.2, %v2548_v60  ;;  %5687 = vmatpush2.bf16.msra.mxu0 %v7519_v53  ;;  %v2664_v2 = vmax.f32 %v2546_v32, %v2648_v57  ;;  %v7516_v53 = vld [vmem:[%s10576_s7 + $0x238] ss:$28 sps:$4 sm:$0xff]  }
 0x30e   :  { %5688 = vmatprep.subr.bf16.mxu0 %v7527_v54 }
 0x30f   :  { %v2665_v5 = vmax.f32 %v2548_v60, %v2649_v63  ;;  %v9533_v9 = vpack.c.bf16 %v2664_v2, %v2656_v6  ;;  %v7522_v2 = vld [vmem:[%s10576_s7 + $0x200] ss:$28 sps:$4 sm:$0xff]  }
 0x311   :  { %v9528_v7 = vpack.c.bf16 %v2665_v5, %v2657_v4  ;;  %5689 = vmatpush2.bf16.msra.mxu0 %v7525_v1  ;;  %v7530_v4 = vld [vmem:[%s10576_s7 + $0x1cc] ss:$28 sps:$4 sm:$0xff]  }
 0x312   :  { %5744 = vmatprep.subr.bf16.mxu0 %v7533_v3 }
 0x313   :  { %5647 = vmatprep.mubr.bf16.mxu1 %v9528_v7 }
 0x314   :  { %5648 = vmatmul.mubr.bf16.vlgmr.msra.gmra.mxu1 %v9533_v9 }
 0x315   :  { %5702 = vmatpush1.bf16.msra.mxu1 %v7438_v8  ;;  %5733 = vmatprep.mubr.bf16.mxu1 %v9169_v0 }
 0x316   :  { %5703 = vmatprep.subr.bf16.mxu1 %v7446_v22 }
 0x319   :  { %5704 = vmatpush1.bf16.msra.mxu1 %v7444_v10 }
 0x31a   :  { %5705 = vmatprep.subr.bf16.mxu1 %v7452_v11  ;;  %v7528_v11 = vld [vmem:[%s10576_s7 + $0x1c8] ss:$28 sps:$4 sm:$0xff]  }
 0x31d   :  { %5706 = vmatpush1.bf16.msra.mxu1 %v7450_v12 }
 0x31e   :  { %5707 = vmatprep.subr.bf16.mxu1 %v7458_v13  ;;  %v7536_v13 = vld [vmem:[%s10576_s7 + $0x894] ss:$28 sps:$4 sm:$0xff]  }
 0x321   :  { %5708 = vmatpush1.bf16.msra.mxu1 %v7456_v14 }
 0x322   :  { %5709 = vmatprep.subr.bf16.mxu1 %v7464_v15 }
 0x325   :  { %5710 = vmatpush1.bf16.msra.mxu1 %v7462_v16 }
 0x326   :  { %5711 = vmatprep.subr.bf16.mxu1 %v7470_v17 }
 0x329   :  { %5712 = vmatpush1.bf16.msra.mxu1 %v7468_v18  ;;  %v7531_v18 = vld [vmem:[%s10576_s7 + $0x510] ss:$28 sps:$4 sm:$0xff]  }
 0x32a   :  { %5713 = vmatprep.subr.bf16.mxu1 %v7476_v19  ;;  %v7534_v19 = vld [vmem:[%s10576_s7 + $0x890] ss:$28 sps:$4 sm:$0xff]  }
 0x32d   :  { %5714 = vmatpush1.bf16.msra.mxu1 %v7474_v20 }
 0x32e   :  { %5715 = vmatprep.subr.bf16.mxu1 %v7482_v23  ;;  %v7539_v23 = vld [vmem:[%s10576_s7 + $0x4dc] ss:$28 sps:$4 sm:$0xff]  }
 0x331   :  { %5716 = vmatpush1.bf16.msra.mxu1 %v7480_v25  ;;  %v7542_v25 = vld [vmem:[%s10576_s7 + $0x85c] ss:$28 sps:$4 sm:$0xff]  }
 0x332   :  { %5717 = vmatprep.subr.bf16.mxu1 %v7488_v26  ;;  %v7537_v26 = vld [vmem:[%s10576_s7 + $0x4d8] ss:$28 sps:$4 sm:$0xff]  }
 0x335   :  { %5718 = vmatpush2.bf16.msra.mxu1 %v7486_v33  ;;  %v7540_v33 = vld [vmem:[%s10576_s7 + $0x858] ss:$28 sps:$4 sm:$0xff]  }
 0x336   :  { %5719 = vmatprep.subr.bf16.mxu1 %v7494_v34  ;;  %v7545_v34 = vld [vmem:[%s10576_s7 + $0x4a4] ss:$28 sps:$4 sm:$0xff]  }
 0x339   :  { %5720 = vmatpush2.bf16.msra.mxu1 %v7492_v39  ;;  %v7548_v39 = vld [vmem:[%s10576_s7 + $0x824] ss:$28 sps:$4 sm:$0xff]  }
 0x33a   :  { %5721 = vmatprep.subr.bf16.mxu1 %v7500_v35  ;;  %v7543_v35 = vld [vmem:[%s10576_s7 + $0x4a0] ss:$28 sps:$4 sm:$0xff]  }
 0x33d   :  { %5722 = vmatpush2.bf16.msra.mxu1 %v7498_v41  ;;  %v7546_v41 = vld [vmem:[%s10576_s7 + $0x820] ss:$28 sps:$4 sm:$0xff]  }
 0x33e   :  { %5723 = vmatprep.subr.bf16.mxu1 %v7506_v40  ;;  %v7551_v40 = vld [vmem:[%s10576_s7 + $0x46c] ss:$28 sps:$4 sm:$0xff]  }
 0x341   :  { %5724 = vmatpush2.bf16.msra.mxu1 %v7504_v38  ;;  %v7554_v38 = vld [vmem:[%s10576_s7 + $0x7ec] ss:$28 sps:$4 sm:$0xff]  }
 0x342   :  { %v2584_v48 = vpop.f32.mrf.mxu1  ;;  %5725 = vmatprep.subr.bf16.mxu1 %v7512_v42  ;;  %v7552_v42 = vld [vmem:[%s10576_s7 + $0x7e8] ss:$28 sps:$4 sm:$0xff]  }
 0x343   :  { %v2627_v37 = vpop.f32.mrf.mxu0  ;;  %v2585_v50 = vadd.f32 %v2584_v48, %v999_v46  ;;  %v7558_v48 = vld [vmem:[%s10576_s7 + $0x7b0] ss:$28 sps:$4 sm:$0xff]  }
 0x344   :  { %v2586_v51 = vpop.f32.mrf.mxu1 }
 0x345   :  { %v2587_v32 = vadd.f32 %v2586_v51, %v1003_v31  ;;  %v2629_v52 = vpop.f32.mrf.mxu0  ;;  %5726 = vmatpush2.bf16.msra.mxu1 %v7510_v47  ;;  %v2628_v60 = vadd.f32 %v2627_v37, %v2585_v50  ;;  %v7560_v47 = vld [vmem:[%s10576_s7 + $0x7b4] ss:$28 sps:$4 sm:$0xff]   ;;  %v7566_v37 = vld [vmem:[%s10576_s7 + $0x77c] ss:$28 sps:$4 sm:$0xff]  }
 0x346   :  { %v2588_v56 = vpop.f32.mrf.mxu1  ;;  %5727 = vmatprep.subr.bf16.mxu1 %v7518_v49  ;;  %v7563_v49 = vld [vmem:[%s10576_s7 + $0x3fc] ss:$28 sps:$4 sm:$0xff]  }
 0x347   :  { %v2630_v54 = vadd.f32 %v2629_v52, %v2587_v32  ;;  %v2589_v55 = vadd.f32 %v2588_v56, %v999_v46  ;;  %v2631_v57 = vpop.f32.mrf.mxu0  ;;  %v2642_v22 = vmul.f32 0.2, %v2628_v60  ;;  %v7557_v46 = vld [vmem:[%s10576_s7 + $0x434] ss:$28 sps:$4 sm:$0xff]   ;;  %v7569_v32 = vld [vmem:[%s10576_s7 + $0x3c4] ss:$28 sps:$4 sm:$0xff]  }
 0x348   :  { %v2590_v61 = vpop.f32.mrf.mxu1  ;;  %v7561_v50 = vld [vmem:[%s10576_s7 + $0x3f8] ss:$28 sps:$4 sm:$0xff]   ;;  %v7572_v52 = vld [vmem:[%s10576_s7 + $0x744] ss:$28 sps:$4 sm:$0xff]  }
 0x349   :  { %v2632_v63 = vadd.f32 %v2631_v57, %v2589_v55  ;;  %v2591_v1 = vadd.f32 %v2590_v61, %v1003_v31  ;;  %5728 = vmatpush2.bf16.msra.mxu1 %v7516_v53  ;;  %v2633_v3 = vpop.f32.mrf.mxu0  ;;  %v2643_v5 = vmul.f32 0.2, %v2630_v54  ;;  %v2658_v16 = vmax.f32 %v2628_v60, %v2642_v22  ;;  %v7555_v31 = vld [vmem:[%s10576_s7 + $0x430] ss:$28 sps:$4 sm:$0xff]   ;;  %v7564_v51 = vld [vmem:[%s10576_s7 + $0x778] ss:$28 sps:$4 sm:$0xff]  }
 0x34a   :  { %5729 = vmatprep.subr.bf16.mxu1 %v7524_v30  ;;  %v7567_v53 = vld [vmem:[%s10576_s7 + $0x3c0] ss:$28 sps:$4 sm:$0xff]   ;;  %v7575_v30 = vld [vmem:[%s10576_s7 + $0x38c] ss:$28 sps:$4 sm:$0xff]   ;;  %v7581_v60 = vld [vmem:[%s10576_s7 + $0x6d4] ss:$28 sps:$4 sm:$0xff]  }
 0x34b   :  { %v2650_v6 = vmul.f32 0.2, %v2632_v63  ;;  %v2634_v8 = vadd.f32 %v2633_v3, %v2591_v1  ;;  %v2659_v14 = vmax.f32 %v2630_v54, %v2643_v5  ;;  %v7570_v56 = vld [vmem:[%s10576_s7 + $0x740] ss:$28 sps:$4 sm:$0xff]   ;;  %v7578_v54 = vld [vmem:[%s10576_s7 + $0x70c] ss:$28 sps:$4 sm:$0xff]  }
 0x34c   :  { %v7573_v55 = vld [vmem:[%s10576_s7 + $0x388] ss:$28 sps:$4 sm:$0xff]   ;;  %v7584_v61 = vld [vmem:[%s10576_s7 + $0xa54] ss:$28 sps:$4 sm:$0xff]   ;;  %v7590_v3 = vld [vmem:[%s10576_s7 + $0xa1c] ss:$28 sps:$4 sm:$0xff]  }
 0x34d   :  { %v2651_v10 = vmul.f32 0.2, %v2634_v8  ;;  %5730 = vmatpush2.bf16.msra.mxu1 %v7522_v2  ;;  %v2666_v12 = vmax.f32 %v2632_v63, %v2650_v6  ;;  %v7576_v57 = vld [vmem:[%s10576_s7 + $0x708] ss:$28 sps:$4 sm:$0xff]   ;;  %v7579_v63 = vld [vmem:[%s10576_s7 + $0x6d0] ss:$28 sps:$4 sm:$0xff]  }
 0x34e   :  { %5731 = vmatprep.subr.bf16.mxu1 %v7530_v4  ;;  %v7582_v1 = vld [vmem:[%s10576_s7 + $0xa50] ss:$28 sps:$4 sm:$0xff]   ;;  %v7587_v2 = vld [vmem:[%s10576_s7 + $0x69c] ss:$28 sps:$4 sm:$0xff]   ;;  %v7593_v6 = vld [vmem:[%s10576_s7 + $0x664] ss:$28 sps:$4 sm:$0xff]  }
 0x34f   :  { %v2667_v15 = vmax.f32 %v2634_v8, %v2651_v10  ;;  %v9645_v20 = vpack.c.bf16 %v2666_v12, %v2658_v16  ;;  %v7585_v4 = vld [vmem:[%s10576_s7 + $0x698] ss:$28 sps:$4 sm:$0xff]   ;;  %v7596_v8 = vld [vmem:[%s10576_s7 + $0x9e4] ss:$28 sps:$4 sm:$0xff]   ;;  %v7602_v12 = vld [vmem:[%s10576_s7 + $0x9ac] ss:$28 sps:$4 sm:$0xff]  }
 0x350   :  { %v7588_v5 = vld [vmem:[%s10576_s7 + $0xa18] ss:$28 sps:$4 sm:$0xff]   ;;  %v7591_v22 = vld [vmem:[%s10576_s7 + $0x660] ss:$28 sps:$4 sm:$0xff]  }
 0x351   :  { %v9637_v17 = vpack.c.bf16 %v2667_v15, %v2659_v14  ;;  %5732 = vmatpush2.bf16.msra.mxu1 %v7528_v11  ;;  %v7594_v10 = vld [vmem:[%s10576_s7 + $0x9e0] ss:$28 sps:$4 sm:$0xff]   ;;  %v7599_v11 = vld [vmem:[%s10576_s7 + $0x62c] ss:$28 sps:$4 sm:$0xff]   ;;  %v7605_v15 = vld [vmem:[%s10576_s7 + $0x5f4] ss:$28 sps:$4 sm:$0xff]  }
 0x352   :  { %5787 = vmatprep.subr.bf16.mxu1 %v7536_v13  ;;  %v7597_v13 = vld [vmem:[%s10576_s7 + $0x628] ss:$28 sps:$4 sm:$0xff]   ;;  %v7608_v16 = vld [vmem:[%s10576_s7 + $0x974] ss:$28 sps:$4 sm:$0xff]  }
 0x353   :  { %5690 = vmatprep.mubr.bf16.mxu0 %v9637_v17  ;;  %v7600_v14 = vld [vmem:[%s10576_s7 + $0x9a8] ss:$28 sps:$4 sm:$0xff]  }
 0x354   :  { %5734 = vmatmul.mubr.bf16.vlgmr.msra.gmra.mxu1 %v9316_v62  ;;  %5691 = vmatmul.mubr.bf16.vlgmr.msra.gmra.mxu0 %v9645_v20 }
 0x355   :  { %5745 = vmatpush1.bf16.msra.mxu0 %v7531_v18  ;;  %5788 = vmatpush1.bf16.msra.mxu1 %v7534_v19  ;;  %v7603_v18 = vld [vmem:[%s10576_s7 + $0x5f0] ss:$28 sps:$4 sm:$0xff]  }
 0x356   :  { %5819 = vmatprep.mubr.bf16.mxu1 %v9528_v7  ;;  %5776 = vmatprep.mubr.bf16.mxu0 %v9353_v43  ;;  %v7606_v19 = vld [vmem:[%s10576_s7 + $0x970] ss:$28 sps:$4 sm:$0xff]  }
 0x357   :  { %5746 = vmatprep.subr.bf16.mxu0 %v7539_v23  ;;  %5789 = vmatprep.subr.bf16.mxu1 %v7542_v25  ;;  %v7611_v23 = vld [vmem:[%s10576_s7 + $0x5bc] ss:$28 sps:$4 sm:$0xff]  }
 0x358   :  { %v7614_v25 = vld [vmem:[%s10576_s7 + $0x93c] ss:$28 sps:$4 sm:$0xff]  }
 0x359   :  { %5747 = vmatpush1.bf16.msra.mxu0 %v7537_v26  ;;  %5790 = vmatpush1.bf16.msra.mxu1 %v7540_v33  ;;  %v7609_v26 = vld [vmem:[%s10576_s7 + $0x5b8] ss:$28 sps:$4 sm:$0xff]  }
 0x35a   :  { %5748 = vmatprep.subr.bf16.mxu0 %v7545_v34  ;;  %5791 = vmatprep.subr.bf16.mxu1 %v7548_v39  ;;  %v7612_v33 = vld [vmem:[%s10576_s7 + $0x938] ss:$28 sps:$4 sm:$0xff]   ;;  %v7617_v34 = vld [vmem:[%s10576_s7 + $0x584] ss:$28 sps:$4 sm:$0xff]  }
 0x35b   :  { %v7620_v39 = vld [vmem:[%s10576_s7 + $0x904] ss:$28 sps:$4 sm:$0xff]  }
 0x35d   :  { %5749 = vmatpush1.bf16.msra.mxu0 %v7543_v35  ;;  %5792 = vmatpush1.bf16.msra.mxu1 %v7546_v41  ;;  %v7615_v35 = vld [vmem:[%s10576_s7 + $0x580] ss:$28 sps:$4 sm:$0xff]  }
 0x35e   :  { %5750 = vmatprep.subr.bf16.mxu0 %v7551_v40  ;;  %5793 = vmatprep.subr.bf16.mxu1 %v7554_v38  ;;  %v7618_v41 = vld [vmem:[%s10576_s7 + $0x900] ss:$28 sps:$4 sm:$0xff]   ;;  %v7623_v40 = vld [vmem:[%s10576_s7 + $0x54c] ss:$28 sps:$4 sm:$0xff]  }
 0x35f   :  { %v7626_v38 = vld [vmem:[%s10576_s7 + $0x8cc] ss:$28 sps:$4 sm:$0xff]  }
 0x361   :  { %5751 = vmatpush1.bf16.msra.mxu0 %v7549_v45  ;;  %5794 = vmatpush1.bf16.msra.mxu1 %v7552_v42  ;;  %v7621_v45 = vld [vmem:[%s10576_s7 + $0x548] ss:$28 sps:$4 sm:$0xff]  }
 0x362   :  { %5752 = vmatprep.subr.bf16.mxu0 %v7557_v46  ;;  %5795 = vmatprep.subr.bf16.mxu1 %v7560_v47  ;;  %v7624_v42 = vld [vmem:[%s10576_s7 + $0x8c8] ss:$28 sps:$4 sm:$0xff]   ;;  %v7629_v46 = vld [vmem:[%s10576_s7 + $0xc14] ss:$28 sps:$4 sm:$0xff]   ;;  %v7632_v47 = vld [vmem:[%s10576_s7 + $0x19c] ss:$28 sps:$4 sm:$0xff]  }
 0x365   :  { %5753 = vmatpush1.bf16.msra.mxu0 %v7555_v31  ;;  %5796 = vmatpush1.bf16.msra.mxu1 %v7558_v48  ;;  %v7627_v31 = vld [vmem:[%s10576_s7 + $0xc10] ss:$28 sps:$4 sm:$0xff]   ;;  %v7630_v48 = vld [vmem:[%s10576_s7 + $0x198] ss:$28 sps:$4 sm:$0xff]  }
 0x366   :  { %5754 = vmatprep.subr.bf16.mxu0 %v7563_v49  ;;  %5797 = vmatprep.subr.bf16.mxu1 %v7566_v37  ;;  %v7635_v49 = vld [vmem:[%s10576_s7 + $0xbdc] ss:$28 sps:$4 sm:$0xff]   ;;  %v7638_v37 = vld [vmem:[%s10576_s7 + $0x164] ss:$28 sps:$4 sm:$0xff]  }
 0x369   :  { %5755 = vmatpush1.bf16.msra.mxu0 %v7561_v50  ;;  %5798 = vmatpush1.bf16.msra.mxu1 %v7564_v51  ;;  %v7633_v50 = vld [vmem:[%s10576_s7 + $0xbd8] ss:$28 sps:$4 sm:$0xff]   ;;  %v7636_v51 = vld [vmem:[%s10576_s7 + $0x160] ss:$28 sps:$4 sm:$0xff]  }
 0x36a   :  { %5756 = vmatprep.subr.bf16.mxu0 %v7569_v32  ;;  %5799 = vmatprep.subr.bf16.mxu1 %v7572_v52  ;;  %v7641_v32 = vld [vmem:[%s10576_s7 + $0xba4] ss:$28 sps:$4 sm:$0xff]   ;;  %v7644_v52 = vld [vmem:[%s10576_s7 + $0x12c] ss:$28 sps:$4 sm:$0xff]  }
 0x36d   :  { %5757 = vmatpush1.bf16.msra.mxu0 %v7567_v53  ;;  %5800 = vmatpush1.bf16.msra.mxu1 %v7570_v56  ;;  %v7639_v53 = vld [vmem:[%s10576_s7 + $0xba0] ss:$28 sps:$4 sm:$0xff]   ;;  %v7642_v56 = vld [vmem:[%s10576_s7 + $0x128] ss:$28 sps:$4 sm:$0xff]  }
 0x36e   :  { %5758 = vmatprep.subr.bf16.mxu0 %v7575_v30  ;;  %5801 = vmatprep.subr.bf16.mxu1 %v7578_v54  ;;  %v7647_v30 = vld [vmem:[%s10576_s7 + $0xb6c] ss:$28 sps:$4 sm:$0xff]   ;;  %v7650_v54 = vld [vmem:[%s10576_s7 + $0xf4] ss:$28 sps:$4 sm:$0xff]  }
 0x371   :  { %5759 = vmatpush1.bf16.msra.mxu0 %v7573_v55  ;;  %5802 = vmatpush1.bf16.msra.mxu1 %v7576_v57  ;;  %v7645_v55 = vld [vmem:[%s10576_s7 + $0xb68] ss:$28 sps:$4 sm:$0xff]   ;;  %v7648_v57 = vld [vmem:[%s10576_s7 + $0xf0] ss:$28 sps:$4 sm:$0xff]  }
 0x372   :  { %5760 = vmatprep.subr.bf16.mxu0 %v7581_v60  ;;  %5803 = vmatprep.subr.bf16.mxu1 %v7584_v61  ;;  %v7653_v60 = vld [vmem:[%s10576_s7 + $0xb34] ss:$28 sps:$4 sm:$0xff]   ;;  %v7656_v61 = vld [vmem:[%s10576_s7 + $0xbc] ss:$28 sps:$4 sm:$0xff]  }
 0x375   :  { %5761 = vmatpush2.bf16.msra.mxu0 %v7579_v63  ;;  %5804 = vmatpush2.bf16.msra.mxu1 %v7582_v1  ;;  %v7651_v63 = vld [vmem:[%s10576_s7 + $0xb30] ss:$28 sps:$4 sm:$0xff]   ;;  %v7654_v1 = vld [vmem:[%s10576_s7 + $0xb8] ss:$28 sps:$4 sm:$0xff]  }
 0x376   :  { %5762 = vmatprep.subr.bf16.mxu0 %v7587_v2  ;;  %5805 = vmatprep.subr.bf16.mxu1 %v7590_v3  ;;  %v7659_v2 = vld [vmem:[%s10576_s7 + $0xafc] ss:$28 sps:$4 sm:$0xff]   ;;  %v7662_v3 = vld [vmem:[%s10576_s7 + $0x84] ss:$28 sps:$4 sm:$0xff]  }
 0x379   :  { %5763 = vmatpush2.bf16.msra.mxu0 %v7585_v4  ;;  %5806 = vmatpush2.bf16.msra.mxu1 %v7588_v5  ;;  %v7657_v4 = vld [vmem:[%s10576_s7 + $0xaf8] ss:$28 sps:$4 sm:$0xff]   ;;  %v7660_v5 = vld [vmem:[%s10576_s7 + $0x80] ss:$28 sps:$4 sm:$0xff]  }
 0x37a   :  { %5764 = vmatprep.subr.bf16.mxu0 %v7593_v6  ;;  %5807 = vmatprep.subr.bf16.mxu1 %v7596_v8  ;;  %v7665_v6 = vld [vmem:[%s10576_s7 + $0xac4] ss:$28 sps:$4 sm:$0xff]   ;;  %v7668_v8 = vld [vmem:[%s10576_s7 + $0x4c] ss:$28 sps:$4 sm:$0xff]  }
 0x37d   :  { %5765 = vmatpush2.bf16.msra.mxu0 %v7591_v22  ;;  %5808 = vmatpush2.bf16.msra.mxu1 %v7594_v10  ;;  %v7663_v22 = vld [vmem:[%s10576_s7 + $0xac0] ss:$28 sps:$4 sm:$0xff]   ;;  %v7666_v10 = vld [vmem:[%s10576_s7 + $0x48] ss:$28 sps:$4 sm:$0xff]  }
 0x37e   :  { %5766 = vmatprep.subr.bf16.mxu0 %v7599_v11  ;;  %5809 = vmatprep.subr.bf16.mxu1 %v7602_v12  ;;  %v7671_v11 = vld [vmem:[%s10576_s7 + $0xa8c] ss:$28 sps:$4 sm:$0xff]   ;;  %v7674_v12 = vld [vmem:[%s10576_s7 + $0x14] ss:$28 sps:$4 sm:$0xff]  }
 0x381   :  { %5767 = vmatpush2.bf16.msra.mxu0 %v7597_v13  ;;  %5810 = vmatpush2.bf16.msra.mxu1 %v7600_v14  ;;  %v7669_v13 = vld [vmem:[%s10576_s7 + $0xa88] ss:$28 sps:$4 sm:$0xff]   ;;  %v7672_v14 = vld [vmem:[%s10576_s7 + $0x10] ss:$28 sps:$4 sm:$0xff]  }
 0x382   :  { %5768 = vmatprep.subr.bf16.mxu0 %v7605_v15  ;;  %5811 = vmatprep.subr.bf16.mxu1 %v7608_v16  ;;  %v7677_v15 = vld [vmem:[%s10576_s7 + $0xdd4] ss:$28 sps:$4 sm:$0xff]   ;;  %v7680_v16 = vld [vmem:[%s10576_s7 + $0x35c] ss:$28 sps:$4 sm:$0xff]  }
 0x385   :  { %5769 = vmatpush2.bf16.msra.mxu0 %v7603_v18  ;;  %5812 = vmatpush2.bf16.msra.mxu1 %v7606_v19  ;;  %v7675_v18 = vld [vmem:[%s10576_s7 + $0xdd0] ss:$28 sps:$4 sm:$0xff]   ;;  %v7678_v19 = vld [vmem:[%s10576_s7 + $0x358] ss:$28 sps:$4 sm:$0xff]  }
 0x386   :  { %5770 = vmatprep.subr.bf16.mxu0 %v7611_v23  ;;  %5813 = vmatprep.subr.bf16.mxu1 %v7614_v25  ;;  %v7683_v23 = vld [vmem:[%s10576_s7 + $0xd9c] ss:$28 sps:$4 sm:$0xff]   ;;  %v7686_v25 = vld [vmem:[%s10576_s7 + $0x324] ss:$28 sps:$4 sm:$0xff]  }
 0x389   :  { %5771 = vmatpush2.bf16.msra.mxu0 %v7609_v26  ;;  %5814 = vmatpush2.bf16.msra.mxu1 %v7612_v33  ;;  %v7681_v26 = vld [vmem:[%s10576_s7 + $0xd98] ss:$28 sps:$4 sm:$0xff]   ;;  %v7684_v33 = vld [vmem:[%s10576_s7 + $0x320] ss:$28 sps:$4 sm:$0xff]  }
 0x38a   :  { %5772 = vmatprep.subr.bf16.mxu0 %v7617_v34  ;;  %5815 = vmatprep.subr.bf16.mxu1 %v7620_v39  ;;  %v7689_v34 = vld [vmem:[%s10576_s7 + $0xd64] ss:$28 sps:$4 sm:$0xff]   ;;  %v7692_v39 = vld [vmem:[%s10576_s7 + $0x2ec] ss:$28 sps:$4 sm:$0xff]  }
 0x38d   :  { %5773 = vmatpush2.bf16.msra.mxu0 %v7615_v35  ;;  %5816 = vmatpush2.bf16.msra.mxu1 %v7618_v41  ;;  %v7687_v35 = vld [vmem:[%s10576_s7 + $0xd60] ss:$28 sps:$4 sm:$0xff]   ;;  %v7690_v41 = vld [vmem:[%s10576_s7 + $0x2e8] ss:$28 sps:$4 sm:$0xff]  }
 0x38e   :  { %5774 = vmatprep.subr.bf16.mxu0 %v7623_v40  ;;  %5817 = vmatprep.subr.bf16.mxu1 %v7626_v38  ;;  %v7695_v40 = vld [vmem:[%s10576_s7 + $0xd2c] ss:$28 sps:$4 sm:$0xff]   ;;  %v7698_v38 = vld [vmem:[%s10576_s7 + $0x2b4] ss:$28 sps:$4 sm:$0xff]  }
 0x391   :  { %5775 = vmatpush2.bf16.msra.mxu0 %v7621_v45  ;;  %5818 = vmatpush2.bf16.msra.mxu1 %v7624_v42  ;;  %v7693_v45 = vld [vmem:[%s10576_s7 + $0xd28] ss:$28 sps:$4 sm:$0xff]   ;;  %v7696_v42 = vld [vmem:[%s10576_s7 + $0x2b0] ss:$28 sps:$4 sm:$0xff]  }
 0x392   :  { %5830 = vmatprep.subr.bf16.mxu0 %v7629_v46  ;;  %5873 = vmatprep.subr.bf16.mxu1 %v7632_v47  ;;  %v7701_v46 = vld [vmem:[%s10576_s7 + $0xcf4] ss:$28 sps:$4 sm:$0xff]   ;;  %v7704_v47 = vld [vmem:[%s10576_s7 + $0x27c] ss:$28 sps:$4 sm:$0xff]  }
 0x394   :  { %5777 = vmatmul.mubr.bf16.vlgmr.msra.gmra.mxu0 %v9355_v44  ;;  %5820 = vmatmul.mubr.bf16.vlgmr.msra.gmra.mxu1 %v9533_v9 }
 0x395   :  { %5831 = vmatpush1.bf16.msra.mxu0 %v7627_v31  ;;  %5862 = vmatprep.mubr.bf16.mxu0 %v9637_v17  ;;  %v7699_v31 = vld [vmem:[%s10576_s7 + $0xcf0] ss:$28 sps:$4 sm:$0xff]  }
 0x396   :  { %5874 = vmatpush1.bf16.msra.mxu1 %v7630_v48  ;;  %5905 = vmatprep.mubr.bf16.mxu1 %v9169_v0  ;;  %v7702_v48 = vld [vmem:[%s10576_s7 + $0x278] ss:$28 sps:$4 sm:$0xff]  }
 0x397   :  { %5832 = vmatprep.subr.bf16.mxu0 %v7635_v49  ;;  %5875 = vmatprep.subr.bf16.mxu1 %v7638_v37  ;;  %v7707_v49 = vld [vmem:[%s10576_s7 + $0xcbc] ss:$28 sps:$4 sm:$0xff]   ;;  %v7710_v37 = vld [vmem:[%s10576_s7 + $0x244] ss:$28 sps:$4 sm:$0xff]  }
 0x399   :  { %5833 = vmatpush1.bf16.msra.mxu0 %v7633_v50  ;;  %v7705_v50 = vld [vmem:[%s10576_s7 + $0xcb8] ss:$28 sps:$4 sm:$0xff]  }
 0x39a   :  { %5876 = vmatpush1.bf16.msra.mxu1 %v7636_v51  ;;  %5834 = vmatprep.subr.bf16.mxu0 %v7641_v32  ;;  %v7708_v51 = vld [vmem:[%s10576_s7 + $0x240] ss:$28 sps:$4 sm:$0xff]  }
 0x39b   :  { %5877 = vmatprep.subr.bf16.mxu1 %v7644_v52  ;;  %v7713_v32 = vld [vmem:[%s10576_s7 + $0xc84] ss:$28 sps:$4 sm:$0xff]   ;;  %v7716_v52 = vld [vmem:[%s10576_s7 + $0x20c] ss:$28 sps:$4 sm:$0xff]  }
 0x39d   :  { %5835 = vmatpush1.bf16.msra.mxu0 %v7639_v53  ;;  %v7711_v53 = vld [vmem:[%s10576_s7 + $0xc80] ss:$28 sps:$4 sm:$0xff]  }
 0x39e   :  { %5878 = vmatpush1.bf16.msra.mxu1 %v7642_v56  ;;  %5836 = vmatprep.subr.bf16.mxu0 %v7647_v30  ;;  %v7714_v56 = vld [vmem:[%s10576_s7 + $0x208] ss:$28 sps:$4 sm:$0xff]  }
 0x39f   :  { %5879 = vmatprep.subr.bf16.mxu1 %v7650_v54  ;;  %v7719_v30 = vld [vmem:[%s10576_s7 + $0xc4c] ss:$28 sps:$4 sm:$0xff]   ;;  %v7722_v54 = vld [vmem:[%s10576_s7 + $0x1d4] ss:$28 sps:$4 sm:$0xff]  }
 0x3a1   :  { %5837 = vmatpush1.bf16.msra.mxu0 %v7645_v55  ;;  %v7717_v55 = vld [vmem:[%s10576_s7 + $0xc48] ss:$28 sps:$4 sm:$0xff]  }
 0x3a2   :  { %5880 = vmatpush1.bf16.msra.mxu1 %v7648_v57  ;;  %5838 = vmatprep.subr.bf16.mxu0 %v7653_v60  ;;  %v7720_v57 = vld [vmem:[%s10576_s7 + $0x1d0] ss:$28 sps:$4 sm:$0xff]   ;;  %v7725_v60 = vld [vmem:[%s10576_s7 + $0x51c] ss:$28 sps:$4 sm:$0xff]  }
 0x3a3   :  { %5881 = vmatprep.subr.bf16.mxu1 %v7656_v61  ;;  %v7728_v61 = vld [vmem:[%s10576_s7 + $0x89c] ss:$28 sps:$4 sm:$0xff]  }
 0x3a5   :  { %5839 = vmatpush1.bf16.msra.mxu0 %v7651_v63  ;;  %v7723_v63 = vld [vmem:[%s10576_s7 + $0x518] ss:$28 sps:$4 sm:$0xff]  }
 0x3a6   :  { %5882 = vmatpush1.bf16.msra.mxu1 %v7654_v1  ;;  %5840 = vmatprep.subr.bf16.mxu0 %v7659_v2  ;;  %v7726_v1 = vld [vmem:[%s10576_s7 + $0x898] ss:$28 sps:$4 sm:$0xff]   ;;  %v7731_v2 = vld [vmem:[%s10576_s7 + $0x4e4] ss:$28 sps:$4 sm:$0xff]  }
 0x3a7   :  { %5883 = vmatprep.subr.bf16.mxu1 %v7662_v3  ;;  %v7734_v3 = vld [vmem:[%s10576_s7 + $0x864] ss:$28 sps:$4 sm:$0xff]  }
 0x3a9   :  { %5841 = vmatpush1.bf16.msra.mxu0 %v7657_v4  ;;  %v7729_v4 = vld [vmem:[%s10576_s7 + $0x4e0] ss:$28 sps:$4 sm:$0xff]  }
 0x3aa   :  { %5884 = vmatpush1.bf16.msra.mxu1 %v7660_v5  ;;  %5842 = vmatprep.subr.bf16.mxu0 %v7665_v6  ;;  %v7732_v5 = vld [vmem:[%s10576_s7 + $0x860] ss:$28 sps:$4 sm:$0xff]   ;;  %v7737_v6 = vld [vmem:[%s10576_s7 + $0x4ac] ss:$28 sps:$4 sm:$0xff]  }
 0x3ab   :  { %5885 = vmatprep.subr.bf16.mxu1 %v7668_v8  ;;  %v7740_v8 = vld [vmem:[%s10576_s7 + $0x82c] ss:$28 sps:$4 sm:$0xff]  }
 0x3ad   :  { %5843 = vmatpush1.bf16.msra.mxu0 %v7663_v22  ;;  %v7735_v22 = vld [vmem:[%s10576_s7 + $0x4a8] ss:$28 sps:$4 sm:$0xff]  }
 0x3ae   :  { %5886 = vmatpush1.bf16.msra.mxu1 %v7666_v10  ;;  %5844 = vmatprep.subr.bf16.mxu0 %v7671_v11  ;;  %v7738_v10 = vld [vmem:[%s10576_s7 + $0x828] ss:$28 sps:$4 sm:$0xff]   ;;  %v7743_v11 = vld [vmem:[%s10576_s7 + $0x474] ss:$28 sps:$4 sm:$0xff]  }
 0x3af   :  { %5887 = vmatprep.subr.bf16.mxu1 %v7674_v12  ;;  %v7746_v12 = vld [vmem:[%s10576_s7 + $0x7f4] ss:$28 sps:$4 sm:$0xff]  }
 0x3b1   :  { %5845 = vmatpush1.bf16.msra.mxu0 %v7669_v13  ;;  %v7741_v13 = vld [vmem:[%s10576_s7 + $0x470] ss:$28 sps:$4 sm:$0xff]  }
 0x3b2   :  { %5888 = vmatpush1.bf16.msra.mxu1 %v7672_v14  ;;  %5846 = vmatprep.subr.bf16.mxu0 %v7677_v15  ;;  %v7744_v14 = vld [vmem:[%s10576_s7 + $0x7f0] ss:$28 sps:$4 sm:$0xff]   ;;  %v7749_v15 = vld [vmem:[%s10576_s7 + $0x43c] ss:$28 sps:$4 sm:$0xff]  }
 0x3b3   :  { %5889 = vmatprep.subr.bf16.mxu1 %v7680_v16  ;;  %v7752_v16 = vld [vmem:[%s10576_s7 + $0x7bc] ss:$28 sps:$4 sm:$0xff]  }
 0x3b5   :  { %5847 = vmatpush2.bf16.msra.mxu0 %v7675_v18  ;;  %v7747_v18 = vld [vmem:[%s10576_s7 + $0x438] ss:$28 sps:$4 sm:$0xff]  }
 0x3b6   :  { %5890 = vmatpush2.bf16.msra.mxu1 %v7678_v19  ;;  %5848 = vmatprep.subr.bf16.mxu0 %v7683_v23  ;;  %v7750_v19 = vld [vmem:[%s10576_s7 + $0x7b8] ss:$28 sps:$4 sm:$0xff]   ;;  %v7755_v23 = vld [vmem:[%s10576_s7 + $0x404] ss:$28 sps:$4 sm:$0xff]  }
 0x3b7   :  { %5891 = vmatprep.subr.bf16.mxu1 %v7686_v25  ;;  %v7758_v25 = vld [vmem:[%s10576_s7 + $0x784] ss:$28 sps:$4 sm:$0xff]  }
 0x3b9   :  { %5849 = vmatpush2.bf16.msra.mxu0 %v7681_v26  ;;  %v7753_v26 = vld [vmem:[%s10576_s7 + $0x400] ss:$28 sps:$4 sm:$0xff]  }
 0x3ba   :  { %5892 = vmatpush2.bf16.msra.mxu1 %v7684_v33  ;;  %5850 = vmatprep.subr.bf16.mxu0 %v7689_v34  ;;  %v7756_v33 = vld [vmem:[%s10576_s7 + $0x780] ss:$28 sps:$4 sm:$0xff]   ;;  %v7761_v34 = vld [vmem:[%s10576_s7 + $0x3cc] ss:$28 sps:$4 sm:$0xff]  }
 0x3bb   :  { %5893 = vmatprep.subr.bf16.mxu1 %v7692_v39  ;;  %v7764_v39 = vld [vmem:[%s10576_s7 + $0x74c] ss:$28 sps:$4 sm:$0xff]  }
 0x3bd   :  { %5851 = vmatpush2.bf16.msra.mxu0 %v7687_v35  ;;  %v7759_v35 = vld [vmem:[%s10576_s7 + $0x3c8] ss:$28 sps:$4 sm:$0xff]  }
 0x3be   :  { %5894 = vmatpush2.bf16.msra.mxu1 %v7690_v41  ;;  %5852 = vmatprep.subr.bf16.mxu0 %v7695_v40  ;;  %v7762_v41 = vld [vmem:[%s10576_s7 + $0x748] ss:$28 sps:$4 sm:$0xff]   ;;  %v7767_v40 = vld [vmem:[%s10576_s7 + $0x394] ss:$28 sps:$4 sm:$0xff]  }
 0x3bf   :  { %5895 = vmatprep.subr.bf16.mxu1 %v7698_v38  ;;  %v7770_v38 = vld [vmem:[%s10576_s7 + $0x714] ss:$28 sps:$4 sm:$0xff]  }
 0x3c1   :  { %5853 = vmatpush2.bf16.msra.mxu0 %v7693_v45  ;;  %v7765_v45 = vld [vmem:[%s10576_s7 + $0x390] ss:$28 sps:$4 sm:$0xff]  }
 0x3c2   :  { %5896 = vmatpush2.bf16.msra.mxu1 %v7696_v42  ;;  %5854 = vmatprep.subr.bf16.mxu0 %v7701_v46  ;;  %v7768_v42 = vld [vmem:[%s10576_s7 + $0x710] ss:$28 sps:$4 sm:$0xff]   ;;  %v7773_v46 = vld [vmem:[%s10576_s7 + $0x6dc] ss:$28 sps:$4 sm:$0xff]  }
 0x3c3   :  { %5897 = vmatprep.subr.bf16.mxu1 %v7704_v47  ;;  %v7776_v47 = vld [vmem:[%s10576_s7 + $0xa5c] ss:$28 sps:$4 sm:$0xff]  }
 0x3c5   :  { %5855 = vmatpush2.bf16.msra.mxu0 %v7699_v31  ;;  %v7771_v31 = vld [vmem:[%s10576_s7 + $0x6d8] ss:$28 sps:$4 sm:$0xff]  }
 0x3c6   :  { %5898 = vmatpush2.bf16.msra.mxu1 %v7702_v48  ;;  %5856 = vmatprep.subr.bf16.mxu0 %v7707_v49  ;;  %v7774_v48 = vld [vmem:[%s10576_s7 + $0xa58] ss:$28 sps:$4 sm:$0xff]   ;;  %v7779_v49 = vld [vmem:[%s10576_s7 + $0x6a4] ss:$28 sps:$4 sm:$0xff]  }
 0x3c7   :  { %5899 = vmatprep.subr.bf16.mxu1 %v7710_v37  ;;  %v7782_v37 = vld [vmem:[%s10576_s7 + $0xa24] ss:$28 sps:$4 sm:$0xff]  }
 0x3c9   :  { %5857 = vmatpush2.bf16.msra.mxu0 %v7705_v50  ;;  %v7777_v50 = vld [vmem:[%s10576_s7 + $0x6a0] ss:$28 sps:$4 sm:$0xff]  }
 0x3ca   :  { %5900 = vmatpush2.bf16.msra.mxu1 %v7708_v51  ;;  %5858 = vmatprep.subr.bf16.mxu0 %v7713_v32  ;;  %v7780_v51 = vld [vmem:[%s10576_s7 + $0xa20] ss:$28 sps:$4 sm:$0xff]   ;;  %v7785_v32 = vld [vmem:[%s10576_s7 + $0x66c] ss:$28 sps:$4 sm:$0xff]  }
 0x3cb   :  { %5901 = vmatprep.subr.bf16.mxu1 %v7716_v52  ;;  %v7788_v52 = vld [vmem:[%s10576_s7 + $0x9ec] ss:$28 sps:$4 sm:$0xff]  }
 0x3cd   :  { %5859 = vmatpush2.bf16.msra.mxu0 %v7711_v53  ;;  %v7783_v53 = vld [vmem:[%s10576_s7 + $0x668] ss:$28 sps:$4 sm:$0xff]  }
 0x3ce   :  { %5902 = vmatpush2.bf16.msra.mxu1 %v7714_v56  ;;  %5860 = vmatprep.subr.bf16.mxu0 %v7719_v30  ;;  %v7786_v56 = vld [vmem:[%s10576_s7 + $0x9e8] ss:$28 sps:$4 sm:$0xff]   ;;  %v7791_v30 = vld [vmem:[%s10576_s7 + $0x634] ss:$28 sps:$4 sm:$0xff]  }
 0x3cf   :  { %5903 = vmatprep.subr.bf16.mxu1 %v7722_v54  ;;  %v7794_v54 = vld [vmem:[%s10576_s7 + $0x9b4] ss:$28 sps:$4 sm:$0xff]  }
 0x3d1   :  { %5861 = vmatpush2.bf16.msra.mxu0 %v7717_v55  ;;  %v5563_v55 = vpop.f32.mrf.mxu1 }
 0x3d2   :  { %5904 = vmatpush2.bf16.msra.mxu1 %v7720_v57  ;;  %5916 = vmatprep.subr.bf16.mxu0 %v7725_v60  ;;  %v7789_v57 = vld [vmem:[%s10576_s7 + $0x630] ss:$28 sps:$4 sm:$0xff]  }
 0x3d3   :  { %5959 = vmatprep.subr.bf16.mxu1 %v7728_v61  ;;  %v7792_v60 = vld [vmem:[%s10576_s7 + $0x9b0] ss:$28 sps:$4 sm:$0xff]   ;;  %v7797_v61 = vld [vmem:[%s10576_s7 + $0x5fc] ss:$28 sps:$4 sm:$0xff]  }
 0x3d4   :  { %5863 = vmatmul.mubr.bf16.vlgmr.msra.gmra.mxu0 %v9645_v20 }
 0x3d5   :  { %5906 = vmatmul.mubr.bf16.vlgmr.msra.gmra.mxu1 %v9316_v62  ;;  %5917 = vmatpush1.bf16.msra.mxu0 %v7723_v63  ;;  %v7800_v63 = vld [vmem:[%s10576_s7 + $0x97c] ss:$28 sps:$4 sm:$0xff]  }
 0x3d6   :  { %5948 = vmatprep.mubr.bf16.mxu0 %v9353_v43  ;;  %5960 = vmatpush1.bf16.msra.mxu1 %v7726_v1  ;;  %v5565_v1 = vpop.f32.mrf.mxu1 }
 0x3d7   :  { %5991 = vmatprep.mubr.bf16.mxu1 %v9528_v7  ;;  %5918 = vmatprep.subr.bf16.mxu0 %v7731_v2  ;;  %v7795_v2 = vld [vmem:[%s10576_s7 + $0x5f8] ss:$28 sps:$4 sm:$0xff]  }
 0x3d8   :  { %5961 = vmatprep.subr.bf16.mxu1 %v7734_v3  ;;  %v7798_v3 = vld [vmem:[%s10576_s7 + $0x978] ss:$28 sps:$4 sm:$0xff]  }
 0x3d9   :  { %5919 = vmatpush1.bf16.msra.mxu0 %v7729_v4  ;;  %v7803_v4 = vld [vmem:[%s10576_s7 + $0x5c4] ss:$28 sps:$4 sm:$0xff]  }
 0x3da   :  { %5962 = vmatpush1.bf16.msra.mxu1 %v7732_v5  ;;  %5920 = vmatprep.subr.bf16.mxu0 %v7737_v6  ;;  %v7806_v5 = vld [vmem:[%s10576_s7 + $0x944] ss:$28 sps:$4 sm:$0xff]   ;;  %v5567_v6 = vpop.f32.mrf.mxu1 }
 0x3db   :  { %5963 = vmatprep.subr.bf16.mxu1 %v7740_v8  ;;  %v7801_v8 = vld [vmem:[%s10576_s7 + $0x5c0] ss:$28 sps:$4 sm:$0xff]  }
 0x3dd   :  { %5921 = vmatpush1.bf16.msra.mxu0 %v7735_v22  ;;  %v5606_v22 = vpop.f32.mrf.mxu0 }
 0x3de   :  { %5964 = vmatpush1.bf16.msra.mxu1 %v7738_v10  ;;  %5922 = vmatprep.subr.bf16.mxu0 %v7743_v11  ;;  %v7804_v10 = vld [vmem:[%s10576_s7 + $0x940] ss:$28 sps:$4 sm:$0xff]   ;;  %v7809_v11 = vld [vmem:[%s10576_s7 + $0x58c] ss:$28 sps:$4 sm:$0xff]  }
 0x3df   :  { %5965 = vmatprep.subr.bf16.mxu1 %v7746_v12  ;;  %v7812_v12 = vld [vmem:[%s10576_s7 + $0x90c] ss:$28 sps:$4 sm:$0xff]  }
 0x3e1   :  { %5923 = vmatpush1.bf16.msra.mxu0 %v7741_v13  ;;  %v10209_v13 = vld [vmem:[%s10578_s8] sm:$0x7f] }
 0x3e2   :  { %5966 = vmatpush1.bf16.msra.mxu1 %v7744_v14  ;;  %5924 = vmatprep.subr.bf16.mxu0 %v7749_v15  ;;  %v5569_v14 = vpop.f32.mrf.mxu1  ;;  %v7807_v15 = vld [vmem:[%s10576_s7 + $0x588] ss:$28 sps:$4 sm:$0xff]  }
 0x3e3   :  { %5967 = vmatprep.subr.bf16.mxu1 %v7752_v16  ;;  %v5608_v16 = vpop.f32.mrf.mxu0 }
 0x3e5   :  { %5925 = vmatpush1.bf16.msra.mxu0 %v7747_v18  ;;  %v5649_v18 = vpop.f32.mrf.mxu1 }
 0x3e6   :  { %5968 = vmatpush1.bf16.msra.mxu1 %v7750_v19  ;;  %5926 = vmatprep.subr.bf16.mxu0 %v7755_v23  ;;  %v7810_v19 = vld [vmem:[%s10576_s7 + $0x908] ss:$28 sps:$4 sm:$0xff]   ;;  %v7815_v23 = vld [vmem:[%s10576_s7 + $0x554] ss:$28 sps:$4 sm:$0xff]  }
 0x3e7   :  { %5969 = vmatprep.subr.bf16.mxu1 %v7758_v25  ;;  %v3193_v25 = vrot.slane %v10209_v13, %v8272_v29  ;;  %v7816_v29 = vld [vmem:[%s10576_s7 + $0x8d0] ss:$28 sps:$4 sm:$0xff]  }
 0x3e9   :  { %5927 = vmatpush1.bf16.msra.mxu0 %v7753_v26  ;;  %v7818_v26 = vld [vmem:[%s10576_s7 + $0x8d4] ss:$28 sps:$4 sm:$0xff]  }
 0x3ea   :  { %5970 = vmatpush1.bf16.msra.mxu1 %v7756_v33  ;;  %5928 = vmatprep.subr.bf16.mxu0 %v7761_v34  ;;  %v3197_v33 = vrot.slane %v10209_v13, %v8269_v28  ;;  %v7813_v34 = vld [vmem:[%s10576_s7 + $0x550] ss:$28 sps:$4 sm:$0xff]   ;;  %v7822_v28 = vld [vmem:[%s10576_s7 + $0x360] ss:$28 sps:$4 sm:$0xff]  }
 0x3eb   :  { %5971 = vmatprep.subr.bf16.mxu1 %v7764_v39  ;;  %v5610_v39 = vpop.f32.mrf.mxu0 }
 0x3ed   :  { %5929 = vmatpush1.bf16.msra.mxu0 %v7759_v35  ;;  %v5651_v35 = vpop.f32.mrf.mxu1 }
 0x3ee   :  { %5972 = vmatpush1.bf16.msra.mxu1 %v7762_v41  ;;  %5930 = vmatprep.subr.bf16.mxu0 %v7767_v40  ;;  %v7821_v41 = vld [vmem:[%s10576_s7 + $0xc1c] ss:$28 sps:$4 sm:$0xff]   ;;  %v5564_v40 = vadd.f32 %v5563_v55, %v3193_v25 }
 0x3ef   :  { %5973 = vmatprep.subr.bf16.mxu1 %v7770_v38  ;;  %v5566_v38 = vadd.f32 %v5565_v1, %v3197_v33 }
 0x3f1   :  { %5931 = vmatpush1.bf16.msra.mxu0 %v7765_v45  ;;  %v5607_v45 = vadd.f32 %v5606_v22, %v5564_v40  ;;  %v7852_v40 = vld [vmem:[%s10576_s7 + $0x210] ss:$28 sps:$4 sm:$0xff]  }
 0x3f2   :  { %5974 = vmatpush1.bf16.msra.mxu1 %v7768_v42  ;;  %5932 = vmatprep.subr.bf16.mxu0 %v7773_v46  ;;  %v7819_v42 = vld [vmem:[%s10576_s7 + $0xc18] ss:$28 sps:$4 sm:$0xff]   ;;  %v5612_v46 = vpop.f32.mrf.mxu0 }
 0x3f3   :  { %5975 = vmatprep.subr.bf16.mxu1 %v7776_v47  ;;  %v5653_v47 = vpop.f32.mrf.mxu1 }
 0x3f5   :  { %5933 = vmatpush2.bf16.msra.mxu0 %v7771_v31  ;;  %v7823_v31 = vld [vmem:[%s10576_s7 + $0x1a0] ss:$28 sps:$4 sm:$0xff]   ;;  %v5655_v55 = vpop.f32.mrf.mxu1 }
 0x3f6   :  { %5976 = vmatpush2.bf16.msra.mxu1 %v7774_v48  ;;  %5934 = vmatprep.subr.bf16.mxu0 %v7779_v49  ;;  %v5568_v48 = vadd.f32 %v5567_v6, %v3193_v25  ;;  %v5609_v49 = vadd.f32 %v5608_v16, %v5566_v38  ;;  %v7841_v16 = vld [vmem:[%s10576_s7 + $0xb3c] ss:$28 sps:$4 sm:$0xff]   ;;  %v7846_v25 = vld [vmem:[%s10576_s7 + $0xb04] ss:$28 sps:$4 sm:$0xff]  }
 0x3f7   :  { %5977 = vmatprep.subr.bf16.mxu1 %v7782_v37  ;;  %v5650_v37 = vadd.f32 %v5649_v18, %v5607_v45  ;;  %v7842_v18 = vld [vmem:[%s10576_s7 + $0x280] ss:$28 sps:$4 sm:$0xff]   ;;  %v7849_v38 = vld [vmem:[%s10576_s7 + $0xac8] ss:$28 sps:$4 sm:$0xff]  }
 0x3f9   :  { %5935 = vmatpush2.bf16.msra.mxu0 %v7777_v50  ;;  %v7826_v50 = vld [vmem:[%s10576_s7 + $0xbe4] ss:$28 sps:$4 sm:$0xff]  }
 0x3fa   :  { %5978 = vmatpush2.bf16.msra.mxu1 %v7780_v51  ;;  %5936 = vmatprep.subr.bf16.mxu0 %v7785_v32  ;;  %v5570_v51 = vadd.f32 %v5569_v14, %v3197_v33  ;;  %v7834_v14 = vld [vmem:[%s10576_s7 + $0xb70] ss:$28 sps:$4 sm:$0xff]  }
 0x3fb   :  { %5979 = vmatprep.subr.bf16.mxu1 %v7788_v52  ;;  %v7827_v52 = vld [vmem:[%s10576_s7 + $0x328] ss:$28 sps:$4 sm:$0xff]  }
 0x3fd   :  { %5937 = vmatpush2.bf16.msra.mxu0 %v7783_v53  ;;  %v5611_v53 = vadd.f32 %v5610_v39, %v5568_v48  ;;  %v7854_v48 = vld [vmem:[%s10576_s7 + $0xa90] ss:$28 sps:$4 sm:$0xff]  }
 0x3fe   :  { %5980 = vmatpush2.bf16.msra.mxu1 %v7786_v56  ;;  %5938 = vmatprep.subr.bf16.mxu0 %v7791_v30  ;;  %v5652_v56 = vadd.f32 %v5651_v35, %v5609_v49  ;;  %v7848_v35 = vld [vmem:[%s10576_s7 + $0x88] ss:$28 sps:$4 sm:$0xff]   ;;  %v7858_v49 = vld [vmem:[%s10576_s7 + $0x18] ss:$28 sps:$4 sm:$0xff]  }
 0x3ff   :  { %5981 = vmatprep.subr.bf16.mxu1 %v7794_v54  ;;  %v7824_v54 = vld [vmem:[%s10576_s7 + $0xbe0] ss:$28 sps:$4 sm:$0xff]   ;;  %v5654_v1 = vadd.f32 %v5653_v47, %v5611_v53  ;;  %v7867_v53 = vld [vmem:[%s10576_s7 + $0xa28] ss:$28 sps:$4 sm:$0xff]  }
 0x401   :  { %5939 = vmatpush2.bf16.msra.mxu0 %v7789_v57 }
 0x402   :  { %5982 = vmatpush2.bf16.msra.mxu1 %v7792_v60  ;;  %5940 = vmatprep.subr.bf16.mxu0 %v7797_v61  ;;  %v7828_v60 = vld [vmem:[%s10576_s7 + $0x168] ss:$28 sps:$4 sm:$0xff]  }
 0x403   :  { %5983 = vmatprep.subr.bf16.mxu1 %v7800_v63  ;;  %v7831_v61 = vld [vmem:[%s10576_s7 + $0xbac] ss:$28 sps:$4 sm:$0xff]   ;;  %v5613_v63 = vadd.f32 %v5612_v46, %v5570_v51  ;;  %v7856_v46 = vld [vmem:[%s10576_s7 + $0xa94] ss:$28 sps:$4 sm:$0xff]  }
 0x404   :  { %v7859_v51 = vld [vmem:[%s10576_s7 + $0xdd8] ss:$28 sps:$4 sm:$0xff]  }
 0x405   :  { %5941 = vmatpush2.bf16.msra.mxu0 %v7795_v2 }
 0x406   :  { %5984 = vmatpush2.bf16.msra.mxu1 %v7798_v3  ;;  %5942 = vmatprep.subr.bf16.mxu0 %v7803_v4  ;;  %v7832_v3 = vld [vmem:[%s10576_s7 + $0x2f0] ss:$28 sps:$4 sm:$0xff]  }
 0x407   :  { %5985 = vmatprep.subr.bf16.mxu1 %v7806_v5  ;;  %v5656_v5 = vadd.f32 %v5655_v55, %v5613_v63  ;;  %v7869_v55 = vld [vmem:[%s10576_s7 + $0xd68] ss:$28 sps:$4 sm:$0xff]   ;;  %v7878_v63 = vld [vmem:[%s10576_s7 + $0x7f8] ss:$28 sps:$4 sm:$0xff]  }
 0x409   :  { %5943 = vmatpush2.bf16.msra.mxu0 %v7801_v8  ;;  %v7829_v8 = vld [vmem:[%s10576_s7 + $0xba8] ss:$28 sps:$4 sm:$0xff]  }
 0x40a   :  { %5986 = vmatpush2.bf16.msra.mxu1 %v7804_v10  ;;  %5944 = vmatprep.subr.bf16.mxu0 %v7809_v11  ;;  %v7836_v10 = vld [vmem:[%s10576_s7 + $0xb74] ss:$28 sps:$4 sm:$0xff]  }
 0x40b   :  { %5987 = vmatprep.subr.bf16.mxu1 %v7812_v12  ;;  %v7837_v12 = vld [vmem:[%s10576_s7 + $0x2b8] ss:$28 sps:$4 sm:$0xff]  }
 0x40d   :  { %5945 = vmatpush2.bf16.msra.mxu0 %v7807_v15  ;;  %v7838_v15 = vld [vmem:[%s10576_s7 + $0xf8] ss:$28 sps:$4 sm:$0xff]  }
 0x40e   :  { %5988 = vmatpush2.bf16.msra.mxu1 %v7810_v19  ;;  %5946 = vmatprep.subr.bf16.mxu0 %v7815_v23  ;;  %v7839_v19 = vld [vmem:[%s10576_s7 + $0xb38] ss:$28 sps:$4 sm:$0xff]   ;;  %v7843_v23 = vld [vmem:[%s10576_s7 + $0xc0] ss:$28 sps:$4 sm:$0xff]  }
 0x40f   :  { %5989 = vmatprep.subr.bf16.mxu1 %v7818_v26  ;;  %v7847_v26 = vld [vmem:[%s10576_s7 + $0x248] ss:$28 sps:$4 sm:$0xff]  }
 0x411   :  { %5947 = vmatpush2.bf16.msra.mxu0 %v7813_v34  ;;  %v7844_v34 = vld [vmem:[%s10576_s7 + $0xb00] ss:$28 sps:$4 sm:$0xff]  }
 0x412   :  { %5990 = vmatpush2.bf16.msra.mxu1 %v7816_v29  ;;  %6002 = vmatprep.subr.bf16.mxu0 %v7821_v41  ;;  %v7851_v29 = vld [vmem:[%s10576_s7 + $0xacc] ss:$28 sps:$4 sm:$0xff]  }
 0x413   :  { %7081 = vmatprep.subr.bf16.mxu1 %v7822_v28 }
 0x414   :  { %5949 = vmatmul.mubr.bf16.vlgmr.msra.gmra.mxu0 %v9355_v44  ;;  %v5692_v32 = vpop.f32.mrf.mxu0 }
 0x415   :  { %5992 = vmatmul.mubr.bf16.vlgmr.msra.gmra.mxu1 %v9533_v9  ;;  %v5693_v30 = vadd.f32 %v5692_v32, %v5650_v37  ;;  %6003 = vmatpush1.bf16.msra.mxu0 %v7819_v42  ;;  %v7853_v42 = vld [vmem:[%s10576_s7 + $0x50] ss:$28 sps:$4 sm:$0xff]   ;;  %v7861_v37 = vld [vmem:[%s10576_s7 + $0xddc] ss:$28 sps:$4 sm:$0xff]  }
 0x416   :  { %6034 = vmatprep.mubr.bf16.mxu0 %v9637_v17  ;;  %7082 = vmatpush3.bf16.msra.mxu1 %v7823_v31  ;;  %v5694_v57 = vpop.f32.mrf.mxu0  ;;  %v7857_v31 = vld [vmem:[%s10576_s7 + $0x1d8] ss:$28 sps:$4 sm:$0xff]   ;;  %v7863_v32 = vld [vmem:[%s10576_s7 + $0x8a0] ss:$28 sps:$4 sm:$0xff]  }
 0x417   :  { %6077 = vmatprep.mubr.bf16.mxu1 %v9169_v0  ;;  %v5695_v2 = vadd.f32 %v5694_v57, %v5652_v56  ;;  %6004 = vmatprep.subr.bf16.mxu0 %v7826_v50  ;;  %7931 = vtanh.f32 %v5693_v30  ;;  %v7833_v0 = vld [vmem:[%s10576_s7 + $0x130] ss:$28 sps:$4 sm:$0xff]   ;;  %v7862_v50 = vld [vmem:[%s10576_s7 + $0xa60] ss:$28 sps:$4 sm:$0xff]   ;;  %v7868_v30 = vld [vmem:[%s10576_s7 + $0x868] ss:$28 sps:$4 sm:$0xff]  }
 0x418   :  { %7083 = vmatprep.subr.bf16.mxu1 %v7827_v52  ;;  %v5696_v4 = vpop.f32.mrf.mxu0  ;;  %v7866_v52 = vld [vmem:[%s10576_s7 + $0xda4] ss:$28 sps:$4 sm:$0xff]   ;;  %v7876_v57 = vld [vmem:[%s10576_s7 + $0xd34] ss:$28 sps:$4 sm:$0xff]  }
 0x419   :  { %7933 = vtanh.f32 %v5695_v2  ;;  %v5697_v6 = vadd.f32 %v5696_v4, %v5654_v1  ;;  %6005 = vmatpush1.bf16.msra.mxu0 %v7824_v54  ;;  %v7864_v56 = vld [vmem:[%s10576_s7 + $0xda0] ss:$28 sps:$4 sm:$0xff]   ;;  %v7871_v54 = vld [vmem:[%s10576_s7 + $0xd6c] ss:$28 sps:$4 sm:$0xff]  }
 0x41a   :  { %7084 = vmatpush3.bf16.msra.mxu1 %v7828_v60  ;;  %v5698_v22 = vpop.f32.mrf.mxu0  ;;  %6006 = vmatprep.subr.bf16.mxu0 %v7831_v61  ;;  %v7877_v60 = vld [vmem:[%s10576_s7 + $0x9b8] ss:$28 sps:$4 sm:$0xff]   ;;  %v7874_v61 = vld [vmem:[%s10576_s7 + $0xd30] ss:$28 sps:$4 sm:$0xff]   ;;  %v7882_v2 = vld [vmem:[%s10576_s7 + $0x980] ss:$28 sps:$4 sm:$0xff]  }
 0x41b   :  { %v5699_v11 = vadd.f32 %v5698_v22, %v5656_v5  ;;  %7085 = vmatprep.subr.bf16.mxu1 %v7832_v3  ;;  %7935 = vtanh.f32 %v5697_v6  ;;  %v7881_v1 = vld [vmem:[%s10576_s7 + $0xcfc] ss:$28 sps:$4 sm:$0xff]   ;;  %v7886_v5 = vld [vmem:[%s10576_s7 + $0xcc4] ss:$28 sps:$4 sm:$0xff]  }
 0x41c   :  { %v7879_v3 = vld [vmem:[%s10576_s7 + $0xcf8] ss:$28 sps:$4 sm:$0xff]   ;;  %v7883_v4 = vld [vmem:[%s10576_s7 + $0x7c0] ss:$28 sps:$4 sm:$0xff]   ;;  %v7887_v6 = vld [vmem:[%s10576_s7 + $0x948] ss:$28 sps:$4 sm:$0xff]  }
 0x41d   :  { %7937 = vtanh.f32 %v5699_v11  ;;  %6007 = vmatpush1.bf16.msra.mxu0 %v7829_v8  ;;  %v7884_v8 = vld [vmem:[%s10576_s7 + $0xcc0] ss:$28 sps:$4 sm:$0xff]   ;;  %v7888_v22 = vld [vmem:[%s10576_s7 + $0x788] ss:$28 sps:$4 sm:$0xff]  }
 0x41e   :  { %7086 = vmatpush3.bf16.msra.mxu1 %v7833_v0  ;;  %6008 = vmatprep.subr.bf16.mxu0 %v7836_v10  ;;  %v7891_v0 = vld [vmem:[%s10576_s7 + $0xc8c] ss:$28 sps:$4 sm:$0xff]  }
 0x41f   :  { %7087 = vmatprep.subr.bf16.mxu1 %v7837_v12  ;;  %v7892_v10 = vld [vmem:[%s10576_s7 + $0x910] ss:$28 sps:$4 sm:$0xff]   ;;  %v7889_v11 = vld [vmem:[%s10576_s7 + $0xc88] ss:$28 sps:$4 sm:$0xff]  }
 0x420   :  { %v7893_v12 = vld [vmem:[%s10576_s7 + $0x750] ss:$28 sps:$4 sm:$0xff]  }
 0x421   :  { %6009 = vmatpush1.bf16.msra.mxu0 %v7834_v14  ;;  %v7896_v14 = vld [vmem:[%s10576_s7 + $0xc54] ss:$28 sps:$4 sm:$0xff]  }
 0x422   :  { %7088 = vmatpush3.bf16.msra.mxu1 %v7838_v15  ;;  %6010 = vmatprep.subr.bf16.mxu0 %v7841_v16  ;;  %v7897_v15 = vld [vmem:[%s10576_s7 + $0x8d8] ss:$28 sps:$4 sm:$0xff]   ;;  %v7894_v16 = vld [vmem:[%s10576_s7 + $0xc50] ss:$28 sps:$4 sm:$0xff]  }
 0x423   :  { %7089 = vmatprep.subr.bf16.mxu1 %v7842_v18  ;;  %v7898_v18 = vld [vmem:[%s10576_s7 + $0x718] ss:$28 sps:$4 sm:$0xff]  }
 0x424   :  { %v7932_v33 = vpop.eup %7931 }
 0x425   :  { %6011 = vmatpush1.bf16.msra.mxu0 %v7839_v19  ;;  %v7899_v19 = vld [vmem:[%s10576_s7 + $0x6e0] ss:$28 sps:$4 sm:$0xff]  }
 0x426   :  { %v7934_v39 = vpop.eup %7933  ;;  %7090 = vmatpush3.bf16.msra.mxu1 %v7843_v23  ;;  %6012 = vmatprep.subr.bf16.mxu0 %v7846_v25  ;;  %v7900_v23 = vld [vmem:[%s10576_s7 + $0x520] ss:$28 sps:$4 sm:$0xff]   ;;  %v7901_v25 = vld [vmem:[%s10576_s7 + $0x6a8] ss:$28 sps:$4 sm:$0xff]  }
 0x427   :  { %v7073_v41 = vpack.c.bf16 %v7934_v39, %v7932_v33  ;;  %7091 = vmatprep.subr.bf16.mxu1 %v7847_v26  ;;  %v7902_v26 = vld [vmem:[%s10576_s7 + $0x4e8] ss:$28 sps:$4 sm:$0xff]   ;;  %v7903_v33 = vld [vmem:[%s10576_s7 + $0x670] ss:$28 sps:$4 sm:$0xff]   ;;  %v7907_v39 = vld [vmem:[%s10576_s7 + $0x600] ss:$28 sps:$4 sm:$0xff]  }
 0x428   :  { %v7936_v28 = vpop.eup %7935 }
 0x429   :  { %6267 = vst [vmem:[%s10579_s9] sm:$0xff] %v7073_v41  ;;  %6013 = vmatpush1.bf16.msra.mxu0 %v7844_v34  ;;  %v7904_v34 = vld [vmem:[%s10576_s7 + $0x4b0] ss:$28 sps:$4 sm:$0xff]   ;;  %v7910_v41 = vld [vmem:[%s10576_s7 + $0x408] ss:$28 sps:$4 sm:$0xff]  }
 0x42a   :  { %v7938_v45 = vpop.eup %7937  ;;  %7092 = vmatpush3.bf16.msra.mxu1 %v7848_v35  ;;  %6014 = vmatprep.subr.bf16.mxu0 %v7851_v29  ;;  %v7908_v35 = vld [vmem:[%s10576_s7 + $0x440] ss:$28 sps:$4 sm:$0xff]   ;;  %v7909_v29 = vld [vmem:[%s10576_s7 + $0x5c8] ss:$28 sps:$4 sm:$0xff]  }
 0x42b   :  { %v7077_v47 = vpack.c.bf16 %v7938_v45, %v7936_v28  ;;  %7093 = vmatprep.subr.bf16.mxu1 %v7852_v40  ;;  %v7911_v40 = vld [vmem:[%s10576_s7 + $0x590] ss:$28 sps:$4 sm:$0xff]   ;;  %v7914_v45 = vld [vmem:[%s10576_s7 + $0x398] ss:$28 sps:$4 sm:$0xff]  }
 0x42c   :  { %v7912_v28 = vld [vmem:[%s10576_s7 + $0x3d0] ss:$28 sps:$4 sm:$0xff]  }
 0x42d   :  { %6272 = vst [vmem:[%s10579_s9 + $0x1c] sm:$0xff] %v7077_v47  ;;  %6015 = vmatpush1.bf16.msra.mxu0 %v7849_v38  ;;  %v7913_v38 = vld [vmem:[%s10576_s7 + $0x558] ss:$28 sps:$4 sm:$0xff]   ;;  %v7917_v47 = vld [vmem:[%s10576_s7 + $0xda8] ss:$28 sps:$4 sm:$0xff]  }
 0x42e   :  { %7094 = vmatpush3.bf16.msra.mxu1 %v7853_v42  ;;  %6016 = vmatprep.subr.bf16.mxu0 %v7856_v46  ;;  %v7915_v42 = vld [vmem:[%s10576_s7 + $0xde0] ss:$28 sps:$4 sm:$0xff]  }
 0x42f   :  { %7095 = vmatprep.subr.bf16.mxu1 %v7857_v31  ;;  %v7916_v46 = vld [vmem:[%s10576_s7 + $0xc20] ss:$28 sps:$4 sm:$0xff]   ;;  %v7918_v31 = vld [vmem:[%s10576_s7 + $0xbe8] ss:$28 sps:$4 sm:$0xff]  }
 0x431   :  { %6017 = vmatpush1.bf16.msra.mxu0 %v7854_v48  ;;  %v7919_v48 = vld [vmem:[%s10576_s7 + $0xd70] ss:$28 sps:$4 sm:$0xff]  }
 0x432   :  { %7096 = vmatpush3.bf16.msra.mxu1 %v7858_v49  ;;  %6018 = vmatprep.subr.bf16.mxu0 %v7861_v37  ;;  %v7920_v49 = vld [vmem:[%s10576_s7 + $0xbb0] ss:$28 sps:$4 sm:$0xff]   ;;  %v5735_v37 = vpop.f32.mrf.mxu1 }
 0x433   :  { %7125 = vmatprep.subr.bf16.mxu1 %v7862_v50  ;;  %v7923_v50 = vld [vmem:[%s10576_s7 + $0xd00] ss:$28 sps:$4 sm:$0xff]  }
 0x435   :  { %6078 = vmatmul.mubr.bf16.vlgmr.msra.gmra.mxu1 %v9316_v62  ;;  %6019 = vmatpush2.bf16.msra.mxu0 %v7859_v51  ;;  %v7872_v62 = vld [vmem:[%s10576_s7 + $0x9f0] ss:$28 sps:$4 sm:$0xff]   ;;  %v7924_v51 = vld [vmem:[%s10576_s7 + $0xb40] ss:$28 sps:$4 sm:$0xff]  }
 0x436   :  { %7126 = vmatpush3.bf16.msra.mxu1 %v7863_v32  ;;  %6159 = vmatprep.mubr.bf16.mxu1 %v9528_v7  ;;  %v7873_v7 = vld [vmem:[%s10576_s7 + $0x830] ss:$28 sps:$4 sm:$0xff]   ;;  %v5737_v32 = vpop.f32.mrf.mxu1 }
 0x437   :  { %6020 = vmatprep.subr.bf16.mxu0 %v7866_v52  ;;  %7127 = vmatprep.subr.bf16.mxu1 %v7867_v53  ;;  %v7925_v52 = vld [vmem:[%s10576_s7 + $0xcc8] ss:$28 sps:$4 sm:$0xff]  }
 0x438   :  { %v7926_v53 = vld [vmem:[%s10576_s7 + $0xb08] ss:$28 sps:$4 sm:$0xff]  }
 0x439   :  { %6021 = vmatpush2.bf16.msra.mxu0 %v7864_v56  ;;  %v5739_v56 = vpop.f32.mrf.mxu1 }
 0x43a   :  { %7128 = vmatpush3.bf16.msra.mxu1 %v7868_v30  ;;  %6022 = vmatprep.subr.bf16.mxu0 %v7871_v54  ;;  %v7927_v54 = vld [vmem:[%s10576_s7 + $0xc90] ss:$28 sps:$4 sm:$0xff]  }
 0x43b   :  { %7129 = vmatprep.subr.bf16.mxu1 %v7872_v62  ;;  %v3201_v62 = vrot.slane %v10209_v13, %v8494_v59  ;;  %v7930_v59 = vld [vmem:[%s10576_s7 + $0xa98] ss:$28 sps:$4 sm:$0xff]  }
 0x43d   :  { %6023 = vmatpush2.bf16.msra.mxu0 %v7869_v55  ;;  %v7928_v55 = vld [vmem:[%s10576_s7 + $0xad0] ss:$28 sps:$4 sm:$0xff]  }
 0x43e   :  { %7130 = vmatpush3.bf16.msra.mxu1 %v7873_v7  ;;  %6024 = vmatprep.subr.bf16.mxu0 %v7876_v57  ;;  %v5741_v7 = vpop.f32.mrf.mxu1 }
 0x43f   :  { %7131 = vmatprep.subr.bf16.mxu1 %v7877_v60  ;;  %v7929_v60 = vld [vmem:[%s10576_s7 + $0xc58] ss:$28 sps:$4 sm:$0xff]  }
 0x441   :  { %6025 = vmatpush2.bf16.msra.mxu0 %v7874_v61  ;;  %v3205_v61 = vrot.slane %v10209_v13, %v8491_v58 }
 0x442   :  { %7132 = vmatpush3.bf16.msra.mxu1 %v7878_v63  ;;  %6026 = vmatprep.subr.bf16.mxu0 %v7881_v1  ;;  %v5736_v1 = vadd.f32 %v5735_v37, %v3201_v62 }
 0x443   :  { %7133 = vmatprep.subr.bf16.mxu1 %v7882_v2 }
 0x445   :  { %6027 = vmatpush2.bf16.msra.mxu0 %v7879_v3  ;;  %v5738_v3 = vadd.f32 %v5737_v32, %v3205_v61 }
 0x446   :  { %7134 = vmatpush3.bf16.msra.mxu1 %v7883_v4  ;;  %6028 = vmatprep.subr.bf16.mxu0 %v7886_v5 }
 0x447   :  { %7135 = vmatprep.subr.bf16.mxu1 %v7887_v6  ;;  %v5740_v6 = vadd.f32 %v5739_v56, %v3201_v62 }
 0x449   :  { %6029 = vmatpush2.bf16.msra.mxu0 %v7884_v8 }
 0x44a   :  { %7136 = vmatpush3.bf16.msra.mxu1 %v7888_v22  ;;  %6030 = vmatprep.subr.bf16.mxu0 %v7891_v0  ;;  %v5742_v0 = vadd.f32 %v5741_v7, %v3205_v61 }
 0x44b   :  { %7137 = vmatprep.subr.bf16.mxu1 %v7892_v10 }
 0x44d   :  { %6031 = vmatpush2.bf16.msra.mxu0 %v7889_v11 }
 0x44e   :  { %7138 = vmatpush3.bf16.msra.mxu1 %v7893_v12  ;;  %6032 = vmatprep.subr.bf16.mxu0 %v7896_v14 }
 0x44f   :  { %7139 = vmatprep.subr.bf16.mxu1 %v7897_v15 }
 0x451   :  { %6033 = vmatpush2.bf16.msra.mxu0 %v7894_v16 }
 0x452   :  { %7140 = vmatpush3.bf16.msra.mxu1 %v7898_v18  ;;  %7103 = vmatprep.subr.bf16.mxu0 %v7899_v19 }
 0x454   :  { %6035 = vmatmul.mubr.bf16.vlgmr.msra.gmra.mxu0 %v9645_v20  ;;  %v5778_v30 = vpop.f32.mrf.mxu0  ;;  %v5821_v63 = vpop.f32.mrf.mxu1 }
 0x455   :  { %6160 = vmatmul.mubr.bf16.vlgmr.msra.gmra.mxu1 %v9533_v9  ;;  %7104 = vmatpush3.bf16.msra.mxu0 %v7900_v23  ;;  %v7905_v9 = vld [vmem:[%s10576_s7 + $0x638] ss:$28 sps:$4 sm:$0xff]   ;;  %v5779_v4 = vadd.f32 %v5778_v30, %v5736_v1 }
 0x456   :  { %6118 = vmatprep.mubr.bf16.mxu0 %v9353_v43  ;;  %7105 = vmatprep.subr.bf16.mxu0 %v7901_v25  ;;  %v7906_v43 = vld [vmem:[%s10576_s7 + $0x478] ss:$28 sps:$4 sm:$0xff]   ;;  %v5780_v57 = vpop.f32.mrf.mxu0  ;;  %v5823_v5 = vpop.f32.mrf.mxu1 }
 0x457   :  { %v5781_v8 = vadd.f32 %v5780_v57, %v5738_v3  ;;  %v5822_v10 = vadd.f32 %v5821_v63, %v5779_v4 }
 0x458   :  { %v5782_v2 = vpop.f32.mrf.mxu0  ;;  %v5825_v58 = vpop.f32.mrf.mxu1 }
 0x459   :  { %7106 = vmatpush3.bf16.msra.mxu0 %v7902_v26  ;;  %v5783_v11 = vadd.f32 %v5782_v2, %v5740_v6  ;;  %v5824_v14 = vadd.f32 %v5823_v5, %v5781_v8 }
 0x45a   :  { %7107 = vmatprep.subr.bf16.mxu0 %v7903_v33  ;;  %v5784_v22 = vpop.f32.mrf.mxu0  ;;  %v5827_v25 = vpop.f32.mrf.mxu1 }
 0x45b   :  { %v5785_v15 = vadd.f32 %v5784_v22, %v5742_v0  ;;  %v5826_v19 = vadd.f32 %v5825_v58, %v5783_v11 }
 0x45d   :  { %7108 = vmatpush3.bf16.msra.mxu0 %v7904_v34  ;;  %v5828_v33 = vadd.f32 %v5827_v25, %v5785_v15 }
 0x45e   :  { %7109 = vmatprep.subr.bf16.mxu0 %v7905_v9 }
 0x461   :  { %7110 = vmatpush3.bf16.msra.mxu0 %v7906_v43 }
 0x462   :  { %7111 = vmatprep.subr.bf16.mxu0 %v7907_v39 }
 0x465   :  { %7112 = vmatpush3.bf16.msra.mxu0 %v7908_v35 }
 0x466   :  { %7113 = vmatprep.subr.bf16.mxu0 %v7909_v29 }
 0x469   :  { %7114 = vmatpush3.bf16.msra.mxu0 %v7910_v41 }
 0x46a   :  { %7115 = vmatprep.subr.bf16.mxu0 %v7911_v40 }
 0x46d   :  { %7116 = vmatpush3.bf16.msra.mxu0 %v7912_v28 }
 0x46e   :  { %7117 = vmatprep.subr.bf16.mxu0 %v7913_v38 }
 0x471   :  { %7118 = vmatpush3.bf16.msra.mxu0 %v7914_v45 }
 0x472   :  { %7147 = vmatprep.subr.bf16.mxu0 %v7915_v42 }
 0x474   :  { %6119 = vmatmul.mubr.bf16.vlgmr.msra.gmra.mxu0 %v9355_v44  ;;  %v7921_v44 = vld [vmem:[%s10576_s7 + $0xd38] ss:$28 sps:$4 sm:$0xff]  }
 0x475   :  { %7148 = vmatpush3.bf16.msra.mxu0 %v7916_v46  ;;  %6200 = vmatprep.mubr.bf16.mxu0 %v9637_v17  ;;  %v7922_v17 = vld [vmem:[%s10576_s7 + $0xb78] ss:$28 sps:$4 sm:$0xff]   ;;  %v3209_v46 = vrot.slane %v10209_v13, %v990_v21 }
 0x476   :  { %7149 = vmatprep.subr.bf16.mxu0 %v7917_v47 }
 0x479   :  { %7150 = vmatpush3.bf16.msra.mxu0 %v7918_v31 }
 0x47a   :  { %7151 = vmatprep.subr.bf16.mxu0 %v7919_v48  ;;  %v3213_v48 = vrot.slane %v10209_v13, %v994_v24 }
 0x47d   :  { %7152 = vmatpush3.bf16.msra.mxu0 %v7920_v49 }
 0x47e   :  { %7153 = vmatprep.subr.bf16.mxu0 %v7921_v44 }
 0x481   :  { %7154 = vmatpush3.bf16.msra.mxu0 %v7922_v17 }
 0x482   :  { %7155 = vmatprep.subr.bf16.mxu0 %v7923_v50 }
 0x485   :  { %7156 = vmatpush3.bf16.msra.mxu0 %v7924_v51 }
 0x486   :  { %7157 = vmatprep.subr.bf16.mxu0 %v7925_v52 }
 0x489   :  { %7158 = vmatpush3.bf16.msra.mxu0 %v7926_v53 }
 0x48a   :  { %7159 = vmatprep.subr.bf16.mxu0 %v7927_v54 }
 0x48d   :  { %7160 = vmatpush3.bf16.msra.mxu0 %v7928_v55 }
 0x48e   :  { %7161 = vmatprep.subr.bf16.mxu0 %v7929_v60 }
 0x491   :  { %7162 = vmatpush3.bf16.msra.mxu0 %v7930_v59 }
 0x494   :  { %v5864_v12 = vpop.f32.mrf.mxu0  ;;  %6201 = vmatmul.mubr.bf16.vlgmr.msra.gmra.mxu0 %v9645_v20 }
 0x495   :  { %v5865_v16 = vadd.f32 %v5864_v12, %v5822_v10  ;;  %v5907_v28 = vpop.f32.mrf.mxu1 }
 0x496   :  { %v5866_v18 = vpop.f32.mrf.mxu0  ;;  %v5908_v44 = vadd.f32 %v5907_v28, %v3209_v46 }
 0x497   :  { %v5867_v23 = vadd.f32 %v5866_v18, %v5824_v14  ;;  %7939 = vtanh.f32 %v5865_v16  ;;  %v5909_v38 = vpop.f32.mrf.mxu1 }
 0x498   :  { %v5868_v26 = vpop.f32.mrf.mxu0  ;;  %v5910_v37 = vadd.f32 %v5909_v38, %v3213_v48 }
 0x499   :  { %7941 = vtanh.f32 %v5867_v23  ;;  %v5869_v34 = vadd.f32 %v5868_v26, %v5826_v19  ;;  %v5911_v45 = vpop.f32.mrf.mxu1  ;;  %v3217_v23 = vrot.slane %v10209_v13, %v998_v36 }
 0x49a   :  { %v5870_v9 = vpop.f32.mrf.mxu0  ;;  %v5912_v32 = vadd.f32 %v5911_v45, %v3209_v46 }
 0x49b   :  { %v5871_v43 = vadd.f32 %v5870_v9, %v5828_v33  ;;  %7943 = vtanh.f32 %v5869_v34  ;;  %v5913_v47 = vpop.f32.mrf.mxu1 }
 0x49c   :  { %v5914_v56 = vadd.f32 %v5913_v47, %v3213_v48 }
 0x49d   :  { %7945 = vtanh.f32 %v5871_v43 }
 0x4a4   :  { %v7940_v39 = vpop.eup %7939 }
 0x4a6   :  { %v7942_v35 = vpop.eup %7941 }
 0x4a7   :  { %v7074_v29 = vpack.c.bf16 %v7942_v35, %v7940_v39 }
 0x4a8   :  { %v7944_v20 = vpop.eup %7943 }
 0x4a9   :  { %6268 = vst [vmem:[%s10579_s9 + $0x8] sm:$0xff] %v7074_v29 }
 0x4aa   :  { %v7946_v41 = vpop.eup %7945 }
 0x4ab   :  { %v7078_v40 = vpack.c.bf16 %v7946_v41, %v7944_v20 }
 0x4ad   :  { %6273 = vst [vmem:[%s10579_s9 + $0x24] sm:$0xff] %v7078_v40 }
 0x4d4   :  { %v5950_v42 = vpop.f32.mrf.mxu0 }
 0x4d5   :  { %v5993_v49 = vpop.f32.mrf.mxu1  ;;  %v5951_v50 = vadd.f32 %v5950_v42, %v5908_v44 }
 0x4d6   :  { %v5952_v31 = vpop.f32.mrf.mxu0 }
 0x4d7   :  { %v5995_v51 = vpop.f32.mrf.mxu1  ;;  %v5953_v52 = vadd.f32 %v5952_v31, %v5910_v37  ;;  %v5994_v30 = vadd.f32 %v5993_v49, %v5951_v50 }
 0x4d8   :  { %v5954_v17 = vpop.f32.mrf.mxu0 }
 0x4d9   :  { %v5955_v54 = vadd.f32 %v5954_v17, %v5912_v32  ;;  %v5997_v62 = vpop.f32.mrf.mxu1  ;;  %v5996_v55 = vadd.f32 %v5995_v51, %v5953_v52 }
 0x4da   :  { %v5956_v53 = vpop.f32.mrf.mxu0 }
 0x4db   :  { %v5957_v7 = vadd.f32 %v5956_v53, %v5914_v56  ;;  %v5998_v61 = vadd.f32 %v5997_v62, %v5955_v54  ;;  %v5999_v63 = vpop.f32.mrf.mxu1 }
 0x4dd   :  { %v6000_v59 = vadd.f32 %v5999_v63, %v5957_v7 }
 0x4f5   :  { %v7097_v11 = vpop.f32.mrf.mxu1 }
 0x4f7   :  { %v7098_v58 = vpop.f32.mrf.mxu1 }
 0x4f8   :  { %v7099_v25 = vadd.f32 %v7098_v58, %v7097_v11 }
 0x4f9   :  { %v7100_v12 = vpop.f32.mrf.mxu1 }
 0x4fa   :  { %v6080_v9 = vadd.f32 %v7099_v25, %v3217_v23 }
 0x4fb   :  { %v7101_v15 = vpop.f32.mrf.mxu1 }
 0x4fc   :  { %v7102_v43 = vadd.f32 %v7101_v15, %v7100_v12 }
 0x4fe   :  { %v6083_v41 = vadd.f32 %v7102_v43, %v3217_v23 }
 0x514   :  { %v6036_v21 = vpop.f32.mrf.mxu0 }
 0x515   :  { %v6037_v57 = vadd.f32 %v6036_v21, %v5994_v30  ;;  %v7141_v18 = vpop.f32.mrf.mxu1 }
 0x516   :  { %v6038_v60 = vpop.f32.mrf.mxu0 }
 0x517   :  { %v6039_v24 = vadd.f32 %v6038_v60, %v5996_v55  ;;  %7947 = vtanh.f32 %v6037_v57  ;;  %v7142_v26 = vpop.f32.mrf.mxu1 }
 0x518   :  { %v6040_v1 = vpop.f32.mrf.mxu0  ;;  %v7143_v40 = vadd.f32 %v7142_v26, %v7141_v18 }
 0x519   :  { %7949 = vtanh.f32 %v6039_v24  ;;  %v6041_v2 = vadd.f32 %v6040_v1, %v5998_v61  ;;  %v7144_v39 = vpop.f32.mrf.mxu1 }
 0x51a   :  { %v6042_v3 = vpop.f32.mrf.mxu0 }
 0x51b   :  { %v6043_v4 = vadd.f32 %v6042_v3, %v6000_v59  ;;  %7951 = vtanh.f32 %v6041_v2  ;;  %v7145_v28 = vpop.f32.mrf.mxu1 }
 0x51c   :  { %v7146_v47 = vadd.f32 %v7145_v28, %v7144_v39 }
 0x51d   :  { %7953 = vtanh.f32 %v6043_v4 }
 0x524   :  { %v7948_v5 = vpop.eup %7947 }
 0x526   :  { %v7950_v6 = vpop.eup %7949 }
 0x527   :  { %v7075_v8 = vpack.c.bf16 %v7950_v6, %v7948_v5 }
 0x528   :  { %v7952_v22 = vpop.eup %7951 }
 0x529   :  { %6269 = vst [vmem:[%s10579_s9 + $0x10] sm:$0xff] %v7075_v8 }
 0x52a   :  { %v7954_v0 = vpop.eup %7953 }
 0x52b   :  { %v7079_v10 = vpack.c.bf16 %v7954_v0, %v7952_v22 }
 0x52d   :  { %6274 = vst [vmem:[%s10579_s9 + $0x2c] sm:$0xff] %v7079_v10 }
 0x534   :  { %v7119_v14 = vpop.f32.mrf.mxu0 }
 0x536   :  { %v7120_v16 = vpop.f32.mrf.mxu0 }
 0x537   :  { %v7121_v33 = vadd.f32 %v7120_v16, %v7119_v14 }
 0x538   :  { %v7122_v19 = vpop.f32.mrf.mxu0 }
 0x539   :  { %v6121_v35 = vadd.f32 %v7121_v33, %v6080_v9 }
 0x53a   :  { %v7123_v34 = vpop.f32.mrf.mxu0 }
 0x53b   :  { %v7124_v29 = vadd.f32 %v7123_v34, %v7122_v19  ;;  %v6162_v42 = vadd.f32 %v7143_v40, %v6121_v35 }
 0x53d   :  { %v6124_v45 = vadd.f32 %v7124_v29, %v6083_v41 }
 0x53f   :  { %v6165_v31 = vadd.f32 %v7146_v47, %v6124_v45 }
 0x554   :  { %v7163_v20 = vpop.f32.mrf.mxu0 }
 0x556   :  { %v7164_v38 = vpop.f32.mrf.mxu0 }
 0x557   :  { %v7165_v46 = vadd.f32 %v7164_v38, %v7163_v20 }
 0x558   :  { %v7166_v27 = vpop.f32.mrf.mxu0 }
 0x559   :  { %v6203_v36 = vadd.f32 %v7165_v46, %v6162_v42 }
 0x55a   :  { %v7167_v13 = vpop.f32.mrf.mxu0 }
 0x55b   :  { %7955 = vtanh.f32 %v6203_v36  ;;  %v7168_v48 = vadd.f32 %v7167_v13, %v7166_v27 }
 0x55d   :  { %v6206_v49 = vadd.f32 %v7168_v48, %v6165_v31 }
 0x55f   :  { %7957 = vtanh.f32 %v6206_v49 }
 0x568   :  { %v7956_v44 = vpop.eup %7955 }
 0x569   :  { %v7076_v17 = vpack.c.bf16 %v7956_v44, %v7956_v44 }
 0x56b   :  { %6271 = vst.msk [vmem:[%s10579_s9 + $0x18] sm:$0xf] %vm6270_vm0, %v7076_v17 }
 0x56c   :  { %v7958_v37 = vpop.eup %7957 }
 0x56d   :  { %v7080_v50 = vpack.c.bf16 %v7958_v37, %v7958_v37 }
 0x56f   :  { %6275 = vst.msk [vmem:[%s10579_s9 + $0x34] sm:$0xf] %vm6270_vm0, %v7080_v50 }

</bundles_post_ra>
